<compile_context>
chip_gen: v7x
topology: tpu7x:2x2x1
jax: 0.10.0
libtpu: 0.0.40
codegen_flags: <defaults>
</compile_context>

<pallas_src>
import functools
import math

import jax
import jax.numpy as jnp
from jax import lax
from jax.experimental import pallas as pl
from jax.experimental.pallas import tpu as pltpu

jax.config.update("jax_default_matmul_precision", "highest")

# ----------------------------- small config ---------------------------------
N_BATCH = 2
IMG = (16, 16, 16)            # input spatial size (D, H, W)
IN_CH = 2                     # moving + fixed image channels
ENC_CH = (4, 8, 16)           # config.encoder_channels
DOWN_NUM = 2                  # config.down_num
DOWN_FACTOR = 2               # config.down_factor (CNN downsamples by 2**2)
PATCH = (2, 2, 2)             # config.patches['size']
HIDDEN = 32                   # config.hidden_size
NUM_HEADS = 4                 # config.transformer['num_heads']
HEAD_DIM = HIDDEN // NUM_HEADS
MLP_DIM = 64                  # config.transformer['mlp_dim']
NUM_LAYERS = 2                # config.transformer['num_layers']
N_PATCHES = int(IMG[0] / 2 ** DOWN_FACTOR // PATCH[0]
                * (IMG[1] / 2 ** DOWN_FACTOR // PATCH[1])
                * (IMG[2] / 2 ** DOWN_FACTOR // PATCH[2]))          # = 8

_INV_SQRT2 = 0.7071067811865476


def _erf_approx(x):
    """Abramowitz-Stegun 7.1.26 erf (max abs err ~1.5e-7). Safe to lower."""
    a1, a2, a3, a4, a5 = (0.254829592, -0.284496736, 1.421413741,
                          -1.453152027, 1.061405429)
    p = 0.3275911
    s = jnp.where(x >= 0, 1.0, -1.0)
    ax = jnp.abs(x)
    t = 1.0 / (1.0 + p * ax)
    poly = ((((a5 * t + a4) * t + a3) * t + a2) * t + a1) * t
    return s * (1.0 - poly * jnp.exp(-ax * ax))


def _gelu_exact(x):
    return 0.5 * x * (1.0 + _erf_approx(x * _INV_SQRT2))


# ---------------------------------------------------------------------------
# Pallas kernel 1: channels-first conv matmul (+ bias + LeakyReLU + InstanceNorm)
#   x_col : (Nb, K, P)  (im2col patches, K = Cin*k^3, P = D*H*W)
#   w     : (Co, K)
#   b     : (Co, 1)
#   out   : (Nb, Co, P)
# Grid iterates over the batch; each step holds the full spatial extent so the
# InstanceNorm reduction is exact.
# ---------------------------------------------------------------------------
def _conv_kernel(x_ref, w_ref, b_ref, o_ref, *, act, fuse_inorm):
    y = jnp.dot(w_ref[...], x_ref[0], preferred_element_type=jnp.float32)
    y = y + b_ref[...]
    if act == "leaky_relu":
        y = jnp.where(y >= 0, y, 0.01 * y)
    if fuse_inorm:  # InstanceNorm3d(affine=False), eps=1e-5, biased var
        mu = jnp.mean(y, axis=-1, keepdims=True)
        yc = y - mu
        var = jnp.mean(yc * yc, axis=-1, keepdims=True)
        y = yc * lax.rsqrt(var + 1e-5)
    o_ref[0] = y


def conv_matmul_pallas(x_col, w2d, b, *, act=None, fuse_inorm=False):
    nb, k, p = x_col.shape
    co = w2d.shape[0]
    kernel = functools.partial(_conv_kernel, act=act, fuse_inorm=fuse_inorm)
    return pl.pallas_call(
        kernel,
        out_shape=jax.ShapeDtypeStruct((nb, co, p), jnp.float32),
        grid_spec=pltpu.PrefetchScalarGridSpec(
            num_scalar_prefetch=0,
            grid=(nb,),
            in_specs=[
                pl.BlockSpec((1, k, p), lambda n: (n, 0, 0)),
                pl.BlockSpec((co, k), lambda n: (0, 0)),
                pl.BlockSpec((co, 1), lambda n: (0, 0)),
            ],
            out_specs=pl.BlockSpec((1, co, p), lambda n: (n, 0, 0)),
        ),
        compiler_params=pltpu.CompilerParams(
            dimension_semantics=("parallel",)),
    )(x_col, w2d, b.reshape(co, 1))


def conv_matmul_ref(x_col, w2d, b, *, act=None, fuse_inorm=False):
    y = jnp.einsum("ok,nkp->nop", w2d, x_col,
                   precision=lax.Precision.HIGHEST)
    y = y + b[None, :, None]
    if act == "leaky_relu":
        y = jnp.where(y >= 0, y, 0.01 * y)
    if fuse_inorm:
        mu = jnp.mean(y, axis=-1, keepdims=True)
        yc = y - mu
        var = jnp.mean(yc * yc, axis=-1, keepdims=True)
        y = yc * lax.rsqrt(var + 1e-5)
    return y


# ---------------------------------------------------------------------------
# Pallas kernel 2: fused ViT encoder (all layers + final LayerNorm), per batch.
# ---------------------------------------------------------------------------
def _encoder_kernel(x_ref, ln1g_ref, ln1b_ref, wq_ref, bq_ref, wk_ref, bk_ref,
                    wv_ref, bv_ref, wo_ref, bo_ref, ln2g_ref, ln2b_ref,
                    w1_ref, b1_ref, w2_ref, b2_ref, lnfg_ref, lnfb_ref,
                    o_ref, *, num_layers, num_heads, head_dim):
    f32 = jnp.float32
    x = x_ref[0]                                  # (S, H)
    s_len, h_dim = x.shape
    scale = 1.0 / math.sqrt(head_dim)

    def mm(a, b):
        return jnp.dot(a, b, preferred_element_type=f32)

    def layer_norm(v, g, b):                      # eps = 1e-6 (PyTorch LayerNorm)
        mu = jnp.mean(v, axis=-1, keepdims=True)
        vc = v - mu
        var = jnp.mean(vc * vc, axis=-1, keepdims=True)
        return vc * lax.rsqrt(var + 1e-6) * g + b

    # Per-head selection matrices (built once from 2-D iota; extraction and
    # scatter-back of head columns become tiny MXU matmuls -> no lane slicing
    # or concatenation needed inside the kernel).
    sels, sel_ts = [], []
    for hd in range(num_heads):
        r = lax.broadcasted_iota(jnp.int32, (h_dim, head_dim), 0)
        c = lax.broadcasted_iota(jnp.int32, (h_dim, head_dim), 1)
        sels.append((r == c + hd * head_dim).astype(f32))        # (H, Dh)
        r2 = lax.broadcasted_iota(jnp.int32, (head_dim, h_dim), 0)
        c2 = lax.broadcasted_iota(jnp.int32, (head_dim, h_dim), 1)
        sel_ts.append((c2 == r2 + hd * head_dim).astype(f32))    # (Dh, H)

    ln1g, ln1b = ln1g_ref[...], ln1b_ref[...]
    wq, bq = wq_ref[...], bq_ref[...]
    wk, bk = wk_ref[...], bk_ref[...]
    wv, bv = wv_ref[...], bv_ref[...]
    wo, bo = wo_ref[...], bo_ref[...]
    ln2g, ln2b = ln2g_ref[...], ln2b_ref[...]
    w1, b1 = w1_ref[...], b1_ref[...]
    w2, b2 = w2_ref[...], b2_ref[...]

    for l in range(num_layers):
        # --- attention sub-block -------------------------------------------
        res = x
        xn = layer_norm(x, ln1g[l:l + 1, :], ln1b[l:l + 1, :])
        q = mm(xn, wq[l]) + bq[l:l + 1, :]
        k = mm(xn, wk[l]) + bk[l:l + 1, :]
        v = mm(xn, wv[l]) + bv[l:l + 1, :]
        ctx = jnp.zeros_like(xn)
        for hd in range(num_heads):
            qh = mm(q, sels[hd])                  # (S, Dh)
            kh = mm(k, sels[hd])
            vh = mm(v, sels[hd])
            sc = jnp.dot(qh, kh.T, preferred_element_type=f32) * scale
            sc = sc - jnp.max(sc, axis=-1, keepdims=True)
            pr = jnp.exp(sc)
            pr = pr / jnp.sum(pr, axis=-1, keepdims=True)
            ctx = ctx + mm(mm(pr, vh), sel_ts[hd])
        x = res + mm(ctx, wo[l]) + bo[l:l + 1, :]
        # --- MLP sub-block --------------------------------------------------
        res = x
        xn = layer_norm(x, ln2g[l:l + 1, :], ln2b[l:l + 1, :])
        y = mm(xn, w1[l]) + b1[l:l + 1, :]
        y = _gelu_exact(y)
        y = mm(y, w2[l]) + b2[l:l + 1, :]
        x = res + y

    x = layer_norm(x, lnfg_ref[...], lnfb_ref[...])
    o_ref[0] = x


def encoder_pallas(x, p):
    nb, s_len, h_dim = x.shape
    weights = [p["ln1_g"], p["ln1_b"], p["wq"], p["bq"], p["wk"], p["bk"],
               p["wv"], p["bv"], p["wo"], p["bo"], p["ln2_g"], p["ln2_b"],
               p["w1"], p["b1"], p["w2"], p["b2"], p["lnf_g"], p["lnf_b"]]

    def full_spec(a):
        nd = a.ndim
        return pl.BlockSpec(a.shape, lambda n, _nd=nd: (0,) * _nd)

    in_specs = ([pl.BlockSpec((1, s_len, h_dim), lambda n: (n, 0, 0))]
                + [full_spec(a) for a in weights])
    kernel = functools.partial(_encoder_kernel, num_layers=NUM_LAYERS,
                               num_heads=NUM_HEADS, head_dim=HEAD_DIM)
    return pl.pallas_call(
        kernel,
        out_shape=jax.ShapeDtypeStruct((nb, s_len, h_dim), jnp.float32),
        grid_spec=pltpu.PrefetchScalarGridSpec(
            num_scalar_prefetch=0,
            grid=(nb,),
            in_specs=in_specs,
            out_specs=pl.BlockSpec((1, s_len, h_dim), lambda n: (n, 0, 0)),
        ),
        compiler_params=pltpu.CompilerParams(
            dimension_semantics=("parallel",)),
    )(x, *weights)


def encoder_ref(x, p):
    nb, s_len, h_dim = x.shape

    def ln(v, g, b):
        mu = jnp.mean(v, axis=-1, keepdims=True)
        vc = v - mu
        var = jnp.mean(vc * vc, axis=-1, keepdims=True)
        return vc * lax.rsqrt(var + 1e-6) * g + b

    def split_heads(t):
        return t.reshape(nb, s_len, NUM_HEADS, HEAD_DIM).transpose(0, 2, 1, 3)

    for l in range(NUM_LAYERS):
        res = x
        xn = ln(x, p["ln1_g"][l], p["ln1_b"][l])
        q = split_heads(jnp.dot(xn, p["wq"][l]) + p["bq"][l])
        k = split_heads(jnp.dot(xn, p["wk"][l]) + p["bk"][l])
        v = split_heads(jnp.dot(xn, p["wv"][l]) + p["bv"][l])
        sc = jnp.einsum("bhqd,bhkd->bhqk", q, k) / math.sqrt(HEAD_DIM)
        pr = jax.nn.softmax(sc, axis=-1)
        ctx = jnp.einsum("bhqk,bhkd->bhqd", pr, v)
        ctx = ctx.transpose(0, 2, 1, 3).reshape(nb, s_len, h_dim)
        x = res + jnp.dot(ctx, p["wo"][l]) + p["bo"][l]
        res = x
        xn = ln(x, p["ln2_g"][l], p["ln2_b"][l])
        y = jnp.dot(xn, p["w1"][l]) + p["b1"][l]
        y = _gelu_exact(y)
        y = jnp.dot(y, p["w2"][l]) + p["b2"][l]
        x = res + y
    return ln(x, p["lnf_g"][0], p["lnf_b"][0])


# ---------------------------------------------------------------------------
# Wrapper-side data movement: im2col / patch extraction / maxpool (pure XLA).
# ---------------------------------------------------------------------------
def im2col_3x3x3(x):                       # (N, C, D, H, W) -> (N, C*27, DHW)
    nb, c, d, h, w = x.shape
    xp = jnp.pad(x, ((0, 0), (0, 0), (1, 1), (1, 1), (1, 1)))
    cols = []
    for kd in range(3):
        for kh in range(3):
            for kw in range(3):
                cols.append(xp[:, :, kd:kd + d, kh:kh + h, kw:kw + w])
    pat = jnp.stack(cols, axis=2)          # (N, C, 27, D, H, W)
    return pat.reshape(nb, c * 27, d * h * w)


def im2col_patch2(x):                      # k=2, s=2 -> (N, C*8, (D/2)(H/2)(W/2))
    nb, c, d, h, w = x.shape
    xr = x.reshape(nb, c, d // 2, 2, h // 2, 2, w // 2, 2)
    xr = xr.transpose(0, 1, 3, 5, 7, 2, 4, 6)   # (N, C, kd, kh, kw, d, h, w)
    return xr.reshape(nb, c * 8, (d // 2) * (h // 2) * (w // 2))


def maxpool2(x):                           # MaxPool3d(2)
    nb, c, d, h, w = x.shape
    return x.reshape(nb, c, d // 2, 2, h // 2, 2, w // 2, 2).max(axis=(3, 5, 7))


def double_conv(x5d, p, conv_apply):
    """(Conv3d k3 p1 -> LeakyReLU -> InstanceNorm3d) * 2."""
    y = x5d
    for wname, bname in (("w1", "b1"), ("w2", "b2")):
        w, b = p[wname], p[bname]
        nb, ci, d, h, wd = y.shape
        co = w.shape[0]
        x_col = im2col_3x3x3(y)
        z = conv_apply(x_col, w.reshape(co, ci * 27), b,
                       act="leaky_relu", fuse_inorm=True)
        y = z.reshape(nb, co, d, h, wd)
    return y


# ---------------------------------------------------------------------------
# Full Transformer.forward
# ---------------------------------------------------------------------------
def transformer_forward(params, x, use_pallas=True):
    conv_apply = conv_matmul_pallas if use_pallas else conv_matmul_ref

    # --- CNNEncoder ---------------------------------------------------------
    feats_list = []
    x1 = double_conv(x, params["inc"], conv_apply)
    feats_list.append(x1)
    x2 = double_conv(maxpool2(x1), params["down1"], conv_apply)
    feats_list.append(x2)
    feats = double_conv(maxpool2(x2), params["down2"], conv_apply)
    feats_list.append(feats)
    fd = feats
    for _ in range(DOWN_NUM):
        fd = maxpool2(fd)
        feats_list.append(fd)
    features = feats_list[::-1]

    # --- Embeddings: patch Conv3d(k=2, s=2) -> flatten -> +pos -> dropout ---
    nb = feats.shape[0]
    x_col = im2col_patch2(feats)
    pw = params["patch_w"].reshape(HIDDEN, -1)
    y = conv_apply(x_col, pw, params["patch_b"], act=None, fuse_inorm=False)
    emb = jnp.transpose(y, (0, 2, 1)) + params["pos_emb"]   # (N, n_patches, H)

    # --- ViT encoder ---------------------------------------------------------
    if use_pallas:
        encoded = encoder_pallas(emb, params["enc"])
    else:
        encoded = encoder_ref(emb, params["enc"])
    attn_weights = []          # vis = False
    return encoded, attn_weights, features


# ---------------------------------------------------------------------------
# Deterministic parameter construction
# ---------------------------------------------------------------------------
def init_params(key):
    it = iter(jax.random.split(key, 48))

    def nrm(shape, scale):
        return (scale * jax.random.normal(next(it), shape)).astype(jnp.float32)

    def dconv(ci, co):
        return {"w1": nrm((co, ci, 3, 3, 3), 1.0 / math.sqrt(ci * 27)),
                "b1": nrm((co,), 0.05),
                "w2": nrm((co, co, 3, 3, 3), 1.0 / math.sqrt(co * 27)),
                "b2": nrm((co,), 0.05)}

    params = {
        "inc": dconv(IN_CH, ENC_CH[0]),
        "down1": dconv(ENC_CH[0], ENC_CH[1]),
        "down2": dconv(ENC_CH[1], ENC_CH[2]),
        "patch_w": nrm((HIDDEN, ENC_CH[2]) + PATCH,
                       1.0 / math.sqrt(ENC_CH[2] * PATCH[0] * PATCH[1] * PATCH[2])),
        "patch_b": nrm((HIDDEN,), 0.05),
        "pos_emb": nrm((1, N_PATCHES, HIDDEN), 0.02),
    }
    L, H, M = NUM_LAYERS, HIDDEN, MLP_DIM
    params["enc"] = {
        "ln1_g": jnp.ones((L, H), jnp.float32) + nrm((L, H), 0.05),
        "ln1_b": nrm((L, H), 0.05),
        "wq": nrm((L, H, H), 1.0 / math.sqrt(H)), "bq": nrm((L, H), 0.02),
        "wk": nrm((L, H, H), 1.0 / math.sqrt(H)), "bk": nrm((L, H), 0.02),
        "wv": nrm((L, H, H), 1.0 / math.sqrt(H)), "bv": nrm((L, H), 0.02),
        "wo": nrm((L, H, H), 1.0 / math.sqrt(H)), "bo": nrm((L, H), 0.02),
        "ln2_g": jnp.ones((L, H), jnp.float32) + nrm((L, H), 0.05),
        "ln2_b": nrm((L, H), 0.05),
        "w1": nrm((L, H, M), 1.0 / math.sqrt(H)), "b1": nrm((L, M), 0.02),
        "w2": nrm((L, M, H), 1.0 / math.sqrt(M)), "b2": nrm((L, H), 0.02),
        "lnf_g": jnp.ones((1, H), jnp.float32) + nrm((1, H), 0.05),
        "lnf_b": nrm((1, H), 0.05),
    }
    return params


if __name__ == "__main__":
    key = jax.random.PRNGKey(0)
    k_params, k_x = jax.random.split(key)
    params = init_params(k_params)
    x = jax.random.normal(k_x, (N_BATCH, IN_CH) + IMG, dtype=jnp.float32)

    encoded, attn_w, features = transformer_forward(params, x, use_pallas=True)
    encoded = jax.block_until_ready(encoded)

    # Pure-JAX reference of the same forward pass (shared im2col/maxpool,
    # XLA matmuls at highest precision) to validate the Pallas kernels.
    ref_encoded, _, ref_features = transformer_forward(params, x,
                                                       use_pallas=False)

    assert encoded.shape == (N_BATCH, N_PATCHES, HIDDEN)
    assert attn_w == []
    assert features[0].shape == (N_BATCH, ENC_CH[2], 1, 1, 1)
    assert features[2].shape == (N_BATCH, ENC_CH[2], 4, 4, 4)
    assert features[-1].shape == (N_BATCH, ENC_CH[0]) + IMG

    err_enc = float(jnp.max(jnp.abs(encoded - ref_encoded)))
    err_feat = float(jnp.max(jnp.abs(features[2] - ref_features[2])))
    assert jnp.allclose(encoded, ref_encoded, atol=2e-3, rtol=2e-3), err_enc
    assert jnp.allclose(features[2], ref_features[2],
                        atol=2e-3, rtol=2e-3), err_feat

    print("KERNEL_OK")
</pallas_src>

<mosaic_0001>
module attributes {stable_mosaic.version = 11 : i64} {
  func.func @_conv_kernel(%arg0: i32, %arg1: memref<1x54x4096xf32, #tpu.memory_space<vmem>>, %arg2: memref<4x54xf32, #tpu.memory_space<vmem>>, %arg3: memref<4x1xf32, #tpu.memory_space<vmem>>, %arg4: memref<1x4x4096xf32, #tpu.memory_space<vmem>>) attributes {dimension_semantics = [#tpu.dimension_semantics<parallel>], iteration_bounds = array<i64: 2>, scalar_prefetch = 0 : i64, scratch_operands = 0 : i64, tpu.core_type = #tpu.core_type<tc>, window_params = [{transform_indices = @transform_0, window_bounds = array<i64: 1, 54, 4096>}, {pipeline_mode = #tpu.pipeline_mode<synchronous>, transform_indices = @transform_1, window_bounds = array<i64: 4, 54>}, {pipeline_mode = #tpu.pipeline_mode<synchronous>, transform_indices = @transform_2, window_bounds = array<i64: 4, 1>}, {transform_indices = @transform_3, window_bounds = array<i64: 1, 4, 4096>}]} {
    %c0 = arith.constant 0 : index
    %c0_0 = arith.constant 0 : index
    %0 = vector.load %arg2[%c0, %c0_0] : memref<4x54xf32, #tpu.memory_space<vmem>>, vector<4x54xf32>
    %c0_1 = arith.constant 0 : index
    %c0_2 = arith.constant 0 : index
    %c0_3 = arith.constant 0 : index
    %1 = vector.load %arg1[%c0_1, %c0_2, %c0_3] : memref<1x54x4096xf32, #tpu.memory_space<vmem>>, vector<1x54x4096xf32>
    %2 = vector.shape_cast %1 : vector<1x54x4096xf32> to vector<54x4096xf32>
    %cst = arith.constant dense<0.000000e+00> : vector<4x4096xf32>
    %3 = tpu.matmul %0, %2, %cst {dimension_numbers = #tpu.dot_dimension_numbers<[1], [0], [0], [1], [0, 0, 1, 1], [], []>, precision = #tpu.contract_precision<fp32>} : vector<4x54xf32>, vector<54x4096xf32>, vector<4x4096xf32> -> vector<4x4096xf32>
    %c0_4 = arith.constant 0 : index
    %c0_5 = arith.constant 0 : index
    %4 = vector.load %arg3[%c0_4, %c0_5] : memref<4x1xf32, #tpu.memory_space<vmem>>, vector<4x1xf32>
    %5 = vector.broadcast %4 : vector<4x1xf32> to vector<4x4096xf32>
    %6 = arith.addf %3, %5 : vector<4x4096xf32>
    %cst_6 = arith.constant 0.000000e+00 : f32
    %7 = vector.broadcast %cst_6 : f32 to vector<4x4096xf32>
    %8 = arith.cmpf oge, %6, %7 : vector<4x4096xf32>
    %cst_7 = arith.constant 0.00999999977 : f32
    %9 = vector.broadcast %cst_7 : f32 to vector<4x4096xf32>
    %10 = arith.mulf %9, %6 : vector<4x4096xf32>
    %11 = arith.select %8, %6, %10 : vector<4x4096xi1>, vector<4x4096xf32>
    %cst_8 = arith.constant dense<0.000000e+00> : vector<4xf32>
    %12 = vector.multi_reduction <add>, %11, %cst_8 [1] : vector<4x4096xf32> to vector<4xf32>
    %13 = vector.shape_cast %12 : vector<4xf32> to vector<4x1xf32>
    %cst_9 = arith.constant 4.096000e+03 : f32
    %14 = vector.broadcast %cst_9 : f32 to vector<4x1xf32>
    %15 = arith.divf %13, %14 : vector<4x1xf32>
    %16 = vector.broadcast %15 : vector<4x1xf32> to vector<4x4096xf32>
    %17 = arith.subf %11, %16 : vector<4x4096xf32>
    %18 = arith.mulf %17, %17 : vector<4x4096xf32>
    %cst_10 = arith.constant dense<0.000000e+00> : vector<4xf32>
    %19 = vector.multi_reduction <add>, %18, %cst_10 [1] : vector<4x4096xf32> to vector<4xf32>
    %20 = vector.shape_cast %19 : vector<4xf32> to vector<4x1xf32>
    %cst_11 = arith.constant 4.096000e+03 : f32
    %21 = vector.broadcast %cst_11 : f32 to vector<4x1xf32>
    %22 = arith.divf %20, %21 : vector<4x1xf32>
    %cst_12 = arith.constant 9.99999974E-6 : f32
    %23 = vector.broadcast %cst_12 : f32 to vector<4x1xf32>
    %24 = arith.addf %22, %23 : vector<4x1xf32>
    %25 = math.rsqrt %24 : vector<4x1xf32>
    %26 = vector.broadcast %25 : vector<4x1xf32> to vector<4x4096xf32>
    %27 = arith.mulf %17, %26 : vector<4x4096xf32>
    %c0_13 = arith.constant 0 : index
    %c0_14 = arith.constant 0 : index
    %c0_15 = arith.constant 0 : index
    %28 = vector.load %arg4[%c0_13, %c0_14, %c0_15] : memref<1x4x4096xf32, #tpu.memory_space<vmem>>, vector<1x4x4096xf32>
    %29 = vector.shape_cast %28 : vector<1x4x4096xf32> to vector<4x4096xf32>
    %30 = vector.shape_cast %27 : vector<4x4096xf32> to vector<1x4x4096xf32>
    tpu.vector_store %arg4[%c0_13, %c0_14, %c0_15], %30 {strides = array<i32>} : memref<1x4x4096xf32, #tpu.memory_space<vmem>>, vector<1x4x4096xf32>,
    return
  }
  func.func @transform_0(%arg0: i32) -> (i32, i32, i32) {
    %c0_i32 = arith.constant 0 : i32
    %c0_i32_0 = arith.constant 0 : i32
    %c0_i32_1 = arith.constant 0 : i32
    return %arg0, %c0_i32, %c0_i32_0 : i32, i32, i32
  }
  func.func @transform_1(%arg0: i32) -> (i32, i32) {
    %c0_i32 = arith.constant 0 : i32
    %c0_i32_0 = arith.constant 0 : i32
    %c0_i32_1 = arith.constant 0 : i32
    return %c0_i32, %c0_i32_0 : i32, i32
  }
  func.func @transform_2(%arg0: i32) -> (i32, i32) {
    %c0_i32 = arith.constant 0 : i32
    %c0_i32_0 = arith.constant 0 : i32
    %c0_i32_1 = arith.constant 0 : i32
    return %c0_i32, %c0_i32_0 : i32, i32
  }
  func.func @transform_3(%arg0: i32) -> (i32, i32, i32) {
    %c0_i32 = arith.constant 0 : i32
    %c0_i32_0 = arith.constant 0 : i32
    %c0_i32_1 = arith.constant 0 : i32
    return %arg0, %c0_i32, %c0_i32_0 : i32, i32, i32
  }
}

</mosaic_0001>

<bundles_post_ra>
// kernel: tpu_custom_call.1
= control target key start
LH: loop header
LB: loop body
LE: loop exit
PB: predicated region body
PF: predicated region fallthrough
CT: control target
= control target key end

     0   :  { %8 = vsyncpa [#allocation3], 0  ;;  %s16260_s0 = inlined_call_operand.vmem [shape: f32[2,54,4096], index: 0, kind: input, shape index: {}]   ;;  %s16261_s1 = inlined_call_operand.vmem [shape: f32[4,54], index: 1, kind: input, shape index: {}]   ;;  %s16262_s2 = inlined_call_operand.vmem [shape: f32[4,1], index: 2, kind: input, shape index: {}]   ;;  %s16263_s3 = inlined_call_operand.hbm [shape: f32[2,4,4096], index: 3, kind: output, shape index: {}]  }
   0x1   :  { %10 = vsyncpa [#allocation3 + $0x1], 0  ;;  %s12407_s12 = smov 0   ;;  %s12409_s13 = smov 0  }
   0x2   :  { %s12411_s14 = smov 0   ;;  %s12413_s15 = smov 0  }
   0x3 LB: > { %s12428_s16 = sadd.s32 4294967295, %s12382_s15   ;;  %s10919_s17 = sadd.s32 4294967294, %s12382_s15   ;;  %s12382_s15 = sphi %s12413_s15, %s17092_s15   ;;  %s12378_s14 = sphi %s12411_s14, %s17091_s14   ;;  %s12374_s13 = sphi %s12409_s13, %s17090_s13   ;;  %s12370_s12 = sphi %s12407_s12, %s17089_s12  }
   0x4   : > { %s12432_s18 = sadd.s32 1, %s12382_s15   ;;  %s91_s19 = sadd.s32 1, %s12378_s14 }
   0x5   : > { %s88_s20 = ssub.s32 %s12382_s15, %s12432_s18  ;;  %p101_p0 = scmp.ne.s32.totalorder %s12378_s14, %s12374_s13 }
   0x6   : > { %p89_p1 = scmp.eq.s32.totalorder %s88_s20, 0  ;;  %p102_p2 = scmp.eq.s32.totalorder %s12428_s16, 1 }
   0x7   : > { %p107_p3 = scmp.ne.s32.totalorder %s12374_s13, %s12370_s12  ;;  %p108_p4 = scmp.eq.s32.totalorder %s10919_s17, 1 }
   0x8   : > { %s12443_s21 = scalar_select %p89_p1, %s12378_s14, %s91_s19  }
   0x9   : > { %p12445_p5 = por %p102_p2, %p101_p0  ;;  %p12449_p6 = por %p108_p4, %p107_p3 }
   0xa   : > { %p10922_p7 = scmp.ge.s32.totalorder %s12382_s15, 1  ;;  %p140_p8 = scmp.lt.s32.totalorder %s12382_s15, 3 }
   0xc   : > { %p141_p9 = pnand %p10922_p7, %p140_p8 }
   0xe   : > { %144 = sbr.rel (%p141_p9) target bundleno = 1392 (0x570), region = 32 }
  0x15   : > { %p164_p10 = scmp.lt.s32.totalorder %s12428_s16, 1  ;;  %v169_v0 = vld [vmem:[%s16261_s1] sm:$0xf]  ;;  %vm400_vm0 = vcmask 441344   ;;  %v16281_v1 = vmov 0.0   ;;  %vm404_vm1 = vcmask 1045504  }
  0x16   : > { %579 = vmatprep.mubr.f32.mxu0 %v16281_v1  ;;  %1200 = vmatprep.mubr.f32.mxu1 %v16281_v1  ;;  %v402_v2 = vsel %vm400_vm0, %v169_v0, 0  ;;  %vm10533_vm4 = vcmask 1043456   ;;  %s161_s6 = sand.u32 1, %s12374_s13   ;;  %s10930_s8 = sshll.u32 %s12428_s16, 11 }
  0x17   : > { %s165_s26 = scalar_select %p164_p10, %s12428_s16, 1  ;;  %v12462_v3 = vand.u32 4294901760, %v402_v2 }
  0x18   : > { %s16170_s7 = sshll.u32 %s161_s6, 7  ;;  %s16208_s17 = scalar_lea.hbm %s16263_s3, %s10930_s8 }
  0x19   : > { %s12275_s27 = smul.u32 1792, %s165_s26  ;;  %v12465_v4 = vsub.f32 %v402_v2, %v12462_v3  ;;  %s16194_s9 = scalar_lea.vmem [#allocation2], %s16170_s7 }
  0x1a   : > { %s10860_s10 = sshll.u32 %s16194_s9, 4  ;;  %s10846_s19 = scalar_lea.sflag [#allocation3], %s161_s6  ;;  %s16210_s10 = int_to_ptr.vmem [resolvable:$true] %s10860_s10 }
  0x1b   : > { %16538 = vst [vmem:[#allocation5_spill] sm:$0xff] %v12465_v4  ;;  %s12470_s30 = scalar_lea.vmem %s16260_s0, %s12275_s27  ;;  %v12473_v5 = vand.u32 4294901760, %v12465_v4  ;;  %s12320_s20 = scalar_lea.vmem %s16210_s10, 2048 }
  0x1c   : > { %v171_v6 = vld [vmem:[%s12470_s30 + $0x8] sm:$0xff]  ;;  %v173_v8 = vld [vmem:[%s12470_s30 + $0x18] sm:$0xff]  ;;  %v170_v13 = vld [vmem:[%s12470_s30] sm:$0xff]  ;;  %p12321_p11 = scmp.ne.s32.totalorder %s16210_s10, %s12320_s20  ;;  %s12386_s24 = smov [#allocation2]  }
  0x1d   : > { %16539 = vst [vmem:[#allocation6_spill] sm:$0xff] %v12473_v5  ;;  %v203_v7 = vld [vmem:[%s12470_s30 + $0x108] sm:$0xff]  ;;  %v501_v9 = vand.u32 4294901760, %v171_v6  ;;  %v205_v11 = vld [vmem:[%s12470_s30 + $0x118] sm:$0xff]  ;;  %v1122_v12 = vand.u32 4294901760, %v173_v8  ;;  %v202_v14 = vld [vmem:[%s12470_s30 + $0x100] sm:$0xff]  ;;  %v583_v21 = vsub.f32 %v12465_v4, %v12473_v5 }
  0x1e   : > { %v505_v10 = vand.u32 4294901760, %v203_v7  ;;  %v1126_v15 = vand.u32 4294901760, %v205_v11  ;;  %v503_v16 = vand.u32 4294901760, %v170_v13  ;;  %v507_v17 = vand.u32 4294901760, %v202_v14  ;;  %v172_v18 = vld [vmem:[%s12470_s30 + $0x10] sm:$0xff]  ;;  %v235_v20 = vld [vmem:[%s12470_s30 + $0x208] sm:$0xff]  ;;  %p12322_p12 = pnand %p12321_p11, %p12445_p5 }
  0x1f   : > { %v204_v19 = vld [vmem:[%s12470_s30 + $0x110] sm:$0xff]  ;;  %v12488_v23 = vsub.f32 %v171_v6, %v501_v9  ;;  %v12492_v25 = vsub.f32 %v173_v8, %v1122_v12  ;;  %v267_v26 = vld [vmem:[%s12470_s30 + $0x308] sm:$0xff]  ;;  %v237_v27 = vld [vmem:[%s12470_s30 + $0x218] sm:$0xff]  ;;  %v1124_v35 = vand.u32 4294901760, %v172_v18  ;;  %v509_v37 = vand.u32 4294901760, %v235_v20  ;;  %s12324_s25 = sshll.u32 %s12386_s24, 4  ;;  %s12325_s25 = int_to_ptr.vmem [resolvable:$false] %s12324_s25 }
  0x20   : > { %v12486_v22 = vpack.c.bf16 %v505_v10, %v501_v9  ;;  %v12490_v24 = vsub.f32 %v203_v7, %v505_v10  ;;  %v269_v28 = vld [vmem:[%s12470_s30 + $0x318] sm:$0xff]  ;;  %v12497_v29 = vpack.c.bf16 %v1126_v15, %v1122_v12  ;;  %v12499_v30 = vsub.f32 %v205_v11, %v1126_v15  ;;  %v234_v33 = vld [vmem:[%s12470_s30 + $0x200] sm:$0xff]  ;;  %v236_v43 = vld [vmem:[%s12470_s30 + $0x210] sm:$0xff]  ;;  %p12323_p13 = pneg %p12322_p12  ;;  %s12326_s26 = scalar_lea.vmem %s12325_s25, 4096 }
  0x21   : > { %v12501_v31 = vpack.c.bf16 %v507_v17, %v503_v16  ;;  %v12503_v32 = vsub.f32 %v170_v13, %v503_v16  ;;  %v12507_v34 = vsub.f32 %v202_v14, %v507_v17  ;;  %v1128_v36 = vand.u32 4294901760, %v204_v19  ;;  %v266_v38 = vld [vmem:[%s12470_s30 + $0x300] sm:$0xff]  ;;  %v268_v44 = vld [vmem:[%s12470_s30 + $0x310] sm:$0xff]  ;;  %v299_v49 = vld [vmem:[%s12470_s30 + $0x408] sm:$0xff]  ;;  %p12327_p0 = scmp.lt.s32.totalorder %s16210_s10, %s12325_s25  ;;  %p12328_p1 = scmp.lt.s32.totalorder %s12326_s26, %s12320_s20 }
  0x22   : > { %10932 = vmatprep.subr.bf16.mxu0 %v12486_v22  ;;  %11004 = vmatprep.subr.bf16.mxu1 %v12497_v29  ;;  %v513_v39 = vand.u32 4294901760, %v267_v26  ;;  %v1130_v40 = vand.u32 4294901760, %v237_v27  ;;  %v1134_v41 = vand.u32 4294901760, %v269_v28  ;;  %v511_v42 = vand.u32 4294901760, %v234_v33  ;;  %v331_v50 = vld [vmem:[%s12470_s30 + $0x508] sm:$0xff]  ;;  %v301_v51 = vld [vmem:[%s12470_s30 + $0x418] sm:$0xff] }
  0x23   : > { %10934 = vmatpush1.bf16.msra.mxu0 %v12501_v31  ;;  %v12514_v45 = vpack.c.bf16 %v1128_v36, %v1124_v35  ;;  %v12516_v46 = vsub.f32 %v172_v18, %v1124_v35  ;;  %v12518_v47 = vsub.f32 %v204_v19, %v1128_v36  ;;  %v12520_v48 = vsub.f32 %v235_v20, %v509_v37  ;;  %v333_v56 = vld [vmem:[%s12470_s30 + $0x518] sm:$0xff]  ;;  %v298_v2 = vld [vmem:[%s12470_s30 + $0x400] sm:$0xff]  ;;  %v300_v11 = vld [vmem:[%s12470_s30 + $0x410] sm:$0xff]  ;;  %p12329_p2 = por %p12328_p1, %p12327_p0 }
  0x24   : > { %v12525_v52 = vpack.c.bf16 %v513_v39, %v509_v37  ;;  %v12527_v53 = vsub.f32 %v267_v26, %v513_v39  ;;  %v12529_v54 = vpack.c.bf16 %v1134_v41, %v1130_v40  ;;  %v12531_v55 = vsub.f32 %v237_v27, %v1130_v40  ;;  %v330_v6 = vld [vmem:[%s12470_s30 + $0x500] sm:$0xff]  ;;  %v332_v12 = vld [vmem:[%s12470_s30 + $0x510] sm:$0xff]  ;;  %v363_v13 = vld [vmem:[%s12470_s30 + $0x608] sm:$0x3f] }
  0x25   : > { %11006 = vmatpush1.bf16.msra.mxu1 %v12514_v45  ;;  %v12535_v57 = vsub.f32 %v269_v28, %v1134_v41  ;;  %v515_v58 = vand.u32 4294901760, %v266_v38  ;;  %v12537_v59 = vsub.f32 %v234_v33, %v511_v42  ;;  %v1132_v60 = vand.u32 4294901760, %v236_v43  ;;  %v365_v18 = vld [vmem:[%s12470_s30 + $0x618] sm:$0x3f]  ;;  %v362_v19 = vld [vmem:[%s12470_s30 + $0x600] sm:$0x3f]  ;;  %p12330_p3 = pnand %p12329_p2, %p12323_p13 }
  0x26   : > { %10936 = vmatprep.subr.bf16.mxu0 %v12525_v52  ;;  %11008 = vmatprep.subr.bf16.mxu1 %v12529_v54  ;;  %v1136_v61 = vand.u32 4294901760, %v268_v44  ;;  %v517_v62 = vand.u32 4294901760, %v299_v49  ;;  %v521_v63 = vand.u32 4294901760, %v331_v50  ;;  %v1138_v0 = vand.u32 4294901760, %v301_v51  ;;  %v364_v20 = vld [vmem:[%s12470_s30 + $0x610] sm:$0x3f] }
  0x27   : > { %v12543_v7 = vpack.c.bf16 %v515_v58, %v511_v42  ;;  %v12545_v8 = vsub.f32 %v266_v38, %v515_v58  ;;  %v12547_v9 = vsub.f32 %v236_v43, %v1132_v60  ;;  %v1142_v10 = vand.u32 4294901760, %v333_v56 }
  0x28   : > { %v12552_v14 = vpack.c.bf16 %v1136_v61, %v1132_v60  ;;  %v12554_v15 = vsub.f32 %v268_v44, %v1136_v61  ;;  %v12556_v16 = vpack.c.bf16 %v521_v63, %v517_v62  ;;  %v12558_v17 = vsub.f32 %v299_v49, %v517_v62 }
  0x29   : > { %10938 = vmatpush1.bf16.msra.mxu0 %v12543_v7  ;;  %v12564_v26 = vsub.f32 %v331_v50, %v521_v63  ;;  %v12566_v27 = vpack.c.bf16 %v1142_v10, %v1138_v0  ;;  %v12568_v28 = vsub.f32 %v301_v51, %v1138_v0  ;;  %v12570_v33 = vsub.f32 %v333_v56, %v1142_v10 }
  0x2a   : > { %11010 = vmatpush1.bf16.msra.mxu1 %v12552_v14  ;;  %10940 = vmatprep.subr.bf16.mxu0 %v12556_v16  ;;  %v519_v35 = vand.u32 4294901760, %v298_v2  ;;  %v523_v36 = vand.u32 4294901760, %v330_v6  ;;  %v1140_v37 = vand.u32 4294901760, %v300_v11  ;;  %v1144_v38 = vand.u32 4294901760, %v332_v12 }
  0x2b   : > { %11012 = vmatprep.subr.bf16.mxu1 %v12566_v27  ;;  %v12576_v39 = vsel %vm404_vm1, %v363_v13, 0  ;;  %v12579_v40 = vsel %vm404_vm1, %v365_v18, 0  ;;  %v406_v41 = vsel %vm404_vm1, %v362_v19, 0  ;;  %v412_v42 = vsel %vm404_vm1, %v364_v20, 0 }
  0x2c   : > { %v12583_v43 = vpack.c.bf16 %v523_v36, %v519_v35  ;;  %v12585_v44 = vsub.f32 %v298_v2, %v519_v35  ;;  %v12587_v49 = vsub.f32 %v330_v6, %v523_v36  ;;  %v12589_v50 = vpack.c.bf16 %v1144_v38, %v1140_v37 }
  0x2d   : > { %v12591_v51 = vsub.f32 %v300_v11, %v1140_v37  ;;  %v12593_v56 = vsub.f32 %v332_v12, %v1144_v38  ;;  %v12596_v58 = vand.u32 4294901760, %v12576_v39  ;;  %v12599_v60 = vand.u32 4294901760, %v12579_v40 }
  0x2e   : > { %10942 = vmatpush1.bf16.msra.mxu0 %v12583_v43  ;;  %11014 = vmatpush1.bf16.msra.mxu1 %v12589_v50  ;;  %v12603_v61 = vand.u32 4294901760, %v406_v41  ;;  %v12605_v62 = vand.u32 4294901760, %v412_v42  ;;  %v16268_v63 = vand.u32 4294901760, %v12488_v23  ;;  %v16265_v0 = vand.u32 4294901760, %v12490_v24 }
  0x2f   : > { %526 = vmatprep.subr.mxu0 %v12596_v58  ;;  %1147 = vmatprep.subr.mxu1 %v12599_v60  ;;  %v16264_v2 = vand.u32 4294901760, %v12492_v25  ;;  %v16266_v6 = vand.u32 4294901760, %v12499_v30  ;;  %v12616_v10 = vand.u32 4294901760, %v583_v21  ;;  %v16267_v11 = vand.u32 4294901760, %v12503_v32 }
  0x30   : > { %v12620_v12 = vsub.f32 %v406_v41, %v12603_v61  ;;  %v12623_v13 = vsub.f32 %v412_v42, %v12605_v62  ;;  %v594_v18 = vsub.f32 %v12488_v23, %v16268_v63  ;;  %v606_v19 = vsub.f32 %v12490_v24, %v16265_v0 }
  0x31   : > { %16540 = vst [vmem:[#allocation7_spill] sm:$0xff] %v12616_v10  ;;  %v1215_v21 = vsub.f32 %v12492_v25, %v16264_v2  ;;  %v1227_v20 = vsub.f32 %v12499_v30, %v16266_v6  ;;  %v600_v35 = vsub.f32 %v12503_v32, %v16267_v11  ;;  %v16269_v36 = vand.u32 4294901760, %v12507_v34 }
  0x32   : > { %528 = vmatpush1.msra.mxu0 %v12603_v61  ;;  %1149 = vmatpush1.msra.mxu1 %v12605_v62  ;;  %v595_v37 = vand.u32 4294901760, %v594_v18  ;;  %v607_v38 = vand.u32 4294901760, %v606_v19  ;;  %v16272_v41 = vand.u32 4294901760, %v12516_v46  ;;  %v16273_v42 = vand.u32 4294901760, %v12518_v47 }
  0x33   : > { %v1216_v2 = vand.u32 4294901760, %v1215_v21  ;;  %v1228_v0 = vand.u32 4294901760, %v1227_v20  ;;  %585 = vmatmul.mubr.f32.vlgmr.msra.gmra.mrb[0].mxu0 %v12616_v10  ;;  %v601_v6 = vand.u32 4294901760, %v600_v35  ;;  %v612_v11 = vsub.f32 %v12507_v34, %v16269_v36  ;;  %1206 = vmatmul.mubr.f32.vlgmr.msra.gmra.mrb[0].mxu1 %v12616_v10 }
  0x34   : > { %v10943_v63 = vpack.c.bf16 %v607_v38, %v595_v37  ;;  %v1221_v18 = vsub.f32 %v12516_v46, %v16272_v41  ;;  %v1233_v19 = vsub.f32 %v12518_v47, %v16273_v42  ;;  %v16276_v21 = vand.u32 4294901760, %v12520_v48  ;;  %725 = vmatprep.mubr.f32.mxu0 %v16281_v1  ;;  %1346 = vmatprep.mubr.f32.mxu1 %v16281_v1 }
  0x35   : > { %v11015_v20 = vpack.c.bf16 %v1228_v0, %v1216_v2  ;;  %v613_v35 = vand.u32 4294901760, %v612_v11  ;;  %v16277_v36 = vand.u32 4294901760, %v12527_v53  ;;  %v16278_v37 = vand.u32 4294901760, %v12531_v55 }
  0x36   : > { %10944 = vmatprep.subr.bf16.mxu0 %v10943_v63  ;;  %v1222_v38 = vand.u32 4294901760, %v1221_v18  ;;  %v1234_v10 = vand.u32 4294901760, %v1233_v19  ;;  %v618_v41 = vsub.f32 %v12520_v48, %v16276_v21  ;;  %v16279_v42 = vand.u32 4294901760, %v12535_v57 }
  0x37   : > { %11016 = vmatprep.subr.bf16.mxu1 %v11015_v20  ;;  %v10945_v5 = vpack.c.bf16 %v613_v35, %v601_v6  ;;  %v630_v0 = vsub.f32 %v12527_v53, %v16277_v36  ;;  %v1239_v2 = vsub.f32 %v12531_v55, %v16278_v37  ;;  %v16280_v63 = vand.u32 4294901760, %v12537_v59 }
  0x38   : > { %v11017_v11 = vpack.c.bf16 %v1234_v10, %v1222_v38  ;;  %v619_v18 = vand.u32 4294901760, %v618_v41  ;;  %v1251_v19 = vsub.f32 %v12535_v57, %v16279_v42  ;;  %v16283_v21 = vand.u32 4294901760, %v12545_v8 }
  0x39   : > { %10946 = vmatpush1.bf16.msra.mxu0 %v10945_v5  ;;  %v631_v6 = vand.u32 4294901760, %v630_v0  ;;  %v1240_v20 = vand.u32 4294901760, %v1239_v2  ;;  %v624_v35 = vsub.f32 %v12537_v59, %v16280_v63  ;;  %v16285_v36 = vand.u32 4294901760, %v12547_v9 }
  0x3a   : > { %11018 = vmatpush1.bf16.msra.mxu1 %v11017_v11  ;;  %v1252_v37 = vand.u32 4294901760, %v1251_v19  ;;  %v636_v10 = vsub.f32 %v12545_v8, %v16283_v21  ;;  %v16284_v41 = vand.u32 4294901760, %v12554_v15  ;;  %v16287_v38 = vand.u32 4294901760, %v12558_v17 }
  0x3b   : > { %v10947_v42 = vpack.c.bf16 %v631_v6, %v619_v18  ;;  %v625_v5 = vand.u32 4294901760, %v624_v35  ;;  %v1245_v0 = vsub.f32 %v12547_v9, %v16285_v36  ;;  %v16286_v2 = vand.u32 4294901760, %v12564_v26 }
  0x3c   : > { %v11019_v63 = vpack.c.bf16 %v1252_v37, %v1240_v20  ;;  %v637_v1 = vand.u32 4294901760, %v636_v10  ;;  %v1257_v11 = vsub.f32 %v12554_v15, %v16284_v41  ;;  %v642_v19 = vsub.f32 %v12558_v17, %v16287_v38 }
  0x3d   : > { %10948 = vmatprep.subr.bf16.mxu0 %v10947_v42  ;;  %v1246_v21 = vand.u32 4294901760, %v1245_v0  ;;  %v654_v18 = vsub.f32 %v12564_v26, %v16286_v2  ;;  %v16288_v6 = vand.u32 4294901760, %v12568_v28  ;;  %v16289_v35 = vand.u32 4294901760, %v12570_v33 }
  0x3e   : > { %11020 = vmatprep.subr.bf16.mxu1 %v11019_v63  ;;  %v10949_v37 = vpack.c.bf16 %v637_v1, %v625_v5  ;;  %v1258_v20 = vand.u32 4294901760, %v1257_v11  ;;  %v643_v10 = vand.u32 4294901760, %v642_v19  ;;  %v647_v41 = vand.u32 4294901760, %v12585_v44 }
  0x3f   : > { %v655_v36 = vand.u32 4294901760, %v654_v18  ;;  %v1263_v42 = vsub.f32 %v12568_v28, %v16288_v6  ;;  %v1275_v0 = vsub.f32 %v12570_v33, %v16289_v35  ;;  %v16291_v2 = vand.u32 4294901760, %v12587_v49 }
  0x40   : > { %10950 = vmatpush1.bf16.msra.mxu0 %v10949_v37  ;;  %v11021_v38 = vpack.c.bf16 %v1258_v20, %v1246_v21  ;;  %v648_v1 = vsub.f32 %v12585_v44, %v647_v41  ;;  %v16290_v63 = vand.u32 4294901760, %v12591_v51  ;;  %v16292_v5 = vand.u32 4294901760, %v12593_v56 }
  0x41   : > { %v10951_v11 = vpack.c.bf16 %v655_v36, %v643_v10  ;;  %v1264_v19 = vand.u32 4294901760, %v1263_v42  ;;  %v1276_v18 = vand.u32 4294901760, %v1275_v0  ;;  %v660_v6 = vsub.f32 %v12587_v49, %v16291_v2 }
  0x42   : > { %11022 = vmatpush1.bf16.msra.mxu1 %v11021_v38  ;;  %v649_v35 = vand.u32 4294901760, %v648_v1  ;;  %v1269_v21 = vsub.f32 %v12591_v51, %v16290_v63  ;;  %v1281_v37 = vsub.f32 %v12593_v56, %v16292_v5  ;;  %v12724_v20 = vsub.f32 %v12576_v39, %v12596_v58 }
  0x43   : > { %10952 = vmatprep.subr.bf16.mxu0 %v10951_v11  ;;  %v11023_v36 = vpack.c.bf16 %v1276_v18, %v1264_v19  ;;  %v661_v10 = vand.u32 4294901760, %v660_v6  ;;  %v12728_v42 = vsub.f32 %v12579_v40, %v12599_v60  ;;  %v671_v38 = vand.u32 4294901760, %v12620_v12 }
  0x44   : > { %v1270_v0 = vand.u32 4294901760, %v1269_v21  ;;  %v1282_v1 = vand.u32 4294901760, %v1281_v37  ;;  %v665_v63 = vand.u32 4294901760, %v12724_v20  ;;  %v1292_v2 = vand.u32 4294901760, %v12623_v13 }
  0x45   : > { %11024 = vmatprep.subr.bf16.mxu1 %v11023_v36  ;;  %v10953_v5 = vpack.c.bf16 %v661_v10, %v649_v35  ;;  %v1286_v39 = vand.u32 4294901760, %v12728_v42  ;;  %v672_v6 = vsub.f32 %v12620_v12, %v671_v38  ;;  %v10955_v36 = vpack.c.bf16 %v12490_v24, %v12488_v23 }
  0x46   : > { %v11025_v11 = vpack.c.bf16 %v1282_v1, %v1270_v0  ;;  %v666_v40 = vsub.f32 %v12724_v20, %v665_v63  ;;  %v1293_v19 = vsub.f32 %v12623_v13, %v1292_v2  ;;  %v11027_v0 = vpack.c.bf16 %v12499_v30, %v12492_v25 }
  0x47   : > { %10954 = vmatpush1.bf16.msra.mxu0 %v10953_v5  ;;  %v1287_v35 = vsub.f32 %v12728_v42, %v1286_v39  ;;  %v673_v18 = vand.u32 4294901760, %v672_v6  ;;  %v10957_v1 = vpack.c.bf16 %v12507_v34, %v12503_v32  ;;  %v11029_v5 = vpack.c.bf16 %v12518_v47, %v12516_v46 }
  0x48   : > { %11026 = vmatpush1.bf16.msra.mxu1 %v11025_v11  ;;  %v667_v21 = vand.u32 4294901760, %v666_v40  ;;  %v1294_v37 = vand.u32 4294901760, %v1293_v19  ;;  %v10959_v6 = vpack.c.bf16 %v12527_v53, %v12520_v48  ;;  %v11031_v11 = vpack.c.bf16 %v12535_v57, %v12531_v55 }
  0x49   : > { %v1288_v10 = vand.u32 4294901760, %v1287_v35  ;;  %v10961_v40 = vpack.c.bf16 %v12545_v8, %v12537_v59  ;;  %v11033_v19 = vpack.c.bf16 %v12554_v15, %v12547_v9  ;;  %v10963_v35 = vpack.c.bf16 %v12564_v26, %v12558_v17 }
  0x4a   : > { %668 = vmatprep.subr.mxu0 %v667_v21  ;;  %v16541_v21 = vmov 0.0  }
  0x4b   : > { %1289 = vmatprep.subr.mxu1 %v1288_v10  ;;  %674 = vmatpush1.msra.mxu0 %v673_v18  ;;  %v11035_v18 = vpack.c.bf16 %v12570_v33, %v12568_v28  ;;  %v16542_v10 = vand.u32 4294901760, %v12488_v23  ;;  %v16548_v23 = vand.u32 4294901760, %v12516_v46  ;;  %v16554_v46 = vld [vmem:[#allocation6_spill] sm:$0xff] }
  0x4c   : > { %1295 = vmatpush1.msra.mxu1 %v1294_v37  ;;  %10956 = vmatprep.subr.bf16.mxu0 %v10955_v36  ;;  %v10965_v37 = vpack.c.bf16 %v12587_v49, %v12585_v44  ;;  %v11037_v36 = vpack.c.bf16 %v12593_v56, %v12591_v51 }
  0x4d   : > { %11028 = vmatprep.subr.bf16.mxu1 %v11027_v0  ;;  %727 = vmatmul.mubr.f32.vlgmr.msra.gmra.mrb[0].mxu0 %v12462_v3  ;;  %v16543_v0 = vand.u32 4294901760, %v12490_v24  ;;  %v16549_v24 = vand.u32 4294901760, %v12518_v47  ;;  %v16555_v47 = vand.u32 4294901760, %v12537_v59  ;;  %v16561_v59 = vand.u32 4294901760, %v12568_v28 }
  0x4e   : > { %10958 = vmatpush1.bf16.msra.mxu0 %v10957_v1  ;;  %1348 = vmatmul.mubr.f32.vlgmr.msra.gmra.mrb[0].mxu1 %v12462_v3 }
  0x4f   : > { %11030 = vmatpush1.bf16.msra.mxu1 %v11029_v5  ;;  %10960 = vmatprep.subr.bf16.mxu0 %v10959_v6  ;;  %v10979_v1 = vpack.c.bf16 %v16543_v0, %v16542_v10  ;;  %v16544_v5 = vand.u32 4294901760, %v12492_v25  ;;  %v16545_v6 = vand.u32 4294901760, %v12499_v30  ;;  %v16551_v25 = vand.u32 4294901760, %v12527_v53 }
  0x50   : > { %11032 = vmatprep.subr.bf16.mxu1 %v11031_v11  ;;  %825 = vmatprep.mubr.f32.mxu0 %v16541_v21  ;;  %v16559_v0 = vand.u32 4294901760, %v12558_v17  ;;  %v174_v17 = vld [vmem:[%s12470_s30 + $0x20] sm:$0xff] }
  0x51   : > { %1446 = vmatprep.mubr.f32.mxu1 %v16541_v21  ;;  %v11051_v11 = vpack.c.bf16 %v16545_v6, %v16544_v5  ;;  %v175_v6 = vld [vmem:[%s12470_s30 + $0x28] sm:$0xff]  ;;  %v1745_v44 = vand.u32 4294901760, %v174_v17 }
  0x52   : > { %10962 = vmatpush1.bf16.msra.mxu0 %v10961_v40  ;;  %v16546_v40 = vand.u32 4294901760, %v12503_v32  ;;  %v16552_v32 = vand.u32 4294901760, %v12531_v55  ;;  %v16557_v55 = vand.u32 4294901760, %v12547_v9  ;;  %v177_v9 = vld [vmem:[%s12470_s30 + $0x38] sm:$0xff] }
  0x53   : > { %11034 = vmatpush1.bf16.msra.mxu1 %v11033_v19  ;;  %10964 = vmatprep.subr.bf16.mxu0 %v10963_v35  ;;  %v16547_v19 = vand.u32 4294901760, %v12507_v34  ;;  %v16553_v34 = vand.u32 4294901760, %v12535_v57  ;;  %v16558_v57 = vand.u32 4294901760, %v12554_v15  ;;  %v209_v15 = vld [vmem:[%s12470_s30 + $0x138] sm:$0xff] }
  0x54   : > { %11036 = vmatprep.subr.bf16.mxu1 %v11035_v18  ;;  %v11053_v18 = vpack.c.bf16 %v16549_v24, %v16548_v23  ;;  %v16564_v23 = vand.u32 4294901760, %v12591_v51  ;;  %v16565_v24 = vand.u32 4294901760, %v12593_v56 }
  0x55   : > { %v10981_v35 = vpack.c.bf16 %v16547_v19, %v16546_v40  ;;  %v11057_v10 = vpack.c.bf16 %v16558_v57, %v16557_v55  ;;  %v16563_v19 = vand.u32 4294901760, %v12587_v49  ;;  %v239_v49 = vld [vmem:[%s12470_s30 + $0x228] sm:$0xff] }
  0x56   : > { %10966 = vmatpush1.bf16.msra.mxu0 %v10965_v37  ;;  %v16550_v37 = vand.u32 4294901760, %v12520_v48  ;;  %v16556_v48 = vand.u32 4294901760, %v12545_v8  ;;  %v16562_v8 = vand.u32 4294901760, %v12570_v33 }
  0x57   : > { %11038 = vmatpush1.bf16.msra.mxu1 %v11037_v36  ;;  %771 = vmatprep.subr.mxu0 %v12724_v20  ;;  %v11055_v36 = vpack.c.bf16 %v16553_v34, %v16552_v32  ;;  %v10989_v28 = vpack.c.bf16 %v16563_v19, %v647_v41  ;;  %v2368_v32 = vand.u32 4294901760, %v209_v15  ;;  %v271_v41 = vld [vmem:[%s12470_s30 + $0x328] sm:$0xff]  ;;  %v240_v20 = vld [vmem:[%s12470_s30 + $0x230] sm:$0xff] }
  0x58   : > { %1392 = vmatprep.subr.mxu1 %v12728_v42  ;;  %v10983_v30 = vpack.c.bf16 %v16551_v25, %v16550_v37  ;;  %v10985_v53 = vpack.c.bf16 %v16556_v48, %v16555_v47  ;;  %v11059_v40 = vpack.c.bf16 %v16562_v8, %v16561_v59  ;;  %v176_v37 = vld [vmem:[%s12470_s30 + $0x30] sm:$0xff]  ;;  %v241_v48 = vld [vmem:[%s12470_s30 + $0x238] sm:$0xff]  ;;  %v303_v42 = vld [vmem:[%s12470_s30 + $0x428] sm:$0xff] }
  0x59   : > { %v208_v25 = vld [vmem:[%s12470_s30 + $0x130] sm:$0xff]  ;;  %v2366_v56 = vand.u32 4294901760, %v176_v37  ;;  %v12878_v59 = vsub.f32 %v209_v15, %v2368_v32  ;;  %v2372_v19 = vand.u32 4294901760, %v241_v48 }
  0x5a   : > { %774 = vmatpush1.msra.mxu0 %v12620_v12  ;;  %v2370_v47 = vand.u32 4294901760, %v208_v25 }
  0x5b   : > { %1395 = vmatpush1.msra.mxu1 %v12623_v13  ;;  %10968 = vmatprep.subr.bf16.mxu0 %v12486_v22  ;;  %v12911_v13 = vsub.f32 %v241_v48, %v2372_v19  ;;  %v394_v48 = vld [vmem:[%s16262_s2] sm:$0xf] }
  0x5c   : > { %11040 = vmatprep.subr.bf16.mxu1 %v12497_v29  ;;  %828 = vmatmul.mubr.f32.vlgmr.msra.gmra.mrb[0].mxu0 %v12465_v4  ;;  %v12894_v15 = vpack.c.bf16 %v2370_v47, %v2366_v56 }
  0x5d   : > { %10970 = vmatpush1.bf16.msra.mxu0 %v12501_v31  ;;  %1449 = vmatmul.mubr.f32.vlgmr.msra.gmra.mrb[0].mxu1 %v12465_v4 }
  0x5e   : > { %11042 = vmatpush1.bf16.msra.mxu1 %v12514_v45  ;;  %10972 = vmatprep.subr.bf16.mxu0 %v12525_v52  ;;  %16567 = vst [vmem:[#allocation9_spill] sm:$0xff] %v12894_v15 }
  0x5f   : > { %11044 = vmatprep.subr.bf16.mxu1 %v12529_v54  ;;  %912 = vmatprep.mubr.f32.mxu0 %v16541_v21 }
  0x60   : > { %1533 = vmatprep.mubr.f32.mxu1 %v16541_v21 }
  0x61   : > { %10974 = vmatpush1.bf16.msra.mxu0 %v12543_v7 }
  0x62   : > { %11046 = vmatpush1.bf16.msra.mxu1 %v12552_v14  ;;  %10976 = vmatprep.subr.bf16.mxu0 %v12556_v16 }
  0x63   : > { %11048 = vmatprep.subr.bf16.mxu1 %v12566_v27 }
  0x65   : > { %10978 = vmatpush1.bf16.msra.mxu0 %v12583_v43 }
  0x66   : > { %11050 = vmatpush1.bf16.msra.mxu1 %v12589_v50  ;;  %859 = vmatprep.subr.mxu0 %v12596_v58 }
  0x67   : > { %1480 = vmatprep.subr.mxu1 %v12599_v60 }
  0x69   : > { %861 = vmatpush1.msra.mxu0 %v12603_v61 }
  0x6a   : > { %1482 = vmatpush1.msra.mxu1 %v12605_v62  ;;  %10980 = vmatprep.subr.bf16.mxu0 %v10979_v1  ;;  %v16560_v1 = vand.u32 4294901760, %v12564_v26  ;;  %v206_v26 = vld [vmem:[%s12470_s30 + $0x120] sm:$0xff] }
  0x6b   : > { %11052 = vmatprep.subr.bf16.mxu1 %v11051_v11  ;;  %916 = vmatmul.mubr.f32.vlgmr.msra.gmra.mrb[0].mxu0 %v16554_v46  ;;  %v207_v11 = vld [vmem:[%s12470_s30 + $0x128] sm:$0xff]  ;;  %v1749_v34 = vand.u32 4294901760, %v206_v26 }
  0x6c   : > { %10982 = vmatpush1.bf16.msra.mxu0 %v10981_v35  ;;  %1537 = vmatmul.mubr.f32.vlgmr.msra.gmra.mrb[0].mxu1 %v16554_v46  ;;  %v10987_v5 = vpack.c.bf16 %v16560_v1, %v16559_v0  ;;  %v1743_v35 = vand.u32 4294901760, %v175_v6  ;;  %v1747_v33 = vand.u32 4294901760, %v207_v11  ;;  %v1755_v0 = vand.u32 4294901760, %v271_v41  ;;  %v238_v1 = vld [vmem:[%s12470_s30 + $0x220] sm:$0xff] }
  0x6d   : > { %11054 = vmatpush1.bf16.msra.mxu1 %v11053_v18  ;;  %10984 = vmatprep.subr.bf16.mxu0 %v10983_v30  ;;  %v11061_v18 = vpack.c.bf16 %v16565_v24, %v16564_v23  ;;  %v2364_v30 = vand.u32 4294901760, %v177_v9  ;;  %v12880_v8 = vpack.c.bf16 %v1749_v34, %v1745_v44  ;;  %v2374_v24 = vand.u32 4294901760, %v240_v20 }
  0x6e   : > { %11056 = vmatprep.subr.bf16.mxu1 %v11055_v36  ;;  %1028 = vmatprep.mubr.f32.mxu0 %v16541_v21  ;;  %v12860_v36 = vpack.c.bf16 %v1747_v33, %v1743_v35  ;;  %v12862_v51 = vsub.f32 %v175_v6, %v1743_v35  ;;  %v12868_v55 = vsub.f32 %v207_v11, %v1747_v33  ;;  %v272_v11 = vld [vmem:[%s12470_s30 + $0x330] sm:$0xff] }
  0x6f   : > { %1649 = vmatprep.mubr.f32.mxu1 %v16541_v21  ;;  %v12870_v57 = vsub.f32 %v177_v9, %v2364_v30  ;;  %v12876_v6 = vpack.c.bf16 %v2368_v32, %v2364_v30  ;;  %16566 = vst [vmem:[#allocation8_spill] sm:$0xff] %v12880_v8  ;;  %v12888_v9 = vsub.f32 %v176_v37, %v2366_v56  ;;  %v2378_v12 = vand.u32 4294901760, %v272_v11 }
  0x70   : > { %10986 = vmatpush1.bf16.msra.mxu0 %v10985_v53  ;;  %v273_v53 = vld [vmem:[%s12470_s30 + $0x338] sm:$0xff]  ;;  %v12896_v35 = vsub.f32 %v208_v25, %v2370_v47  ;;  %v12909_v37 = vsub.f32 %v271_v41, %v1755_v0  ;;  %v367_v47 = vld [vmem:[%s12470_s30 + $0x628] sm:$0x3f] }
  0x71   : > { %11058 = vmatpush1.bf16.msra.mxu1 %v11057_v10  ;;  %10988 = vmatprep.subr.bf16.mxu0 %v10987_v5  ;;  %v1751_v10 = vand.u32 4294901760, %v239_v49  ;;  %v270_v5 = vld [vmem:[%s12470_s30 + $0x320] sm:$0xff] }
  0x72   : > { %11060 = vmatprep.subr.bf16.mxu1 %v11059_v40  ;;  %v12886_v40 = vsub.f32 %v206_v26, %v1749_v34  ;;  %v1757_v33 = vand.u32 4294901760, %v270_v5  ;;  %v304_v34 = vld [vmem:[%s12470_s30 + $0x430] sm:$0xff] }
  0x73   : > { %v12901_v26 = vpack.c.bf16 %v1755_v0, %v1751_v10  ;;  %v12903_v23 = vsub.f32 %v239_v49, %v1751_v10  ;;  %v336_v10 = vld [vmem:[%s12470_s30 + $0x530] sm:$0xff] }
  0x74   : > { %10990 = vmatpush1.bf16.msra.mxu0 %v10989_v28  ;;  %v2376_v28 = vand.u32 4294901760, %v273_v53  ;;  %v12928_v41 = vsub.f32 %v270_v5, %v1757_v33 }
  0x75   : > { %11062 = vmatpush1.bf16.msra.mxu1 %v11061_v18  ;;  %973 = vmatprep.subr.mxu0 %v665_v63  ;;  %v12882_v63 = vsub.f32 %v174_v17, %v1745_v44  ;;  %v1753_v17 = vand.u32 4294901760, %v238_v1  ;;  %16568 = vst [vmem:[#allocation10_spill] sm:$0xff] %v12901_v26  ;;  %v337_v18 = vld [vmem:[%s12470_s30 + $0x538] sm:$0xff]  ;;  %v334_v44 = vld [vmem:[%s12470_s30 + $0x520] sm:$0xff] }
  0x76   : > { %1594 = vmatprep.subr.mxu1 %v1286_v39  ;;  %v335_v39 = vld [vmem:[%s12470_s30 + $0x528] sm:$0xff]  ;;  %v12915_v25 = vpack.c.bf16 %v2376_v28, %v2372_v19  ;;  %v12917_v30 = vsub.f32 %v273_v53, %v2376_v28  ;;  %v2384_v56 = vand.u32 4294901760, %v337_v18  ;;  %v12936_v53 = vpack.c.bf16 %v2378_v12, %v2374_v24 }
  0x77   : > { %v12919_v32 = vsub.f32 %v238_v1, %v1753_v17  ;;  %v12926_v49 = vpack.c.bf16 %v1757_v33, %v1753_v17  ;;  %v1765_v19 = vand.u32 4294901760, %v334_v44  ;;  %v2382_v28 = vand.u32 4294901760, %v304_v34 }
  0x78   : > { %977 = vmatpush1.msra.mxu0 %v671_v38  ;;  %v305_v38 = vld [vmem:[%s12470_s30 + $0x438] sm:$0xff]  ;;  %16569 = vst [vmem:[#allocation11_spill] sm:$0xff] %v12915_v25  ;;  %16571 = vst [vmem:[#allocation13_spill] sm:$0xff] %v12936_v53  ;;  %v12954_v17 = vsel %vm404_vm1, %v367_v47, 0  ;;  %v12960_v33 = vsub.f32 %v337_v18, %v2384_v56  ;;  %v16583_v46 = vand.u32 4294901760, %v12917_v30 }
  0x79   : > { %1598 = vmatpush1.msra.mxu1 %v1292_v2  ;;  %10992 = vmatprep.subr.bf16.mxu0 %v12486_v22  ;;  %v1759_v22 = vand.u32 4294901760, %v303_v42  ;;  %v1763_v2 = vand.u32 4294901760, %v335_v39  ;;  %16570 = vst [vmem:[#allocation12_spill] sm:$0xff] %v12926_v49 }
  0x7a   : > { %11064 = vmatprep.subr.bf16.mxu1 %v12497_v29  ;;  %1030 = vmatmul.mubr.f32.vlgmr.msra.gmra.mrb[0].mxu0 %v12462_v3  ;;  %v302_v29 = vld [vmem:[%s12470_s30 + $0x420] sm:$0xff] }
  0x7b   : > { %10994 = vmatpush1.bf16.msra.mxu0 %v12501_v31  ;;  %1651 = vmatmul.mubr.f32.vlgmr.msra.gmra.mrb[0].mxu1 %v12462_v3  ;;  %v2380_v31 = vand.u32 4294901760, %v305_v38  ;;  %v12944_v0 = vpack.c.bf16 %v1763_v2, %v1759_v22  ;;  %v12946_v1 = vsub.f32 %v303_v42, %v1759_v22  ;;  %v1761_v5 = vand.u32 4294901760, %v302_v29 }
  0x7c   : > { %11066 = vmatpush1.bf16.msra.mxu1 %v12514_v45  ;;  %10996 = vmatprep.subr.bf16.mxu0 %v12525_v52  ;;  %v12938_v45 = vsub.f32 %v240_v20, %v2374_v24  ;;  %v12940_v52 = vsub.f32 %v272_v11, %v2378_v12  ;;  %v12949_v20 = vsub.f32 %v335_v39, %v1763_v2  ;;  %v2386_v24 = vand.u32 4294901760, %v336_v10  ;;  %v369_v12 = vld [vmem:[%s12470_s30 + $0x638] sm:$0x3f] }
  0x7d   : > { %11068 = vmatprep.subr.bf16.mxu1 %v12529_v54  ;;  %1114 = vmatprep.mubr.f32.mxu0 %v16541_v21  ;;  %16572 = vst [vmem:[#allocation14_spill] sm:$0xff] %v12944_v0  ;;  %v12385_v54 = vmov 0   ;;  %v12951_v11 = vsub.f32 %v305_v38, %v2380_v31  ;;  %v12958_v42 = vpack.c.bf16 %v2384_v56, %v2380_v31  ;;  %v16294_v39 = vand.u32 4294901760, %v12862_v51  ;;  %v368_v38 = vld [vmem:[%s12470_s30 + $0x630] sm:$0x3f] }
  0x7e   : > { %1735 = vmatprep.mubr.f32.mxu1 %v16541_v21  ;;  %12317 = vset.pattern.permute.xlu0 %v12385_v54  ;;  %v16293_v22 = vand.u32 4294901760, %v12868_v55  ;;  %v16295_v2 = vand.u32 4294901760, %v12870_v57  ;;  %v12971_v31 = vpack.c.bf16 %v1765_v19, %v1761_v5  ;;  %v12973_v18 = vsub.f32 %v302_v29, %v1761_v5 }
  0x7f   : > { %10998 = vmatpush1.bf16.msra.mxu0 %v12543_v7  ;;  %397 = vperm.xlu0 %12317, %v394_v48   ;;  %16573 = vst [vmem:[#allocation15_spill] sm:$0xff] %v12958_v42  ;;  %v366_v7 = vld [vmem:[%s12470_s30 + $0x620] sm:$0x3f]  ;;  %v12976_v56 = vand.u32 4294901760, %v12954_v17  ;;  %v16297_v54 = vand.u32 4294901760, %v12888_v9  ;;  %v12987_v29 = vpack.c.bf16 %v2386_v24, %v2382_v28  ;;  %v12990_v5 = vsel %vm404_vm1, %v369_v12, 0 }
  0x80   : > { %11070 = vmatpush1.bf16.msra.mxu1 %v12552_v14  ;;  %11000 = vmatprep.subr.bf16.mxu0 %v12556_v16  ;;  %v16298_v16 = vand.u32 4294901760, %v12882_v63  ;;  %16574 = vst [vmem:[#allocation16_spill] sm:$0xff] %v12971_v31  ;;  %v418_v48 = vsel %vm404_vm1, %v366_v7, 0  ;;  %v16296_v14 = vand.u32 4294901760, %v12896_v35  ;;  %v424_v47 = vsel %vm404_vm1, %v368_v38, 0 }
  0x81   : > { %11072 = vmatprep.subr.bf16.mxu1 %v12566_v27  ;;  %16575 = vst [vmem:[#allocation17_spill] sm:$0xff] %v12976_v56  ;;  %v12980_v27 = vsub.f32 %v334_v44, %v1765_v19  ;;  %16576 = vst [vmem:[#allocation18_spill] sm:$0xff] %v12987_v29  ;;  %v1848_v44 = vsub.f32 %v12868_v55, %v16293_v22  ;;  %v13009_v7 = vsub.f32 %v304_v34, %v2382_v28 }
  0x82   : > { %v1842_v12 = vsub.f32 %v12882_v63, %v16298_v16  ;;  %v13011_v38 = vand.u32 4294901760, %v418_v48  ;;  %v2475_v34 = vsub.f32 %v12896_v35, %v16296_v14 }
  0x83   : > { %11002 = vmatpush1.bf16.msra.mxu0 %v12583_v43  ;;  %v1836_v43 = vsub.f32 %v12862_v51, %v16294_v39  ;;  %v16300_v39 = vand.u32 4294901760, %v12903_v23  ;;  %v1849_v14 = vand.u32 4294901760, %v1848_v44 }
  0x84   : > { %11074 = vmatpush1.bf16.msra.mxu1 %v12589_v50  ;;  %1061 = vmatprep.subr.mxu0 %v12596_v58  ;;  %v2457_v50 = vsub.f32 %v12870_v57, %v16295_v2  ;;  %v16577_v58 = vand.u32 4294901760, %v12878_v59  ;;  %16578 = vst [vmem:[#allocation19_spill] sm:$0xff] %v13011_v38  ;;  %v13018_v2 = vsub.f32 %v336_v10, %v2386_v24  ;;  %v13035_v10 = vand.u32 4294901760, %v424_v47 }
  0x85   : > { %1682 = vmatprep.subr.mxu1 %v12599_v60  ;;  %v16579_v60 = vand.u32 4294901760, %v12886_v40  ;;  %v1837_v24 = vand.u32 4294901760, %v1836_v43  ;;  %v1843_v28 = vand.u32 4294901760, %v1842_v12  ;;  %v16581_v12 = vand.u32 4294901760, %v12909_v37 }
  0x86   : > { %v2469_v19 = vsub.f32 %v12878_v59, %v16577_v58  ;;  %v2463_v58 = vsub.f32 %v12888_v9, %v16297_v54  ;;  %v2458_v54 = vand.u32 4294901760, %v2457_v50  ;;  %v13049_v44 = vsub.f32 %v424_v47, %v13035_v10 }
  0x87   : > { %v1854_v22 = vsub.f32 %v12886_v40, %v16579_v60  ;;  %1063 = vmatpush1.msra.mxu0 %v12603_v61  ;;  %v13030_v60 = vand.u32 4294901760, %v12990_v5  ;;  %v13033_v61 = vsub.f32 %v418_v48, %v13011_v38  ;;  %v1860_v48 = vsub.f32 %v12903_v23, %v16300_v39 }
  0x88   : > { %1684 = vmatpush1.msra.mxu1 %v12605_v62  ;;  %1116 = vmatmul.mubr.f32.vlgmr.msra.gmra.mrb[0].mxu0 %v12462_v3  ;;  %v2470_v16 = vand.u32 4294901760, %v2469_v19  ;;  %v2464_v50 = vand.u32 4294901760, %v2463_v58  ;;  %v2476_v19 = vand.u32 4294901760, %v2475_v34  ;;  %v11087_v47 = vpack.c.bf16 %v1849_v14, %v1837_v24 }
  0x89   : > { %16580 = vst [vmem:[#allocation20_spill] sm:$0xff] %v13030_v60  ;;  %1737 = vmatmul.mubr.f32.vlgmr.msra.gmra.mrb[0].mxu1 %v12462_v3  ;;  %11076 = vmatprep.subr.bf16.mxu0 %v12860_v36  ;;  %v1855_v62 = vand.u32 4294901760, %v1854_v22  ;;  %v1872_v22 = vsub.f32 %v12909_v37, %v16581_v12  ;;  %v16311_v34 = vand.u32 4294901760, %v12946_v1  ;;  %v16582_v39 = vand.u32 4294901760, %v12911_v13 }
  0x8a   : > { %11148 = vmatprep.subr.bf16.mxu1 %v12876_v6  ;;  %11078 = vmatpush1.bf16.msra.mxu0 %v12880_v8  ;;  %v11159_v58 = vpack.c.bf16 %v2470_v16, %v2458_v54  ;;  %v11161_v14 = vpack.c.bf16 %v2476_v19, %v2464_v50  ;;  %v16587_v50 = vand.u32 4294901760, %v12940_v52  ;;  %v16588_v24 = vand.u32 4294901760, %v12949_v20 }
  0x8b   : > { %11150 = vmatpush1.bf16.msra.mxu1 %v12894_v15  ;;  %11080 = vmatprep.subr.bf16.mxu0 %v12901_v26  ;;  %v1861_v15 = vand.u32 4294901760, %v1860_v48  ;;  %v2481_v43 = vsub.f32 %v12911_v13, %v16582_v39  ;;  %v2493_v26 = vsub.f32 %v12917_v30, %v16583_v46  ;;  %v1873_v16 = vand.u32 4294901760, %v1872_v22 }
  0x8c   : > { %11152 = vmatprep.subr.bf16.mxu1 %v12915_v25  ;;  %1821 = vmatprep.mubr.f32.mxu0 %v16541_v21  ;;  %v11089_v25 = vpack.c.bf16 %v1855_v62, %v1843_v28  ;;  %v16584_v28 = vand.u32 4294901760, %v12919_v32  ;;  %v16585_v62 = vand.u32 4294901760, %v12928_v41  ;;  %v16586_v48 = vand.u32 4294901760, %v12938_v45 }
  0x8d   : > { %2442 = vmatprep.mubr.f32.mxu1 %v16541_v21  ;;  %v2499_v19 = vsub.f32 %v12940_v52, %v16587_v50  ;;  %v1884_v22 = vsub.f32 %v12946_v1, %v16311_v34  ;;  %v13100_v50 = vsub.f32 %v12954_v17, %v12976_v56  ;;  %v16589_v34 = vand.u32 4294901760, %v12951_v11 }
  0x8e   : > { %11082 = vmatpush1.bf16.msra.mxu0 %v12926_v49  ;;  %v1866_v39 = vsub.f32 %v12919_v32, %v16584_v28  ;;  %v1878_v46 = vsub.f32 %v12928_v41, %v16585_v62  ;;  %v2487_v12 = vsub.f32 %v12938_v45, %v16586_v48  ;;  %v1896_v28 = vsub.f32 %v12949_v20, %v16588_v24 }
  0x8f   : > { %11154 = vmatpush1.bf16.msra.mxu1 %v12936_v53  ;;  %11084 = vmatprep.subr.bf16.mxu0 %v12944_v0  ;;  %v2494_v24 = vand.u32 4294901760, %v2493_v26  ;;  %v2505_v62 = vsub.f32 %v12951_v11, %v16589_v34  ;;  %v16590_v54 = vand.u32 4294901760, %v12960_v33  ;;  %v13112_v0 = vsub.f32 %v12990_v5, %v13030_v60 }
  0x90   : > { %11156 = vmatprep.subr.bf16.mxu1 %v12958_v42  ;;  %v2482_v42 = vand.u32 4294901760, %v2481_v43  ;;  %v1867_v17 = vand.u32 4294901760, %v1866_v39  ;;  %v1879_v48 = vand.u32 4294901760, %v1878_v46  ;;  %v1897_v26 = vand.u32 4294901760, %v1896_v28 }
  0x91   : > { %v2517_v43 = vsub.f32 %v12960_v33, %v16590_v54  ;;  %v16591_v53 = vand.u32 4294901760, %v12973_v18  ;;  %v16592_v49 = vand.u32 4294901760, %v12980_v27  ;;  %v11091_v5 = vpack.c.bf16 %v1873_v16, %v1861_v15  ;;  %v16595_v15 = vld [vmem:[#allocation7_spill] sm:$0xff] }
  0x92   : > { %11086 = vmatpush1.bf16.msra.mxu0 %v12971_v31  ;;  %v2500_v31 = vand.u32 4294901760, %v2499_v19  ;;  %v16593_v8 = vand.u32 4294901760, %v13009_v7  ;;  %v11093_v16 = vpack.c.bf16 %v1879_v48, %v1867_v17  ;;  %v1913_v19 = vand.u32 4294901760, %v13033_v61 }
  0x93   : > { %11158 = vmatpush1.bf16.msra.mxu1 %v12987_v29  ;;  %1768 = vmatprep.subr.mxu0 %v12976_v56  ;;  %v2488_v29 = vand.u32 4294901760, %v2487_v12  ;;  %v1885_v56 = vand.u32 4294901760, %v1884_v22  ;;  %v1890_v34 = vsub.f32 %v12973_v18, %v16591_v53  ;;  %v1902_v54 = vsub.f32 %v12980_v27, %v16592_v49 }
  0x94   : > { %2389 = vmatprep.subr.mxu1 %v13030_v60  ;;  %v2511_v39 = vsub.f32 %v13009_v7, %v16593_v8  ;;  %v16594_v12 = vand.u32 4294901760, %v13018_v2  ;;  %v11163_v53 = vpack.c.bf16 %v2494_v24, %v2482_v42  ;;  %v2506_v22 = vand.u32 4294901760, %v2505_v62 }
  0x95   : > { %v2518_v28 = vand.u32 4294901760, %v2517_v43  ;;  %v2528_v49 = vand.u32 4294901760, %v13112_v0  ;;  %v11095_v8 = vpack.c.bf16 %v1897_v26, %v1885_v56  ;;  %v1903_v60 = vand.u32 4294901760, %v1902_v54 }
  0x96   : > { %1770 = vmatpush1.msra.mxu0 %v13011_v38  ;;  %v2523_v46 = vsub.f32 %v13018_v2, %v16594_v12  ;;  %v11165_v38 = vpack.c.bf16 %v2500_v31, %v2488_v29  ;;  %v1891_v12 = vand.u32 4294901760, %v1890_v34  ;;  %v2512_v42 = vand.u32 4294901760, %v2511_v39 }
  0x97   : > { %2391 = vmatpush1.msra.mxu1 %v13035_v10  ;;  %11088 = vmatprep.subr.bf16.mxu0 %v11087_v47  ;;  %v16596_v62 = vand.u32 4294901760, %v13100_v50  ;;  %v2534_v24 = vand.u32 4294901760, %v13049_v44  ;;  %v11167_v31 = vpack.c.bf16 %v2518_v28, %v2506_v22  ;;  %v1914_v29 = vsub.f32 %v13033_v61, %v1913_v19 }
  0x98   : > { %11160 = vmatprep.subr.bf16.mxu1 %v11159_v58  ;;  %1827 = vmatmul.mubr.f32.vlgmr.msra.gmra.mrb[2].mxu0 %v16595_v15  ;;  %v2524_v47 = vand.u32 4294901760, %v2523_v46  ;;  %v11097_v56 = vpack.c.bf16 %v1903_v60, %v1891_v12  ;;  %v11099_v60 = vpack.c.bf16 %v12868_v55, %v12862_v51  ;;  %v11101_v54 = vpack.c.bf16 %v12886_v40, %v12882_v63 }
  0x99   : > { %11090 = vmatpush1.bf16.msra.mxu0 %v11089_v25  ;;  %2448 = vmatmul.mubr.f32.vlgmr.msra.gmra.mrb[2].mxu1 %v16595_v15  ;;  %v1908_v58 = vsub.f32 %v13100_v50, %v16596_v62  ;;  %v2529_v25 = vsub.f32 %v13112_v0, %v2528_v49  ;;  %v2535_v43 = vsub.f32 %v13049_v44, %v2534_v24  ;;  %v1915_v26 = vand.u32 4294901760, %v1914_v29  ;;  %v16599_v62 = vld [vmem:[#allocation10_spill] sm:$0xff]  ;;  %v16604_v29 = vld [vmem:[#allocation15_spill] sm:$0xff] }
  0x9a   : > { %11162 = vmatpush1.bf16.msra.mxu1 %v11161_v14  ;;  %11092 = vmatprep.subr.bf16.mxu0 %v11091_v5  ;;  %v11169_v14 = vpack.c.bf16 %v2524_v47, %v2512_v42  ;;  %v11173_v5 = vpack.c.bf16 %v12896_v35, %v12888_v9  ;;  %v11103_v39 = vpack.c.bf16 %v12909_v37, %v12903_v23  ;;  %v16597_v42 = vld [vmem:[#allocation8_spill] sm:$0xff]  ;;  %v16598_v47 = vld [vmem:[#allocation9_spill] sm:$0xff] }
  0x9b   : > { %11164 = vmatprep.subr.bf16.mxu1 %v11163_v53  ;;  %1967 = vmatprep.mubr.f32.mxu0 %v16541_v21  ;;  %v1909_v48 = vand.u32 4294901760, %v1908_v58  ;;  %v2530_v17 = vand.u32 4294901760, %v2529_v25  ;;  %v2536_v34 = vand.u32 4294901760, %v2535_v43  ;;  %v11175_v46 = vpack.c.bf16 %v12917_v30, %v12911_v13  ;;  %v16600_v58 = vld [vmem:[#allocation11_spill] sm:$0xff]  ;;  %v16602_v25 = vld [vmem:[#allocation13_spill] sm:$0xff] }
  0x9c   : > { %2588 = vmatprep.mubr.f32.mxu1 %v16541_v21  ;;  %v11105_v53 = vpack.c.bf16 %v12928_v41, %v12919_v32  ;;  %v11177_v22 = vpack.c.bf16 %v12940_v52, %v12938_v45  ;;  %v11107_v28 = vpack.c.bf16 %v12949_v20, %v12946_v1  ;;  %v11181_v12 = vpack.c.bf16 %v13018_v2, %v13009_v7  ;;  %v16607_v43 = vld [vmem:[#allocation17_spill] sm:$0xff] }
  0x9d   : > { %11094 = vmatpush1.bf16.msra.mxu0 %v11093_v16  ;;  %v11179_v16 = vpack.c.bf16 %v12960_v33, %v12951_v11 }
  0x9e   : > { %11166 = vmatpush1.bf16.msra.mxu1 %v11165_v38  ;;  %11096 = vmatprep.subr.bf16.mxu0 %v11095_v8  ;;  %v11171_v38 = vpack.c.bf16 %v12878_v59, %v12870_v57  ;;  %v11109_v8 = vpack.c.bf16 %v12980_v27, %v12973_v18 }
  0x9f   : > { %11168 = vmatprep.subr.bf16.mxu1 %v11167_v31  ;;  %v16601_v31 = vld [vmem:[#allocation12_spill] sm:$0xff] }
  0xa1   : > { %11098 = vmatpush1.bf16.msra.mxu0 %v11097_v56  ;;  %v16603_v56 = vld [vmem:[#allocation14_spill] sm:$0xff] }
  0xa2   : > { %11170 = vmatpush1.bf16.msra.mxu1 %v11169_v14  ;;  %1910 = vmatprep.subr.mxu0 %v1909_v48  ;;  %v16605_v14 = vld [vmem:[#allocation16_spill] sm:$0xff]  ;;  %v16606_v48 = vld [vmem:[#allocation18_spill] sm:$0xff] }
  0xa3   : > { %2531 = vmatprep.subr.mxu1 %v2530_v17  ;;  %v16608_v17 = vand.u32 4294901760, %v12862_v51  ;;  %v16616_v51 = vand.u32 4294901760, %v12888_v9  ;;  %v16622_v9 = vld [vmem:[#allocation6_spill] sm:$0xff] }
  0xa5   : > { %1916 = vmatpush1.msra.mxu0 %v1915_v26  ;;  %v16609_v26 = vand.u32 4294901760, %v12868_v55  ;;  %v16617_v55 = vand.u32 4294901760, %v12896_v35  ;;  %v16623_v35 = vand.u32 4294901760, %v12919_v32  ;;  %v16629_v32 = vand.u32 4294901760, %v12951_v11 }
  0xa6   : > { %2537 = vmatpush1.msra.mxu1 %v2536_v34  ;;  %11100 = vmatprep.subr.bf16.mxu0 %v11099_v60  ;;  %v16610_v60 = vld [vmem:[#allocation20_spill] sm:$0xff]  ;;  %v16632_v11 = vand.u32 4294901760, %v12980_v27 }
  0xa7   : > { %11172 = vmatprep.subr.bf16.mxu1 %v11171_v38  ;;  %1969 = vmatmul.mubr.f32.vlgmr.msra.gmra.mrb[2].mxu0 %v12462_v3  ;;  %v11123_v34 = vpack.c.bf16 %v16609_v26, %v16608_v17  ;;  %v16611_v38 = vand.u32 4294901760, %v12870_v57  ;;  %v16619_v57 = vand.u32 4294901760, %v12909_v37  ;;  %v16627_v17 = vand.u32 4294901760, %v12946_v1  ;;  %v178_v1 = vld [vmem:[%s12470_s30 + $0x40] sm:$0xff] }
  0xa8   : > { %11102 = vmatpush1.bf16.msra.mxu0 %v11101_v54  ;;  %2590 = vmatmul.mubr.f32.vlgmr.msra.gmra.mrb[2].mxu1 %v12462_v3  ;;  %v16612_v54 = vand.u32 4294901760, %v12878_v59  ;;  %v16628_v26 = vand.u32 4294901760, %v12949_v20  ;;  %v210_v20 = vld [vmem:[%s12470_s30 + $0x140] sm:$0xff]  ;;  %v2987_v27 = vand.u32 4294901760, %v178_v1 }
  0xa9   : > { %11174 = vmatpush1.bf16.msra.mxu1 %v11173_v5  ;;  %11104 = vmatprep.subr.bf16.mxu0 %v11103_v39  ;;  %v16613_v39 = vand.u32 4294901760, %v12882_v63  ;;  %v16620_v63 = vand.u32 4294901760, %v12911_v13  ;;  %v16625_v13 = vand.u32 4294901760, %v12938_v45  ;;  %v181_v45 = vld [vmem:[%s12470_s30 + $0x58] sm:$0xff] }
  0xaa   : > { %11176 = vmatprep.subr.bf16.mxu1 %v11175_v46  ;;  %2067 = vmatprep.mubr.f32.mxu0 %v16541_v21  ;;  %v11195_v5 = vpack.c.bf16 %v16612_v54, %v16611_v38  ;;  %v16614_v46 = vand.u32 4294901760, %v12886_v40  ;;  %v16621_v40 = vand.u32 4294901760, %v12917_v30  ;;  %v16626_v30 = vand.u32 4294901760, %v12940_v52  ;;  %v179_v38 = vld [vmem:[%s12470_s30 + $0x48] sm:$0xff]  ;;  %v213_v52 = vld [vmem:[%s12470_s30 + $0x158] sm:$0xff] }
  0xab   : > { %2688 = vmatprep.mubr.f32.mxu1 %v16541_v21  ;;  %v211_v54 = vld [vmem:[%s12470_s30 + $0x148] sm:$0xff] }
  0xac   : > { %11106 = vmatpush1.bf16.msra.mxu0 %v11105_v53  ;;  %v11125_v53 = vpack.c.bf16 %v16614_v46, %v16613_v39  ;;  %v16631_v39 = vand.u32 4294901760, %v12973_v18  ;;  %v2985_v46 = vand.u32 4294901760, %v179_v38  ;;  %v212_v18 = vld [vmem:[%s12470_s30 + $0x150] sm:$0xff] }
  0xad   : > { %11178 = vmatpush1.bf16.msra.mxu1 %v11177_v22  ;;  %11108 = vmatprep.subr.bf16.mxu0 %v11107_v28  ;;  %v16615_v22 = vld [vmem:[#allocation19_spill] sm:$0xff]  ;;  %v11197_v28 = vpack.c.bf16 %v16617_v55, %v16616_v51  ;;  %v16633_v51 = vand.u32 4294901760, %v13009_v7  ;;  %v16634_v55 = vand.u32 4294901760, %v13018_v2 }
  0xae   : > { %11180 = vmatprep.subr.bf16.mxu1 %v11179_v16  ;;  %v16618_v16 = vand.u32 4294901760, %v12903_v23  ;;  %v16624_v23 = vand.u32 4294901760, %v12928_v41  ;;  %v16630_v41 = vand.u32 4294901760, %v12960_v33  ;;  %v11133_v33 = vpack.c.bf16 %v16632_v11, %v16631_v39 }
  0xaf   : > { %v13266_v7 = vsub.f32 %v179_v38, %v2985_v46  ;;  %v13285_v11 = vsub.f32 %v178_v1, %v2987_v27 }
  0xb0   : > { %11110 = vmatpush1.bf16.msra.mxu0 %v11109_v8  ;;  %v11127_v59 = vpack.c.bf16 %v16619_v57, %v16618_v16  ;;  %v11199_v8 = vpack.c.bf16 %v16621_v40, %v16620_v63  ;;  %v11129_v37 = vpack.c.bf16 %v16624_v23, %v16623_v35  ;;  %v3606_v16 = vand.u32 4294901760, %v181_v45  ;;  %v243_v40 = vld [vmem:[%s12470_s30 + $0x248] sm:$0xff]  ;;  %v245_v35 = vld [vmem:[%s12470_s30 + $0x258] sm:$0xff] }
  0xb1   : > { %11182 = vmatpush1.bf16.msra.mxu1 %v11181_v12  ;;  %2013 = vmatprep.subr.mxu0 %v13100_v50  ;;  %v11201_v12 = vpack.c.bf16 %v16626_v30, %v16625_v13  ;;  %v3610_v57 = vand.u32 4294901760, %v213_v52  ;;  %v2991_v63 = vand.u32 4294901760, %v210_v20  ;;  %v277_v13 = vld [vmem:[%s12470_s30 + $0x358] sm:$0xff]  ;;  %v242_v30 = vld [vmem:[%s12470_s30 + $0x240] sm:$0xff] }
  0xb2   : > { %2634 = vmatprep.subr.mxu1 %v13112_v0 }
  0xb3   : > { %v13283_v39 = vpack.c.bf16 %v2991_v63, %v2987_v27  ;;  %v13293_v0 = vsub.f32 %v210_v20, %v2991_v63  ;;  %v309_v20 = vld [vmem:[%s12470_s30 + $0x458] sm:$0xff]  ;;  %v306_v63 = vld [vmem:[%s12470_s30 + $0x440] sm:$0xff] }
  0xb4   : > { %2016 = vmatpush1.msra.mxu0 %v13033_v61 }
  0xb5   : > { %2637 = vmatpush1.msra.mxu1 %v13049_v44  ;;  %11112 = vmatprep.subr.bf16.mxu0 %v12860_v36 }
  0xb6   : > { %11184 = vmatprep.subr.bf16.mxu1 %v12876_v6  ;;  %2070 = vmatmul.mubr.f32.vlgmr.msra.gmra.mrb[2].mxu0 %v12465_v4 }
  0xb7   : > { %11114 = vmatpush1.bf16.msra.mxu0 %v16597_v42  ;;  %2691 = vmatmul.mubr.f32.vlgmr.msra.gmra.mrb[2].mxu1 %v12465_v4 }
  0xb8   : > { %11186 = vmatpush1.bf16.msra.mxu1 %v16598_v47  ;;  %11116 = vmatprep.subr.bf16.mxu0 %v16599_v62 }
  0xb9   : > { %11188 = vmatprep.subr.bf16.mxu1 %v16600_v58  ;;  %2154 = vmatprep.mubr.f32.mxu0 %v16541_v21 }
  0xba   : > { %2775 = vmatprep.mubr.f32.mxu1 %v16541_v21 }
  0xbb   : > { %11118 = vmatpush1.bf16.msra.mxu0 %v16601_v31 }
  0xbc   : > { %11190 = vmatpush1.bf16.msra.mxu1 %v16602_v25  ;;  %11120 = vmatprep.subr.bf16.mxu0 %v16603_v56 }
  0xbd   : > { %11192 = vmatprep.subr.bf16.mxu1 %v16604_v29 }
  0xbf   : > { %11122 = vmatpush1.bf16.msra.mxu0 %v16605_v14 }
  0xc0   : > { %11194 = vmatpush1.bf16.msra.mxu1 %v16606_v48  ;;  %2101 = vmatprep.subr.mxu0 %v16607_v43 }
  0xc1   : > { %2722 = vmatprep.subr.mxu1 %v16610_v60 }
  0xc3   : > { %2103 = vmatpush1.msra.mxu0 %v16615_v22 }
  0xc4   : > { %2724 = vmatpush1.msra.mxu1 %v13035_v10  ;;  %11124 = vmatprep.subr.bf16.mxu0 %v11123_v34  ;;  %v11131_v34 = vpack.c.bf16 %v16628_v26, %v16627_v17  ;;  %v16635_v17 = vand.u32 4294901760, %v13100_v50  ;;  %v244_v50 = vld [vmem:[%s12470_s30 + $0x250] sm:$0xff] }
  0xc5   : > { %11196 = vmatprep.subr.bf16.mxu1 %v11195_v5  ;;  %2158 = vmatmul.mubr.f32.vlgmr.msra.gmra.mrb[2].mxu0 %v16622_v9  ;;  %v11203_v5 = vpack.c.bf16 %v16630_v41, %v16629_v32  ;;  %v2993_v32 = vand.u32 4294901760, %v243_v40  ;;  %v13279_v41 = vsub.f32 %v181_v45, %v3606_v16  ;;  %v3616_v61 = vand.u32 4294901760, %v244_v50 }
  0xc6   : > { %11126 = vmatpush1.bf16.msra.mxu0 %v11125_v53  ;;  %2779 = vmatmul.mubr.f32.vlgmr.msra.gmra.mrb[2].mxu1 %v16622_v9  ;;  %v2989_v53 = vand.u32 4294901760, %v211_v54 }
  0xc7   : > { %11198 = vmatpush1.bf16.msra.mxu1 %v11197_v28  ;;  %11128 = vmatprep.subr.bf16.mxu0 %v11127_v59  ;;  %v11205_v28 = vpack.c.bf16 %v16634_v55, %v16633_v51  ;;  %v180_v59 = vld [vmem:[%s12470_s30 + $0x50] sm:$0xff]  ;;  %v307_v55 = vld [vmem:[%s12470_s30 + $0x448] sm:$0xff] }
  0xc8   : > { %11200 = vmatprep.subr.bf16.mxu1 %v11199_v8  ;;  %2270 = vmatprep.mubr.f32.mxu0 %v16541_v21  ;;  %v275_v8 = vld [vmem:[%s12470_s30 + $0x348] sm:$0xff]  ;;  %v13264_v23 = vpack.c.bf16 %v2989_v53, %v2985_v46  ;;  %v3608_v2 = vand.u32 4294901760, %v180_v59  ;;  %v13273_v26 = vsub.f32 %v211_v54, %v2989_v53  ;;  %v3614_v54 = vand.u32 4294901760, %v245_v35 }
  0xc9   : > { %2891 = vmatprep.mubr.f32.mxu1 %v16541_v21  ;;  %v2997_v38 = vand.u32 4294901760, %v275_v8  ;;  %v3618_v46 = vand.u32 4294901760, %v277_v13  ;;  %v2995_v53 = vand.u32 4294901760, %v242_v30 }
  0xca   : > { %11130 = vmatpush1.bf16.msra.mxu0 %v11129_v37  ;;  %v3612_v37 = vand.u32 4294901760, %v212_v18  ;;  %v13297_v45 = vsub.f32 %v180_v59, %v3608_v2  ;;  %v13314_v44 = vsub.f32 %v245_v35, %v3614_v54  ;;  %v3622_v35 = vand.u32 4294901760, %v309_v20 }
  0xcb   : > { %11202 = vmatpush1.bf16.msra.mxu1 %v11201_v12  ;;  %11132 = vmatprep.subr.bf16.mxu0 %v11131_v34  ;;  %v274_v12 = vld [vmem:[%s12470_s30 + $0x340] sm:$0xff]  ;;  %v13275_v34 = vpack.c.bf16 %v3610_v57, %v3606_v16  ;;  %v13304_v1 = vpack.c.bf16 %v2997_v38, %v2993_v32  ;;  %v13306_v16 = vsub.f32 %v243_v40, %v2993_v32 }
  0xcc   : > { %11204 = vmatprep.subr.bf16.mxu1 %v11203_v5  ;;  %v13281_v5 = vsub.f32 %v213_v52, %v3610_v57  ;;  %v2999_v51 = vand.u32 4294901760, %v274_v12  ;;  %v13299_v52 = vsub.f32 %v212_v18, %v3612_v37  ;;  %v341_v57 = vld [vmem:[%s12470_s30 + $0x558] sm:$0xff]  ;;  %v13312_v59 = vsub.f32 %v275_v8, %v2997_v38 }
  0xcd   : > { %16638 = vst [vmem:[#allocation9_spill] sm:$0xff] %v13304_v1  ;;  %v13318_v18 = vpack.c.bf16 %v3618_v46, %v3614_v54  ;;  %v13320_v27 = vsub.f32 %v277_v13, %v3618_v46  ;;  %v13327_v40 = vsub.f32 %v242_v30, %v2995_v53  ;;  %v13338_v32 = vsub.f32 %v244_v50, %v3616_v61  ;;  %v371_v46 = vld [vmem:[%s12470_s30 + $0x648] sm:$0x3f] }
  0xce   : > { %11134 = vmatpush1.bf16.msra.mxu0 %v11133_v33  ;;  %v276_v33 = vld [vmem:[%s12470_s30 + $0x350] sm:$0xff]  ;;  %16637 = vst [vmem:[#allocation8_spill] sm:$0xff] %v13299_v52  ;;  %v13329_v8 = vsub.f32 %v274_v12, %v2999_v51  ;;  %v3003_v38 = vand.u32 4294901760, %v306_v63  ;;  %v16651_v9 = vand.u32 4294901760, %v13306_v16 }
  0xcf   : > { %11206 = vmatpush1.bf16.msra.mxu1 %v11205_v28  ;;  %2215 = vmatprep.subr.mxu0 %v16635_v17  ;;  %v339_v28 = vld [vmem:[%s12470_s30 + $0x548] sm:$0xff]  ;;  %16639 = vst [vmem:[#allocation10_spill] sm:$0xff] %v13318_v18  ;;  %v340_v17 = vld [vmem:[%s12470_s30 + $0x550] sm:$0xff] }
  0xd0   : > { %2836 = vmatprep.subr.mxu1 %v2528_v49  ;;  %v13295_v49 = vpack.c.bf16 %v3612_v37, %v3608_v2  ;;  %v3626_v2 = vand.u32 4294901760, %v341_v57  ;;  %v308_v37 = vld [vmem:[%s12470_s30 + $0x450] sm:$0xff] }
  0xd1   : > { %v3624_v54 = vand.u32 4294901760, %v308_v37 }
  0xd2   : > { %2219 = vmatpush1.msra.mxu0 %v1913_v19  ;;  %16636 = vst [vmem:[#allocation7_spill] sm:$0xff] %v13295_v49  ;;  %v3620_v19 = vand.u32 4294901760, %v276_v33 }
  0xd3   : > { %2840 = vmatpush1.msra.mxu1 %v2534_v24  ;;  %11136 = vmatprep.subr.bf16.mxu0 %v12860_v36  ;;  %v3001_v36 = vand.u32 4294901760, %v307_v55  ;;  %v3005_v24 = vand.u32 4294901760, %v339_v28 }
  0xd4   : > { %11208 = vmatprep.subr.bf16.mxu1 %v12876_v6  ;;  %2272 = vmatmul.mubr.f32.vlgmr.msra.gmra.mrb[2].mxu0 %v12462_v3  ;;  %v13322_v6 = vpack.c.bf16 %v2999_v51, %v2995_v53  ;;  %v13336_v13 = vpack.c.bf16 %v3620_v19, %v3616_v61  ;;  %v13355_v53 = vpack.c.bf16 %v3626_v2, %v3622_v35  ;;  %v16329_v61 = vand.u32 4294901760, %v13266_v7 }
  0xd5   : > { %11138 = vmatpush1.bf16.msra.mxu0 %v16597_v42  ;;  %2893 = vmatmul.mubr.f32.vlgmr.msra.gmra.mrb[2].mxu1 %v12462_v3  ;;  %v338_v42 = vld [vmem:[%s12470_s30 + $0x540] sm:$0xff]  ;;  %v13345_v30 = vsub.f32 %v307_v55, %v3001_v36  ;;  %v13347_v12 = vsub.f32 %v339_v28, %v3005_v24  ;;  %v13357_v51 = vsub.f32 %v341_v57, %v3626_v2  ;;  %v373_v55 = vld [vmem:[%s12470_s30 + $0x658] sm:$0x3f]  ;;  %v13372_v57 = vsel %vm404_vm1, %v371_v46, 0 }
  0xd6   : > { %16640 = vst [vmem:[#allocation11_spill] sm:$0xff] %v13322_v6  ;;  %11210 = vmatpush1.bf16.msra.mxu1 %v16598_v47  ;;  %11140 = vmatprep.subr.bf16.mxu0 %v16599_v62  ;;  %16641 = vst [vmem:[#allocation12_spill] sm:$0xff] %v13336_v13  ;;  %v13340_v47 = vsub.f32 %v276_v33, %v3620_v19  ;;  %v13343_v62 = vpack.c.bf16 %v3005_v24, %v3001_v36  ;;  %v3007_v50 = vand.u32 4294901760, %v338_v42  ;;  %v370_v28 = vld [vmem:[%s12470_s30 + $0x640] sm:$0x3f] }
  0xd7   : > { %11212 = vmatprep.subr.bf16.mxu1 %v16600_v58  ;;  %2356 = vmatprep.mubr.f32.mxu0 %v16541_v21  ;;  %v13350_v58 = vsub.f32 %v309_v20, %v3622_v35  ;;  %v3628_v33 = vand.u32 4294901760, %v340_v17  ;;  %16643 = vst [vmem:[#allocation14_spill] sm:$0xff] %v13355_v53  ;;  %v372_v19 = vld [vmem:[%s12470_s30 + $0x650] sm:$0x3f]  ;;  %v13369_v24 = vsub.f32 %v306_v63, %v3003_v38  ;;  %v16332_v35 = vand.u32 4294901760, %v13297_v45 }
  0xd8   : > { %2977 = vmatprep.mubr.f32.mxu1 %v16541_v21  ;;  %16642 = vst [vmem:[#allocation13_spill] sm:$0xff] %v13343_v62  ;;  %v16333_v2 = vand.u32 4294901760, %v13299_v52  ;;  %v13379_v20 = vsub.f32 %v338_v42, %v3007_v50  ;;  %v430_v63 = vsel %vm404_vm1, %v370_v28, 0  ;;  %v436_v46 = vsel %vm404_vm1, %v372_v19, 0 }
  0xd9   : > { %11142 = vmatpush1.bf16.msra.mxu0 %v16601_v31  ;;  %v16328_v31 = vand.u32 4294901760, %v13273_v26  ;;  %v13381_v36 = vpack.c.bf16 %v3628_v33, %v3624_v54 }
  0xda   : > { %11214 = vmatpush1.bf16.msra.mxu1 %v16602_v25  ;;  %11144 = vmatprep.subr.bf16.mxu0 %v16603_v56  ;;  %v16330_v56 = vand.u32 4294901760, %v13293_v0  ;;  %v13384_v25 = vsel %vm404_vm1, %v373_v55, 0  ;;  %v16648_v55 = vand.u32 4294901760, %v13285_v11 }
  0xdb   : > { %11216 = vmatprep.subr.bf16.mxu1 %v16604_v29  ;;  %v13377_v29 = vpack.c.bf16 %v3007_v50, %v3003_v38  ;;  %16645 = vst [vmem:[#allocation16_spill] sm:$0xff] %v13381_v36  ;;  %v3090_v42 = vsub.f32 %v13273_v26, %v16328_v31  ;;  %v16646_v38 = vand.u32 4294901760, %v13279_v41  ;;  %v13410_v31 = vand.u32 4294901760, %v13372_v57 }
  0xdc   : > { %v3084_v28 = vsub.f32 %v13285_v11, %v16648_v55  ;;  %v3096_v19 = vsub.f32 %v13293_v0, %v16330_v56  ;;  %v13420_v55 = vsub.f32 %v308_v37, %v3624_v54  ;;  %v13425_v56 = vand.u32 4294901760, %v13384_v25 }
  0xdd   : > { %11146 = vmatpush1.bf16.msra.mxu0 %v16605_v14  ;;  %16644 = vst [vmem:[#allocation15_spill] sm:$0xff] %v13377_v29  ;;  %v3078_v14 = vsub.f32 %v13266_v7, %v16329_v61  ;;  %16649 = vst [vmem:[#allocation18_spill] sm:$0xff] %v13410_v31  ;;  %v13422_v61 = vsub.f32 %v340_v17, %v3628_v33  ;;  %v3091_v4 = vand.u32 4294901760, %v3090_v42 }
  0xde   : > { %11218 = vmatpush1.bf16.msra.mxu1 %v16606_v48  ;;  %2303 = vmatprep.subr.mxu0 %v16607_v43  ;;  %v3699_v48 = vsub.f32 %v13279_v41, %v16646_v38  ;;  %v16647_v43 = vand.u32 4294901760, %v13281_v5  ;;  %v3717_v38 = vsub.f32 %v13299_v52, %v16333_v2  ;;  %v13432_v2 = vand.u32 4294901760, %v436_v46 }
  0xdf   : > { %2924 = vmatprep.subr.mxu1 %v16610_v60  ;;  %v3705_v60 = vsub.f32 %v13297_v45, %v16332_v35  ;;  %v13430_v35 = vand.u32 4294901760, %v430_v63  ;;  %v3085_v17 = vand.u32 4294901760, %v3084_v28  ;;  %v3097_v54 = vand.u32 4294901760, %v3096_v19 }
  0xe0   : > { %v3711_v50 = vsub.f32 %v13281_v5, %v16647_v43  ;;  %v3079_v43 = vand.u32 4294901760, %v3078_v14  ;;  %v3718_v33 = vand.u32 4294901760, %v3717_v38  ;;  %v3102_v52 = vsub.f32 %v13306_v16, %v16651_v9 }
  0xe1   : > { %2305 = vmatpush1.msra.mxu0 %v16615_v22  ;;  %16650 = vst [vmem:[#allocation17_spill] sm:$0xff] %v13430_v35  ;;  %v3700_v22 = vand.u32 4294901760, %v3699_v48  ;;  %v13445_v42 = vsub.f32 %v430_v63, %v13430_v35  ;;  %v13448_v48 = vsub.f32 %v436_v46, %v13432_v2  ;;  %v16344_v63 = vand.u32 4294901760, %v13338_v32 }
  0xe2   : > { %2926 = vmatpush1.msra.mxu1 %v13035_v10  ;;  %2358 = vmatmul.mubr.f32.vlgmr.msra.gmra.mrb[2].mxu0 %v12462_v3  ;;  %v3712_v37 = vand.u32 4294901760, %v3711_v50  ;;  %v3706_v10 = vand.u32 4294901760, %v3705_v60  ;;  %v16652_v50 = vand.u32 4294901760, %v13312_v59  ;;  %v16347_v38 = vand.u32 4294901760, %v13340_v47 }
  0xe3   : > { %2979 = vmatmul.mubr.f32.vlgmr.msra.gmra.mrb[2].mxu1 %v12462_v3  ;;  %11220 = vmatprep.subr.bf16.mxu0 %v13264_v23  ;;  %v11231_v46 = vpack.c.bf16 %v3091_v4, %v3079_v43  ;;  %v16653_v9 = vand.u32 4294901760, %v13314_v44  ;;  %v16654_v43 = vand.u32 4294901760, %v13320_v27  ;;  %v16659_v19 = vand.u32 4294901760, %v13357_v51 }
  0xe4   : > { %11292 = vmatprep.subr.bf16.mxu1 %v13275_v34  ;;  %11222 = vmatpush1.bf16.msra.mxu0 %v13283_v39  ;;  %v3114_v28 = vsub.f32 %v13312_v59, %v16652_v50  ;;  %v11303_v14 = vpack.c.bf16 %v3712_v37, %v3700_v22  ;;  %v16348_v50 = vand.u32 4294901760, %v13345_v30 }
  0xe5   : > { %11294 = vmatpush1.bf16.msra.mxu1 %v13295_v49  ;;  %11224 = vmatprep.subr.bf16.mxu0 %v13304_v1  ;;  %v11305_v1 = vpack.c.bf16 %v3718_v33, %v3706_v10  ;;  %v3103_v49 = vand.u32 4294901760, %v3102_v52  ;;  %v3723_v60 = vsub.f32 %v13314_v44, %v16653_v9  ;;  %v3735_v22 = vsub.f32 %v13320_v27, %v16654_v43 }
  0xe6   : > { %11296 = vmatprep.subr.bf16.mxu1 %v13318_v18  ;;  %3063 = vmatprep.mubr.f32.mxu0 %v16541_v21  ;;  %v11233_v18 = vpack.c.bf16 %v3097_v54, %v3085_v17  ;;  %v3115_v4 = vand.u32 4294901760, %v3114_v28  ;;  %v16655_v52 = vand.u32 4294901760, %v13327_v40  ;;  %v16656_v54 = vand.u32 4294901760, %v13329_v8 }
  0xe7   : > { %3684 = vmatprep.mubr.f32.mxu1 %v16541_v21  ;;  %v3729_v33 = vsub.f32 %v13338_v32, %v16344_v63  ;;  %v3741_v28 = vsub.f32 %v13340_v47, %v16347_v38  ;;  %v3126_v9 = vsub.f32 %v13345_v30, %v16348_v50  ;;  %v16657_v43 = vand.u32 4294901760, %v13347_v12 }
  0xe8   : > { %11226 = vmatpush1.bf16.msra.mxu0 %v13322_v6  ;;  %v3108_v17 = vsub.f32 %v13327_v40, %v16655_v52  ;;  %v3120_v10 = vsub.f32 %v13329_v8, %v16656_v54  ;;  %v3724_v37 = vand.u32 4294901760, %v3723_v60  ;;  %v13500_v38 = vsub.f32 %v13372_v57, %v13410_v31 }
  0xe9   : > { %11298 = vmatpush1.bf16.msra.mxu1 %v13336_v13  ;;  %11228 = vmatprep.subr.bf16.mxu0 %v13343_v62  ;;  %v3138_v52 = vsub.f32 %v13347_v12, %v16657_v43  ;;  %v3736_v43 = vand.u32 4294901760, %v3735_v22  ;;  %v16658_v50 = vand.u32 4294901760, %v13350_v58  ;;  %v3759_v60 = vsub.f32 %v13357_v51, %v16659_v19 }
  0xea   : > { %11300 = vmatprep.subr.bf16.mxu1 %v13355_v53  ;;  %v13512_v53 = vsub.f32 %v13384_v25, %v13425_v56  ;;  %v3109_v57 = vand.u32 4294901760, %v3108_v17  ;;  %v3121_v63 = vand.u32 4294901760, %v3120_v10  ;;  %v16660_v62 = vand.u32 4294901760, %v13369_v24 }
  0xeb   : > { %v3747_v54 = vsub.f32 %v13350_v58, %v16658_v50  ;;  %v3139_v22 = vand.u32 4294901760, %v3138_v52  ;;  %v16661_v13 = vand.u32 4294901760, %v13379_v20  ;;  %v11235_v25 = vpack.c.bf16 %v3115_v4, %v3103_v49 }
  0xec   : > { %11230 = vmatpush1.bf16.msra.mxu0 %v13377_v29  ;;  %v3742_v29 = vand.u32 4294901760, %v3741_v28  ;;  %v3132_v50 = vsub.f32 %v13369_v24, %v16660_v62  ;;  %v16662_v6 = vand.u32 4294901760, %v13420_v55  ;;  %v16663_v10 = vand.u32 4294901760, %v13422_v61 }
  0xed   : > { %11302 = vmatpush1.bf16.msra.mxu1 %v13381_v36  ;;  %3010 = vmatprep.subr.mxu0 %v13410_v31  ;;  %v3730_v36 = vand.u32 4294901760, %v3729_v33  ;;  %v3127_v31 = vand.u32 4294901760, %v3126_v9  ;;  %v3144_v19 = vsub.f32 %v13379_v20, %v16661_v13  ;;  %v11307_v62 = vpack.c.bf16 %v3736_v43, %v3724_v37 }
  0xee   : > { %3631 = vmatprep.subr.mxu1 %v13425_v56  ;;  %v3753_v17 = vsub.f32 %v13420_v55, %v16662_v6  ;;  %v3765_v33 = vsub.f32 %v13422_v61, %v16663_v10  ;;  %v3748_v9 = vand.u32 4294901760, %v3747_v54  ;;  %v3760_v52 = vand.u32 4294901760, %v3759_v60 }
  0xef   : > { %v3770_v13 = vand.u32 4294901760, %v13512_v53  ;;  %v11237_v49 = vpack.c.bf16 %v3121_v63, %v3109_v57  ;;  %v11309_v4 = vpack.c.bf16 %v3742_v29, %v3730_v36  ;;  %v11239_v6 = vpack.c.bf16 %v3139_v22, %v3127_v31 }
  0xf0   : > { %3012 = vmatpush1.msra.mxu0 %v13430_v35  ;;  %v3133_v10 = vand.u32 4294901760, %v3132_v50  ;;  %v3145_v35 = vand.u32 4294901760, %v3144_v19  ;;  %v3155_v28 = vand.u32 4294901760, %v13445_v42  ;;  %v3766_v37 = vand.u32 4294901760, %v3765_v33 }
  0xf1   : > { %3633 = vmatpush1.msra.mxu1 %v13432_v2  ;;  %11232 = vmatprep.subr.bf16.mxu0 %v11231_v46  ;;  %v3754_v46 = vand.u32 4294901760, %v3753_v17  ;;  %v16664_v54 = vand.u32 4294901760, %v13500_v38  ;;  %v3776_v43 = vand.u32 4294901760, %v13448_v48  ;;  %v11311_v36 = vpack.c.bf16 %v3760_v52, %v3748_v9  ;;  %v16665_v17 = vld [vmem:[#allocation8_spill] sm:$0xff] }
  0xf2   : > { %11304 = vmatprep.subr.bf16.mxu1 %v11303_v14  ;;  %3069 = vmatmul.mubr.f32.vlgmr.msra.gmra.mrb[4].mxu0 %v16595_v15  ;;  %v3156_v31 = vsub.f32 %v13445_v42, %v3155_v28  ;;  %v11315_v19 = vpack.c.bf16 %v13281_v5, %v13279_v41  ;;  %v11317_v33 = vpack.c.bf16 %v16665_v17, %v13297_v45 }
  0xf3   : > { %11234 = vmatpush1.bf16.msra.mxu0 %v11233_v18  ;;  %3690 = vmatmul.mubr.f32.vlgmr.msra.gmra.mrb[4].mxu1 %v16595_v15  ;;  %v3150_v14 = vsub.f32 %v13500_v38, %v16664_v54  ;;  %v3771_v18 = vsub.f32 %v13512_v53, %v3770_v13  ;;  %v11313_v29 = vpack.c.bf16 %v3766_v37, %v3754_v46  ;;  %v16666_v37 = vld [vmem:[#allocation5_spill] sm:$0xff]  ;;  %v16667_v54 = vld [vmem:[#allocation7_spill] sm:$0xff] }
  0xf4   : > { %11306 = vmatpush1.bf16.msra.mxu1 %v11305_v1  ;;  %11236 = vmatprep.subr.bf16.mxu0 %v11235_v25  ;;  %v11241_v1 = vpack.c.bf16 %v3145_v35, %v3133_v10  ;;  %v3777_v60 = vsub.f32 %v13448_v48, %v3776_v43  ;;  %v3157_v22 = vand.u32 4294901760, %v3156_v31  ;;  %v11243_v35 = vpack.c.bf16 %v13273_v26, %v13266_v7  ;;  %v16672_v31 = vld [vmem:[#allocation13_spill] sm:$0xff] }
  0xf5   : > { %11308 = vmatprep.subr.bf16.mxu1 %v11307_v62  ;;  %3209 = vmatprep.mubr.f32.mxu0 %v16541_v21  ;;  %v3151_v63 = vand.u32 4294901760, %v3150_v14  ;;  %v3772_v57 = vand.u32 4294901760, %v3771_v18  ;;  %v11245_v25 = vpack.c.bf16 %v13293_v0, %v13285_v11  ;;  %v11247_v62 = vpack.c.bf16 %v13312_v59, %v13306_v16  ;;  %v16668_v14 = vld [vmem:[#allocation9_spill] sm:$0xff]  ;;  %v16670_v18 = vld [vmem:[#allocation11_spill] sm:$0xff] }
  0xf6   : > { %3830 = vmatprep.mubr.f32.mxu1 %v16541_v21  ;;  %v3778_v50 = vand.u32 4294901760, %v3777_v60  ;;  %v11319_v9 = vpack.c.bf16 %v13320_v27, %v13314_v44  ;;  %v11249_v52 = vpack.c.bf16 %v13329_v8, %v13327_v40  ;;  %v11253_v10 = vpack.c.bf16 %v13379_v20, %v13369_v24  ;;  %v16675_v60 = vld [vmem:[#allocation16_spill] sm:$0xff] }
  0xf7   : > { %11238 = vmatpush1.bf16.msra.mxu0 %v11237_v49  ;;  %v11321_v49 = vpack.c.bf16 %v13340_v47, %v13338_v32  ;;  %v11325_v46 = vpack.c.bf16 %v13422_v61, %v13420_v55 }
  0xf8   : > { %11310 = vmatpush1.bf16.msra.mxu1 %v11309_v4  ;;  %11240 = vmatprep.subr.bf16.mxu0 %v11239_v6  ;;  %v11251_v4 = vpack.c.bf16 %v13347_v12, %v13345_v30  ;;  %v11323_v6 = vpack.c.bf16 %v13357_v51, %v13350_v58 }
  0xf9   : > { %11312 = vmatprep.subr.bf16.mxu1 %v11311_v36  ;;  %v16669_v36 = vld [vmem:[#allocation10_spill] sm:$0xff] }
  0xfb   : > { %11242 = vmatpush1.bf16.msra.mxu0 %v11241_v1  ;;  %v16671_v1 = vld [vmem:[#allocation12_spill] sm:$0xff] }
  0xfc   : > { %11314 = vmatpush1.bf16.msra.mxu1 %v11313_v29  ;;  %3152 = vmatprep.subr.mxu0 %v3151_v63  ;;  %v16673_v29 = vld [vmem:[#allocation14_spill] sm:$0xff]  ;;  %v16674_v63 = vld [vmem:[#allocation15_spill] sm:$0xff] }
  0xfd   : > { %3773 = vmatprep.subr.mxu1 %v3772_v57  ;;  %v16676_v57 = vld [vmem:[#allocation18_spill] sm:$0xff] }
  0xff   : > { %3158 = vmatpush1.msra.mxu0 %v3157_v22  ;;  %v16677_v22 = vand.u32 4294901760, %v13266_v7  ;;  %v16684_v7 = vand.u32 4294901760, %v13297_v45  ;;  %v16690_v45 = vld [vmem:[#allocation6_spill] sm:$0xff] }
 0x100   : > { %3779 = vmatpush1.msra.mxu1 %v3778_v50  ;;  %11244 = vmatprep.subr.bf16.mxu0 %v11243_v35  ;;  %v16678_v50 = vand.u32 4294901760, %v13273_v26  ;;  %v16685_v26 = vand.u32 4294901760, %v16665_v17 }
 0x101   : > { %11316 = vmatprep.subr.bf16.mxu1 %v11315_v19  ;;  %3211 = vmatmul.mubr.f32.vlgmr.msra.gmra.mrb[4].mxu0 %v12462_v3  ;;  %v16679_v19 = vand.u32 4294901760, %v13279_v41  ;;  %v16687_v41 = vand.u32 4294901760, %v13312_v59  ;;  %v16692_v59 = vand.u32 4294901760, %v13329_v8  ;;  %v16697_v8 = vand.u32 4294901760, %v13350_v58 }
 0x102   : > { %11246 = vmatpush1.bf16.msra.mxu0 %v11245_v25  ;;  %3832 = vmatmul.mubr.f32.vlgmr.msra.gmra.mrb[4].mxu1 %v12462_v3  ;;  %v11267_v35 = vpack.c.bf16 %v16678_v50, %v16677_v22  ;;  %v16680_v25 = vand.u32 4294901760, %v13281_v5  ;;  %v16695_v50 = vand.u32 4294901760, %v13345_v30 }
 0x103   : > { %11318 = vmatpush1.bf16.msra.mxu1 %v11317_v33  ;;  %11248 = vmatprep.subr.bf16.mxu0 %v11247_v62  ;;  %v16681_v62 = vand.u32 4294901760, %v13285_v11  ;;  %v16688_v11 = vand.u32 4294901760, %v13314_v44  ;;  %v16693_v44 = vand.u32 4294901760, %v13338_v32  ;;  %v16699_v32 = vand.u32 4294901760, %v13369_v24 }
 0x104   : > { %11320 = vmatprep.subr.bf16.mxu1 %v11319_v9  ;;  %3309 = vmatprep.mubr.f32.mxu0 %v16541_v21  ;;  %v11339_v33 = vpack.c.bf16 %v16680_v25, %v16679_v19  ;;  %v16682_v9 = vand.u32 4294901760, %v13293_v0  ;;  %v16689_v0 = vand.u32 4294901760, %v13320_v27  ;;  %v16694_v27 = vand.u32 4294901760, %v13340_v47  ;;  %v215_v25 = vld [vmem:[%s12470_s30 + $0x168] sm:$0xff] }
 0x105   : > { %3930 = vmatprep.mubr.f32.mxu1 %v16541_v21  ;;  %v16700_v47 = vand.u32 4294901760, %v13379_v20  ;;  %v16701_v24 = vand.u32 4294901760, %v13420_v55  ;;  %v16702_v20 = vand.u32 4294901760, %v13422_v61 }
 0x106   : > { %11250 = vmatpush1.bf16.msra.mxu0 %v11249_v52  ;;  %v11269_v52 = vpack.c.bf16 %v16682_v9, %v16681_v62  ;;  %v11345_v22 = vpack.c.bf16 %v16694_v27, %v16693_v44  ;;  %v16698_v62 = vand.u32 4294901760, %v13357_v51  ;;  %v4231_v51 = vand.u32 4294901760, %v215_v25  ;;  %v246_v27 = vld [vmem:[%s12470_s30 + $0x260] sm:$0xff] }
 0x107   : > { %11322 = vmatpush1.bf16.msra.mxu1 %v11321_v49  ;;  %11252 = vmatprep.subr.bf16.mxu0 %v11251_v4  ;;  %v16683_v49 = vld [vmem:[#allocation17_spill] sm:$0xff]  ;;  %v11341_v4 = vpack.c.bf16 %v16685_v26, %v16684_v7  ;;  %v11277_v30 = vpack.c.bf16 %v16700_v47, %v16699_v32 }
 0x108   : > { %11324 = vmatprep.subr.bf16.mxu1 %v11323_v6  ;;  %v16686_v6 = vand.u32 4294901760, %v13306_v16  ;;  %v16691_v16 = vand.u32 4294901760, %v13327_v40  ;;  %v217_v40 = vld [vmem:[%s12470_s30 + $0x178] sm:$0xff]  ;;  %v11347_v9 = vpack.c.bf16 %v16698_v62, %v16697_v8 }
 0x109   : > { %v4852_v26 = vand.u32 4294901760, %v217_v40 }
 0x10a   : > { %11254 = vmatpush1.bf16.msra.mxu0 %v11253_v10  ;;  %v11271_v5 = vpack.c.bf16 %v16687_v41, %v16686_v6  ;;  %v11343_v10 = vpack.c.bf16 %v16689_v0, %v16688_v11  ;;  %v11273_v17 = vpack.c.bf16 %v16692_v59, %v16691_v16  ;;  %v184_v6 = vld [vmem:[%s12470_s30 + $0x70] sm:$0xff]  ;;  %v247_v0 = vld [vmem:[%s12470_s30 + $0x268] sm:$0xff]  ;;  %v249_v16 = vld [vmem:[%s12470_s30 + $0x278] sm:$0xff] }
 0x10b   : > { %11326 = vmatpush1.bf16.msra.mxu1 %v11325_v46  ;;  %3255 = vmatprep.subr.mxu0 %v13500_v38  ;;  %v183_v46 = vld [vmem:[%s12470_s30 + $0x68] sm:$0xff]  ;;  %v216_v41 = vld [vmem:[%s12470_s30 + $0x170] sm:$0xff]  ;;  %v281_v59 = vld [vmem:[%s12470_s30 + $0x378] sm:$0xff]  ;;  %v4850_v55 = vand.u32 4294901760, %v184_v6  ;;  %v4235_v8 = vand.u32 4294901760, %v247_v0  ;;  %v4856_v47 = vand.u32 4294901760, %v249_v16 }
 0x10c   : > { %3876 = vmatprep.subr.mxu1 %v13512_v53  ;;  %v4227_v58 = vand.u32 4294901760, %v183_v46  ;;  %v4854_v61 = vand.u32 4294901760, %v216_v41 }
 0x10e   : > { %3258 = vmatpush1.msra.mxu0 %v13445_v42 }
 0x10f   : > { %3879 = vmatpush1.msra.mxu1 %v13448_v48  ;;  %11256 = vmatprep.subr.bf16.mxu0 %v13264_v23 }
 0x110   : > { %11328 = vmatprep.subr.bf16.mxu1 %v13275_v34  ;;  %3312 = vmatmul.mubr.f32.vlgmr.msra.gmra.mrb[4].mxu0 %v16666_v37 }
 0x111   : > { %11258 = vmatpush1.bf16.msra.mxu0 %v13283_v39  ;;  %3933 = vmatmul.mubr.f32.vlgmr.msra.gmra.mrb[4].mxu1 %v16666_v37 }
 0x112   : > { %11330 = vmatpush1.bf16.msra.mxu1 %v16667_v54  ;;  %11260 = vmatprep.subr.bf16.mxu0 %v16668_v14 }
 0x113   : > { %11332 = vmatprep.subr.bf16.mxu1 %v16669_v36  ;;  %3396 = vmatprep.mubr.f32.mxu0 %v16541_v21 }
 0x114   : > { %4017 = vmatprep.mubr.f32.mxu1 %v16541_v21 }
 0x115   : > { %11262 = vmatpush1.bf16.msra.mxu0 %v16670_v18 }
 0x116   : > { %11334 = vmatpush1.bf16.msra.mxu1 %v16671_v1  ;;  %11264 = vmatprep.subr.bf16.mxu0 %v16672_v31 }
 0x117   : > { %11336 = vmatprep.subr.bf16.mxu1 %v16673_v29 }
 0x119   : > { %11266 = vmatpush1.bf16.msra.mxu0 %v16674_v63 }
 0x11a   : > { %11338 = vmatpush1.bf16.msra.mxu1 %v16675_v60  ;;  %3343 = vmatprep.subr.mxu0 %v16676_v57 }
 0x11b   : > { %3964 = vmatprep.subr.mxu1 %v13425_v56 }
 0x11d   : > { %3345 = vmatpush1.msra.mxu0 %v16683_v49 }
 0x11e   : > { %3966 = vmatpush1.msra.mxu1 %v13432_v2  ;;  %11268 = vmatprep.subr.bf16.mxu0 %v11267_v35  ;;  %v16696_v35 = vand.u32 4294901760, %v13347_v12  ;;  %v182_v12 = vld [vmem:[%s12470_s30 + $0x60] sm:$0xff] }
 0x11f   : > { %11340 = vmatprep.subr.bf16.mxu1 %v11339_v33  ;;  %3400 = vmatmul.mubr.f32.vlgmr.msra.gmra.mrb[4].mxu0 %v16690_v45  ;;  %v185_v33 = vld [vmem:[%s12470_s30 + $0x78] sm:$0xff] }
 0x120   : > { %11270 = vmatpush1.bf16.msra.mxu0 %v11269_v52  ;;  %4021 = vmatmul.mubr.f32.vlgmr.msra.gmra.mrb[4].mxu1 %v16690_v45  ;;  %v11275_v19 = vpack.c.bf16 %v16696_v35, %v16695_v50  ;;  %v214_v52 = vld [vmem:[%s12470_s30 + $0x160] sm:$0xff]  ;;  %v4848_v7 = vand.u32 4294901760, %v185_v33  ;;  %v16703_v50 = vand.u32 4294901760, %v13500_v38  ;;  %v13673_v35 = vsub.f32 %v183_v46, %v4227_v58  ;;  %v280_v38 = vld [vmem:[%s12470_s30 + $0x370] sm:$0xff] }
 0x121   : > { %11342 = vmatpush1.bf16.msra.mxu1 %v11341_v4  ;;  %11272 = vmatprep.subr.bf16.mxu0 %v11271_v5  ;;  %v11349_v4 = vpack.c.bf16 %v16702_v20, %v16701_v24  ;;  %v4229_v5 = vand.u32 4294901760, %v182_v12  ;;  %v4233_v11 = vand.u32 4294901760, %v214_v52  ;;  %v248_v24 = vld [vmem:[%s12470_s30 + $0x270] sm:$0xff]  ;;  %v13685_v20 = vsub.f32 %v217_v40, %v4852_v26  ;;  %v343_v40 = vld [vmem:[%s12470_s30 + $0x568] sm:$0xff] }
 0x122   : > { %11344 = vmatprep.subr.bf16.mxu1 %v11343_v10  ;;  %3512 = vmatprep.mubr.f32.mxu0 %v16541_v21  ;;  %v279_v10 = vld [vmem:[%s12470_s30 + $0x368] sm:$0xff]  ;;  %v13667_v44 = vpack.c.bf16 %v4852_v26, %v4848_v7  ;;  %v13706_v26 = vsub.f32 %v247_v0, %v4235_v8  ;;  %v4858_v42 = vand.u32 4294901760, %v248_v24  ;;  %v342_v0 = vld [vmem:[%s12470_s30 + $0x560] sm:$0xff] }
 0x123   : > { %4133 = vmatprep.mubr.f32.mxu1 %v16541_v21  ;;  %v4239_v62 = vand.u32 4294901760, %v279_v10  ;;  %v13681_v32 = vpack.c.bf16 %v4233_v11, %v4229_v5  ;;  %v13687_v46 = vsub.f32 %v182_v12, %v4229_v5  ;;  %v13691_v53 = vsub.f32 %v214_v52, %v4233_v11  ;;  %v313_v52 = vld [vmem:[%s12470_s30 + $0x478] sm:$0xff]  ;;  %v310_v11 = vld [vmem:[%s12470_s30 + $0x460] sm:$0xff] }
 0x124   : > { %11274 = vmatpush1.bf16.msra.mxu0 %v11273_v17  ;;  %v13665_v17 = vpack.c.bf16 %v4231_v51, %v4227_v58  ;;  %v16720_v37 = vand.u32 4294901760, %v13706_v26 }
 0x125   : > { %11346 = vmatpush1.bf16.msra.mxu1 %v11345_v22  ;;  %11276 = vmatprep.subr.bf16.mxu0 %v11275_v19  ;;  %v278_v22 = vld [vmem:[%s12470_s30 + $0x360] sm:$0xff]  ;;  %v13675_v19 = vsub.f32 %v215_v25, %v4231_v51  ;;  %v4237_v25 = vand.u32 4294901760, %v246_v27  ;;  %v13697_v51 = vsub.f32 %v216_v41, %v4854_v61  ;;  %v13704_v12 = vpack.c.bf16 %v4239_v62, %v4235_v8 }
 0x126   : > { %11348 = vmatprep.subr.bf16.mxu1 %v11347_v9  ;;  %v13679_v9 = vsub.f32 %v185_v33, %v4848_v7  ;;  %v4241_v58 = vand.u32 4294901760, %v278_v22  ;;  %v13695_v33 = vsub.f32 %v184_v6, %v4850_v55  ;;  %v311_v7 = vld [vmem:[%s12470_s30 + $0x468] sm:$0xff]  ;;  %v13712_v6 = vsub.f32 %v279_v10, %v4239_v62  ;;  %v13727_v10 = vld [vmem:[%s12470_s30 + $0x470] sm:$0xff] }
 0x127   : > { %16705 = vst [vmem:[#allocation19_spill] sm:$0xff] %v13697_v51  ;;  %16706 = vst [vmem:[#allocation8_spill] sm:$0xff] %v13704_v12  ;;  %v4243_v5 = vand.u32 4294901760, %v311_v7  ;;  %v13741_v62 = vsub.f32 %v248_v24, %v4858_v42 }
 0x128   : > { %11278 = vmatpush1.bf16.msra.mxu0 %v11277_v30  ;;  %v4860_v30 = vand.u32 4294901760, %v281_v59  ;;  %v13722_v41 = vpack.c.bf16 %v4241_v58, %v4237_v25 }
 0x129   : > { %11350 = vmatpush1.bf16.msra.mxu1 %v11349_v4  ;;  %3457 = vmatprep.subr.mxu0 %v16703_v50  ;;  %v345_v4 = vld [vmem:[%s12470_s30 + $0x578] sm:$0xff]  ;;  %v375_v50 = vld [vmem:[%s12470_s30 + $0x668] sm:$0x3f] }
 0x12a   : > { %4078 = vmatprep.subr.mxu1 %v3770_v13  ;;  %v13693_v13 = vpack.c.bf16 %v4854_v61, %v4850_v55  ;;  %v13714_v48 = vpack.c.bf16 %v4860_v30, %v4856_v47  ;;  %16708 = vst [vmem:[#allocation9_spill] sm:$0xff] %v13722_v41  ;;  %v4864_v55 = vand.u32 4294901760, %v313_v52  ;;  %v4868_v61 = vand.u32 4294901760, %v345_v4 }
 0x12c   : > { %3461 = vmatpush1.msra.mxu0 %v3155_v28  ;;  %16704 = vst [vmem:[#allocation20_spill] sm:$0xff] %v13693_v13  ;;  %v4862_v28 = vand.u32 4294901760, %v280_v38  ;;  %16707 = vst [vmem:[#allocation7_spill] sm:$0xff] %v13714_v48 }
 0x12d   : > { %4082 = vmatpush1.msra.mxu1 %v3776_v43  ;;  %11280 = vmatprep.subr.bf16.mxu0 %v13264_v23  ;;  %v13716_v23 = vsub.f32 %v249_v16, %v4856_v47  ;;  %v13720_v43 = vsub.f32 %v281_v59, %v4860_v30  ;;  %v13731_v16 = vsub.f32 %v246_v27, %v4237_v25  ;;  %v344_v59 = vld [vmem:[%s12470_s30 + $0x570] sm:$0xff]  ;;  %v4245_v27 = vand.u32 4294901760, %v310_v11 }
 0x12e   : > { %11352 = vmatprep.subr.bf16.mxu1 %v13275_v34  ;;  %3514 = vmatmul.mubr.f32.vlgmr.msra.gmra.mrb[4].mxu0 %v12462_v3  ;;  %v4247_v34 = vand.u32 4294901760, %v343_v40  ;;  %v13739_v8 = vpack.c.bf16 %v4862_v28, %v4858_v42  ;;  %v4866_v47 = vand.u32 4294901760, %v13727_v10  ;;  %v4870_v24 = vand.u32 4294901760, %v344_v59  ;;  %v374_v42 = vld [vmem:[%s12470_s30 + $0x660] sm:$0x3f] }
 0x12f   : > { %11282 = vmatpush1.bf16.msra.mxu0 %v13283_v39  ;;  %4135 = vmatmul.mubr.f32.vlgmr.msra.gmra.mrb[4].mxu1 %v12462_v3  ;;  %v13733_v39 = vsub.f32 %v278_v22, %v4241_v58  ;;  %v4249_v22 = vand.u32 4294901760, %v342_v0  ;;  %v13759_v25 = vpack.c.bf16 %v4868_v61, %v4864_v55  ;;  %v13761_v58 = vsub.f32 %v313_v52, %v4864_v55 }
 0x130   : > { %11354 = vmatpush1.bf16.msra.mxu1 %v16667_v54  ;;  %11284 = vmatprep.subr.bf16.mxu0 %v16668_v14  ;;  %16709 = vst [vmem:[#allocation10_spill] sm:$0xff] %v13739_v8  ;;  %v13743_v54 = vsub.f32 %v280_v38, %v4862_v28  ;;  %v13746_v14 = vsub.f32 %v311_v7, %v4243_v5  ;;  %v13755_v38 = vsel %vm404_vm1, %v375_v50, 0  ;;  %v377_v7 = vld [vmem:[%s12470_s30 + $0x678] sm:$0x3f]  ;;  %v16366_v55 = vand.u32 4294901760, %v13695_v33 }
 0x131   : > { %11356 = vmatprep.subr.bf16.mxu1 %v16669_v36  ;;  %3598 = vmatprep.mubr.f32.mxu0 %v16541_v21  ;;  %v13750_v36 = vpack.c.bf16 %v4247_v34, %v4243_v5  ;;  %v13752_v30 = vsub.f32 %v343_v40, %v4247_v34  ;;  %16711 = vst [vmem:[#allocation12_spill] sm:$0xff] %v13759_v25  ;;  %v376_v40 = vld [vmem:[%s12470_s30 + $0x670] sm:$0x3f]  ;;  %v16363_v5 = vand.u32 4294901760, %v13679_v9  ;;  %v13785_v34 = vand.u32 4294901760, %v13755_v38 }
 0x132   : > { %4219 = vmatprep.mubr.f32.mxu1 %v16541_v21  ;;  %v13773_v50 = vsub.f32 %v345_v4, %v4868_v61  ;;  %v13775_v52 = vpack.c.bf16 %v4249_v22, %v4245_v27  ;;  %v13782_v28 = vsub.f32 %v342_v0, %v4249_v22  ;;  %v442_v4 = vsel %vm404_vm1, %v374_v42, 0 }
 0x133   : > { %11286 = vmatpush1.bf16.msra.mxu0 %v16670_v18  ;;  %16710 = vst [vmem:[#allocation11_spill] sm:$0xff] %v13750_v36  ;;  %v16367_v18 = vand.u32 4294901760, %v13697_v51  ;;  %16713 = vst [vmem:[#allocation14_spill] sm:$0xff] %v13785_v34  ;;  %v448_v61 = vsel %vm404_vm1, %v376_v40, 0  ;;  %v16715_v0 = vand.u32 4294901760, %v13675_v19 }
 0x134   : > { %11358 = vmatpush1.bf16.msra.mxu1 %v16671_v1  ;;  %11288 = vmatprep.subr.bf16.mxu0 %v16672_v31  ;;  %v16364_v31 = vand.u32 4294901760, %v13691_v53  ;;  %16712 = vst [vmem:[#allocation13_spill] sm:$0xff] %v13775_v52  ;;  %v13788_v1 = vsel %vm404_vm1, %v377_v7, 0  ;;  %v16717_v7 = vand.u32 4294901760, %v13687_v46 }
 0x135   : > { %11360 = vmatprep.subr.bf16.mxu1 %v16673_v29  ;;  %v13780_v29 = vsub.f32 %v310_v11, %v4245_v27  ;;  %v4332_v27 = vsub.f32 %v13675_v19, %v16715_v0  ;;  %v4959_v0 = vsub.f32 %v13697_v51, %v16367_v18  ;;  %v13836_v18 = vand.u32 4294901760, %v448_v61 }
 0x136   : > { %v4326_v42 = vsub.f32 %v13687_v46, %v16717_v7  ;;  %v4338_v40 = vsub.f32 %v13691_v53, %v16364_v31  ;;  %v13824_v7 = vsub.f32 %v13727_v10, %v4866_v47  ;;  %v13829_v31 = vand.u32 4294901760, %v13788_v1 }
 0x137   : > { %11290 = vmatpush1.bf16.msra.mxu0 %v16674_v63  ;;  %v16714_v63 = vand.u32 4294901760, %v13673_v35  ;;  %v4960_v45 = vand.u32 4294901760, %v4959_v0  ;;  %v4344_v51 = vsub.f32 %v13706_v26, %v16720_v37  ;;  %v16380_v0 = vand.u32 4294901760, %v13743_v54 }
 0x138   : > { %11362 = vmatpush1.bf16.msra.mxu1 %v16675_v60  ;;  %3545 = vmatprep.subr.mxu0 %v16676_v57  ;;  %v4941_v60 = vsub.f32 %v13679_v9, %v16363_v5  ;;  %v16716_v57 = vand.u32 4294901760, %v13685_v20  ;;  %v13826_v5 = vsub.f32 %v344_v59, %v4870_v24  ;;  %v16722_v37 = vand.u32 4294901760, %v13716_v23 }
 0x139   : > { %v4320_v11 = vsub.f32 %v13673_v35, %v16714_v63  ;;  %4166 = vmatprep.subr.mxu1 %v13425_v56  ;;  %v13813_v63 = vpack.c.bf16 %v4870_v24, %v4866_v47  ;;  %v4947_v56 = vsub.f32 %v13695_v33, %v16366_v55  ;;  %v13834_v55 = vand.u32 4294901760, %v442_v4 }
 0x13a   : > { %v4953_v22 = vsub.f32 %v13685_v20, %v16716_v57  ;;  %v4942_v10 = vand.u32 4294901760, %v4941_v60  ;;  %v4327_v47 = vand.u32 4294901760, %v4326_v42  ;;  %v4339_v24 = vand.u32 4294901760, %v4338_v40 }
 0x13b   : > { %16718 = vst [vmem:[#allocation15_spill] sm:$0xff] %v13813_v63  ;;  %3547 = vmatpush1.msra.mxu0 %v16683_v49  ;;  %16719 = vst [vmem:[#allocation16_spill] sm:$0xff] %v13834_v55  ;;  %v4321_v57 = vand.u32 4294901760, %v4320_v11  ;;  %v4333_v49 = vand.u32 4294901760, %v4332_v27  ;;  %v13849_v27 = vsub.f32 %v442_v4, %v13834_v55  ;;  %v13852_v60 = vsub.f32 %v448_v61, %v13836_v18 }
 0x13c   : > { %4168 = vmatpush1.msra.mxu1 %v13432_v2  ;;  %3600 = vmatmul.mubr.f32.vlgmr.msra.gmra.mrb[4].mxu0 %v12462_v3  ;;  %v4954_v59 = vand.u32 4294901760, %v4953_v22  ;;  %v4948_v2 = vand.u32 4294901760, %v4947_v56  ;;  %v16721_v22 = vand.u32 4294901760, %v13712_v6  ;;  %v16377_v4 = vand.u32 4294901760, %v13741_v62 }
 0x13d   : > { %4221 = vmatmul.mubr.f32.vlgmr.msra.gmra.mrb[4].mxu1 %v12462_v3  ;;  %11364 = vmatprep.subr.bf16.mxu0 %v13665_v17  ;;  %v11375_v61 = vpack.c.bf16 %v4333_v49, %v4321_v57  ;;  %v4965_v56 = vsub.f32 %v13716_v23, %v16722_v37  ;;  %v16723_v49 = vand.u32 4294901760, %v13720_v43  ;;  %v16728_v40 = vand.u32 4294901760, %v13773_v50 }
 0x13e   : > { %11436 = vmatprep.subr.bf16.mxu1 %v13667_v44  ;;  %11366 = vmatpush1.bf16.msra.mxu0 %v13681_v32  ;;  %v4356_v42 = vsub.f32 %v13712_v6, %v16721_v22  ;;  %v11447_v11 = vpack.c.bf16 %v4954_v59, %v4942_v10  ;;  %v16381_v22 = vand.u32 4294901760, %v13746_v14 }
 0x13f   : > { %11438 = vmatpush1.bf16.msra.mxu1 %v13693_v13  ;;  %11368 = vmatprep.subr.bf16.mxu0 %v13704_v12  ;;  %v11449_v12 = vpack.c.bf16 %v4960_v45, %v4948_v2  ;;  %v4345_v13 = vand.u32 4294901760, %v4344_v51  ;;  %v4977_v10 = vsub.f32 %v13720_v43, %v16723_v49  ;;  %v16724_v45 = vand.u32 4294901760, %v13731_v16 }
 0x140   : > { %11440 = vmatprep.subr.bf16.mxu1 %v13714_v48  ;;  %4305 = vmatprep.mubr.f32.mxu0 %v16541_v21  ;;  %v11377_v48 = vpack.c.bf16 %v4339_v24, %v4327_v47  ;;  %v4357_v57 = vand.u32 4294901760, %v4356_v42  ;;  %v16725_v47 = vand.u32 4294901760, %v13733_v39  ;;  %v4971_v2 = vsub.f32 %v13741_v62, %v16377_v4 }
 0x141   : > { %4926 = vmatprep.mubr.f32.mxu1 %v16541_v21  ;;  %v4350_v51 = vsub.f32 %v13731_v16, %v16724_v45  ;;  %v4983_v42 = vsub.f32 %v13743_v54, %v16380_v0  ;;  %v4368_v37 = vsub.f32 %v13746_v14, %v16381_v22  ;;  %v16726_v49 = vand.u32 4294901760, %v13752_v30 }
 0x142   : > { %11370 = vmatpush1.bf16.msra.mxu0 %v13722_v41  ;;  %v4362_v24 = vsub.f32 %v13733_v39, %v16725_v47  ;;  %v4966_v59 = vand.u32 4294901760, %v4965_v56  ;;  %v13904_v0 = vsub.f32 %v13755_v38, %v13785_v34  ;;  %v16727_v22 = vand.u32 4294901760, %v13761_v58 }
 0x143   : > { %11442 = vmatpush1.bf16.msra.mxu1 %v13739_v8  ;;  %11372 = vmatprep.subr.bf16.mxu0 %v13750_v36  ;;  %v4380_v45 = vsub.f32 %v13752_v30, %v16726_v49  ;;  %v4978_v49 = vand.u32 4294901760, %v4977_v10  ;;  %v5001_v56 = vsub.f32 %v13773_v50, %v16728_v40  ;;  %v4351_v38 = vand.u32 4294901760, %v4350_v51 }
 0x144   : > { %11444 = vmatprep.subr.bf16.mxu1 %v13759_v25  ;;  %v4989_v47 = vsub.f32 %v13761_v58, %v16727_v22  ;;  %v13916_v25 = vsub.f32 %v13788_v1, %v13829_v31  ;;  %v4363_v4 = vand.u32 4294901760, %v4362_v24  ;;  %v16729_v36 = vand.u32 4294901760, %v13780_v29 }
 0x145   : > { %v4381_v10 = vand.u32 4294901760, %v4380_v45  ;;  %v16730_v8 = vand.u32 4294901760, %v13782_v28  ;;  %v11379_v1 = vpack.c.bf16 %v4357_v57, %v4345_v13  ;;  %v16731_v41 = vand.u32 4294901760, %v13824_v7 }
 0x146   : > { %11374 = vmatpush1.bf16.msra.mxu0 %v13775_v52  ;;  %v4984_v52 = vand.u32 4294901760, %v4983_v42  ;;  %v4374_v22 = vsub.f32 %v13780_v29, %v16729_v36  ;;  %v16732_v24 = vand.u32 4294901760, %v13826_v5  ;;  %v11451_v36 = vpack.c.bf16 %v4978_v49, %v4966_v59 }
 0x147   : > { %11446 = vmatpush1.bf16.msra.mxu1 %v13813_v63  ;;  %4252 = vmatprep.subr.mxu0 %v13785_v34  ;;  %v4972_v63 = vand.u32 4294901760, %v4971_v2  ;;  %v4369_v34 = vand.u32 4294901760, %v4368_v37  ;;  %v4386_v40 = vsub.f32 %v13782_v28, %v16730_v8  ;;  %v4995_v51 = vsub.f32 %v13824_v7, %v16731_v41 }
 0x148   : > { %4873 = vmatprep.subr.mxu1 %v13829_v31  ;;  %v5007_v2 = vsub.f32 %v13826_v5, %v16732_v24  ;;  %v4990_v37 = vand.u32 4294901760, %v4989_v47  ;;  %v5002_v45 = vand.u32 4294901760, %v5001_v56  ;;  %v5012_v8 = vand.u32 4294901760, %v13916_v25 }
 0x149   : > { %v11381_v13 = vpack.c.bf16 %v4363_v4, %v4351_v38  ;;  %v11453_v57 = vpack.c.bf16 %v4984_v52, %v4972_v63  ;;  %v11383_v41 = vpack.c.bf16 %v4381_v10, %v4369_v34  ;;  %v4375_v24 = vand.u32 4294901760, %v4374_v22 }
 0x14a   : > { %4254 = vmatpush1.msra.mxu0 %v13834_v55  ;;  %v4387_v55 = vand.u32 4294901760, %v4386_v40  ;;  %v16397_v42 = vand.u32 4294901760, %v13849_v27  ;;  %v5008_v59 = vand.u32 4294901760, %v5007_v2  ;;  %v16733_v47 = vand.u32 4294901760, %v13904_v0 }
 0x14b   : > { %4875 = vmatpush1.msra.mxu1 %v13836_v18  ;;  %11376 = vmatprep.subr.bf16.mxu0 %v11375_v61  ;;  %v4996_v61 = vand.u32 4294901760, %v4995_v51  ;;  %v16396_v49 = vand.u32 4294901760, %v13852_v60  ;;  %v11455_v52 = vpack.c.bf16 %v5002_v45, %v4990_v37  ;;  %v11459_v40 = vpack.c.bf16 %v13685_v20, %v13679_v9  ;;  %v16734_v51 = vld [vmem:[#allocation19_spill] sm:$0xff] }
 0x14c   : > { %11448 = vmatprep.subr.bf16.mxu1 %v11447_v11  ;;  %4311 = vmatmul.mubr.f32.vlgmr.msra.gmra.mrb[6].mxu0 %v16595_v15  ;;  %v4392_v11 = vsub.f32 %v13904_v0, %v16733_v47  ;;  %v4398_v34 = vsub.f32 %v13849_v27, %v16397_v42  ;;  %v11461_v2 = vpack.c.bf16 %v16734_v51, %v13695_v33  ;;  %v252_v42 = vld [vmem:[%s12470_s30 + $0x290] sm:$0xff] }
 0x14d   : > { %11378 = vmatpush1.bf16.msra.mxu0 %v11377_v48  ;;  %4932 = vmatmul.mubr.f32.vlgmr.msra.gmra.mrb[6].mxu1 %v16595_v15  ;;  %v5013_v48 = vsub.f32 %v13916_v25, %v5012_v8  ;;  %v11457_v63 = vpack.c.bf16 %v5008_v59, %v4996_v61  ;;  %v5019_v56 = vsub.f32 %v13852_v60, %v16396_v49 }
 0x14e   : > { %11450 = vmatpush1.bf16.msra.mxu1 %v11449_v12  ;;  %11380 = vmatprep.subr.bf16.mxu0 %v11379_v1  ;;  %v11385_v12 = vpack.c.bf16 %v4387_v55, %v4375_v24  ;;  %v4393_v4 = vand.u32 4294901760, %v4392_v11  ;;  %v4399_v10 = vand.u32 4294901760, %v4398_v34  ;;  %v11387_v55 = vpack.c.bf16 %v13675_v19, %v13673_v35  ;;  %v16741_v34 = vld [vmem:[#allocation8_spill] sm:$0xff] }
 0x14f   : > { %11452 = vmatprep.subr.bf16.mxu1 %v11451_v36  ;;  %4451 = vmatprep.mubr.f32.mxu0 %v16541_v21  ;;  %v5014_v38 = vand.u32 4294901760, %v5013_v48  ;;  %v5020_v22 = vand.u32 4294901760, %v5019_v56  ;;  %v11389_v1 = vpack.c.bf16 %v13691_v53, %v13687_v46  ;;  %v11391_v36 = vpack.c.bf16 %v13712_v6, %v13706_v26  ;;  %v16739_v48 = vld [vmem:[#allocation5_spill] sm:$0xff]  ;;  %v16744_v56 = vld [vmem:[#allocation10_spill] sm:$0xff] }
 0x150   : > { %5072 = vmatprep.mubr.f32.mxu1 %v16541_v21  ;;  %v11463_v37 = vpack.c.bf16 %v13720_v43, %v13716_v23  ;;  %v11465_v24 = vpack.c.bf16 %v13743_v54, %v13741_v62  ;;  %v11395_v61 = vpack.c.bf16 %v13752_v30, %v13746_v14  ;;  %v11467_v47 = vpack.c.bf16 %v13773_v50, %v13761_v58 }
 0x151   : > { %11382 = vmatpush1.bf16.msra.mxu0 %v11381_v13  ;;  %v11393_v13 = vpack.c.bf16 %v13733_v39, %v13731_v16  ;;  %v11397_v11 = vpack.c.bf16 %v13782_v28, %v13780_v29 }
 0x152   : > { %11454 = vmatpush1.bf16.msra.mxu1 %v11453_v57  ;;  %11384 = vmatprep.subr.bf16.mxu0 %v11383_v41 }
 0x153   : > { %11456 = vmatprep.subr.bf16.mxu1 %v11455_v52  ;;  %v11469_v52 = vpack.c.bf16 %v13826_v5, %v13824_v7 }
 0x155   : > { %11386 = vmatpush1.bf16.msra.mxu0 %v11385_v12  ;;  %v16740_v12 = vld [vmem:[#allocation20_spill] sm:$0xff] }
 0x156   : > { %11458 = vmatpush1.bf16.msra.mxu1 %v11457_v63  ;;  %4394 = vmatprep.subr.mxu0 %v4393_v4  ;;  %v16742_v63 = vld [vmem:[#allocation7_spill] sm:$0xff]  ;;  %v16743_v4 = vld [vmem:[#allocation9_spill] sm:$0xff] }
 0x157   : > { %5015 = vmatprep.subr.mxu1 %v5014_v38  ;;  %v16745_v38 = vld [vmem:[#allocation11_spill] sm:$0xff] }
 0x159   : > { %4400 = vmatpush1.msra.mxu0 %v4399_v10  ;;  %v16746_v10 = vld [vmem:[#allocation12_spill] sm:$0xff] }
 0x15a   : > { %5021 = vmatpush1.msra.mxu1 %v5020_v22  ;;  %11388 = vmatprep.subr.bf16.mxu0 %v11387_v55  ;;  %v16747_v22 = vld [vmem:[#allocation13_spill] sm:$0xff]  ;;  %v16748_v55 = vld [vmem:[#allocation15_spill] sm:$0xff] }
 0x15b   : > { %11460 = vmatprep.subr.bf16.mxu1 %v11459_v40  ;;  %4453 = vmatmul.mubr.f32.vlgmr.msra.gmra.mrb[6].mxu0 %v12462_v3  ;;  %v13966_v45 = vpop.f32.mrb[0].mxu0  ;;  %v16749_v40 = vld [vmem:[#allocation14_spill] sm:$0xff] }
 0x15c   : > { %16735 = vst [vmem:[#allocation18_spill] sm:$0xff] %v13966_v45  ;;  %11390 = vmatpush1.bf16.msra.mxu0 %v11389_v1  ;;  %5074 = vmatmul.mubr.f32.vlgmr.msra.gmra.mrb[6].mxu1 %v12462_v3  ;;  %v13971_v57 = vpop.f32.mrb[0].mxu1  ;;  %v13973_v41 = vpop.f32.mrb[1].mxu0  ;;  %v16750_v1 = vand.u32 4294901760, %v13673_v35  ;;  %v16757_v35 = vand.u32 4294901760, %v13695_v33  ;;  %v16763_v33 = vld [vmem:[#allocation6_spill] sm:$0xff] }
 0x15d   : > { %16736 = vst [vmem:[#allocation17_spill] sm:$0xff] %v13971_v57  ;;  %16737 = vst [vmem:[#allocation19_spill] sm:$0xff] %v13973_v41  ;;  %11462 = vmatpush1.bf16.msra.mxu1 %v11461_v2  ;;  %11392 = vmatprep.subr.bf16.mxu0 %v11391_v36  ;;  %v13979_v59 = vpop.f32.mrb[1].mxu1  ;;  %v16751_v2 = vand.u32 4294901760, %v13675_v19  ;;  %v16758_v19 = vand.u32 4294901760, %v16734_v51 }
 0x15e   : > { %16738 = vst [vmem:[#allocation21_spill] sm:$0xff] %v13979_v59  ;;  %11464 = vmatprep.subr.bf16.mxu1 %v11463_v37  ;;  %4551 = vmatprep.mubr.f32.mxu0 %v16541_v21  ;;  %v16752_v37 = vand.u32 4294901760, %v13679_v9  ;;  %v16760_v9 = vand.u32 4294901760, %v13712_v6  ;;  %v16765_v6 = vand.u32 4294901760, %v13733_v39  ;;  %v16770_v39 = vand.u32 4294901760, %v13761_v58  ;;  %v315_v59 = vld [vmem:[%s12470_s30 + $0x488] sm:$0xff] }
 0x15f   : > { %5172 = vmatprep.mubr.f32.mxu1 %v16541_v21  ;;  %v11411_v36 = vpack.c.bf16 %v16751_v2, %v16750_v1  ;;  %v11485_v1 = vpack.c.bf16 %v16758_v19, %v16757_v35  ;;  %v16759_v2 = vand.u32 4294901760, %v13706_v26  ;;  %v16764_v26 = vand.u32 4294901760, %v13731_v16  ;;  %v189_v35 = vld [vmem:[%s12470_s30 + $0x98] sm:$0xff]  ;;  %v378_v41 = vld [vmem:[%s12470_s30 + $0x680] sm:$0x3f] }
 0x160   : > { %11394 = vmatpush1.bf16.msra.mxu0 %v11393_v13  ;;  %v16753_v13 = vand.u32 4294901760, %v13685_v20  ;;  %v221_v16 = vld [vmem:[%s12470_s30 + $0x198] sm:$0xff]  ;;  %v16771_v19 = vand.u32 4294901760, %v13773_v50 }
 0x161   : > { %11466 = vmatpush1.bf16.msra.mxu1 %v11465_v24  ;;  %11396 = vmatprep.subr.bf16.mxu0 %v11395_v61  ;;  %v16754_v61 = vand.u32 4294901760, %v13687_v46  ;;  %v11415_v20 = vpack.c.bf16 %v16760_v9, %v16759_v2  ;;  %v16761_v46 = vand.u32 4294901760, %v13716_v23  ;;  %v11417_v51 = vpack.c.bf16 %v16765_v6, %v16764_v26  ;;  %v218_v2 = vld [vmem:[%s12470_s30 + $0x180] sm:$0xff] }
 0x162   : > { %11468 = vmatprep.subr.bf16.mxu1 %v11467_v47  ;;  %v11483_v24 = vpack.c.bf16 %v16753_v13, %v16752_v37  ;;  %v16755_v47 = vand.u32 4294901760, %v13691_v53  ;;  %v16762_v53 = vand.u32 4294901760, %v13720_v43  ;;  %v187_v13 = vld [vmem:[%s12470_s30 + $0x88] sm:$0xff]  ;;  %v16766_v23 = vand.u32 4294901760, %v13741_v62 }
 0x163   : > { %v16767_v43 = vand.u32 4294901760, %v13743_v54  ;;  %v16772_v62 = vand.u32 4294901760, %v13780_v29  ;;  %v16773_v54 = vand.u32 4294901760, %v13782_v28  ;;  %v5469_v58 = vand.u32 4294901760, %v187_v13 }
 0x164   : > { %11398 = vmatpush1.bf16.msra.mxu0 %v11397_v11  ;;  %v11413_v11 = vpack.c.bf16 %v16755_v47, %v16754_v61  ;;  %v11487_v37 = vpack.c.bf16 %v16762_v53, %v16761_v46  ;;  %v16769_v61 = vand.u32 4294901760, %v13752_v30  ;;  %v186_v30 = vld [vmem:[%s12470_s30 + $0x80] sm:$0xff]  ;;  %v6090_v9 = vand.u32 4294901760, %v189_v35  ;;  %v188_v53 = vld [vmem:[%s12470_s30 + $0x90] sm:$0xff] }
 0x165   : > { %11470 = vmatpush1.bf16.msra.mxu1 %v11469_v52  ;;  %4497 = vmatprep.subr.mxu0 %v13904_v0  ;;  %v16756_v52 = vld [vmem:[#allocation16_spill] sm:$0xff]  ;;  %v16774_v29 = vand.u32 4294901760, %v13824_v7  ;;  %v16775_v28 = vand.u32 4294901760, %v13826_v5  ;;  %v5471_v26 = vand.u32 4294901760, %v186_v30  ;;  %v5475_v6 = vand.u32 4294901760, %v218_v2 }
 0x166   : > { %5118 = vmatprep.subr.mxu1 %v13916_v25  ;;  %v6092_v7 = vand.u32 4294901760, %v188_v53  ;;  %v16777_v25 = vand.u32 4294901760, %v13849_v27 }
 0x167   : > { %v11493_v46 = vpack.c.bf16 %v16775_v28, %v16774_v29  ;;  %v14091_v29 = vsub.f32 %v189_v35, %v6090_v9  ;;  %v14093_v28 = vpack.c.bf16 %v5475_v6, %v5471_v26 }
 0x168   : > { %4500 = vmatpush1.msra.mxu0 %v13849_v27  ;;  %v6100_v27 = vand.u32 4294901760, %v252_v42 }
 0x169   : > { %5121 = vmatpush1.msra.mxu1 %v13852_v60  ;;  %11400 = vmatprep.subr.bf16.mxu0 %v13665_v17 }
 0x16a   : > { %11472 = vmatprep.subr.bf16.mxu1 %v13667_v44  ;;  %4554 = vmatmul.mubr.f32.vlgmr.msra.gmra.mrb[6].mxu0 %v16739_v48  ;;  %v14153_v57 = vsub.f32 %v252_v42, %v6100_v27 }
 0x16b   : > { %11402 = vmatpush1.bf16.msra.mxu0 %v13681_v32  ;;  %5175 = vmatmul.mubr.f32.vlgmr.msra.gmra.mrb[6].mxu1 %v16739_v48 }
 0x16c   : > { %11474 = vmatpush1.bf16.msra.mxu1 %v16740_v12  ;;  %11404 = vmatprep.subr.bf16.mxu0 %v16741_v34 }
 0x16d   : > { %11476 = vmatprep.subr.bf16.mxu1 %v16742_v63  ;;  %4638 = vmatprep.mubr.f32.mxu0 %v16541_v21 }
 0x16e   : > { %5259 = vmatprep.mubr.f32.mxu1 %v16541_v21 }
 0x16f   : > { %11406 = vmatpush1.bf16.msra.mxu0 %v16743_v4 }
 0x170   : > { %11478 = vmatpush1.bf16.msra.mxu1 %v16744_v56  ;;  %11408 = vmatprep.subr.bf16.mxu0 %v16745_v38 }
 0x171   : > { %11480 = vmatprep.subr.bf16.mxu1 %v16746_v10 }
 0x173   : > { %11410 = vmatpush1.bf16.msra.mxu0 %v16747_v22 }
 0x174   : > { %11482 = vmatpush1.bf16.msra.mxu1 %v16748_v55  ;;  %4585 = vmatprep.subr.mxu0 %v16749_v40 }
 0x175   : > { %5206 = vmatprep.subr.mxu1 %v13829_v31 }
 0x177   : > { %4587 = vmatpush1.msra.mxu0 %v16756_v52 }
 0x178   : > { %5208 = vmatpush1.msra.mxu1 %v13836_v18  ;;  %11412 = vmatprep.subr.bf16.mxu0 %v11411_v36  ;;  %v11489_v36 = vpack.c.bf16 %v16767_v43, %v16766_v23  ;;  %v283_v23 = vld [vmem:[%s12470_s30 + $0x388] sm:$0xff]  ;;  %v253_v43 = vld [vmem:[%s12470_s30 + $0x298] sm:$0xff] }
 0x179   : > { %11484 = vmatprep.subr.bf16.mxu1 %v11483_v24  ;;  %4642 = vmatmul.mubr.f32.vlgmr.msra.gmra.mrb[6].mxu0 %v16763_v33  ;;  %v16768_v24 = vand.u32 4294901760, %v13746_v14  ;;  %v11421_v14 = vpack.c.bf16 %v16773_v54, %v16772_v62  ;;  %v6098_v49 = vand.u32 4294901760, %v253_v43 }
 0x17a   : > { %11414 = vmatpush1.bf16.msra.mxu0 %v11413_v11  ;;  %5263 = vmatmul.mubr.f32.vlgmr.msra.gmra.mrb[6].mxu1 %v16763_v33  ;;  %v219_v11 = vld [vmem:[%s12470_s30 + $0x188] sm:$0xff] }
 0x17b   : > { %11486 = vmatpush1.bf16.msra.mxu1 %v11485_v1  ;;  %11416 = vmatprep.subr.bf16.mxu0 %v11415_v20  ;;  %v11419_v47 = vpack.c.bf16 %v16769_v61, %v16768_v24  ;;  %v11491_v1 = vpack.c.bf16 %v16771_v19, %v16770_v39  ;;  %v5473_v50 = vand.u32 4294901760, %v219_v11  ;;  %v6094_v20 = vand.u32 4294901760, %v221_v16  ;;  %v285_v24 = vld [vmem:[%s12470_s30 + $0x398] sm:$0xff]  ;;  %v282_v39 = vld [vmem:[%s12470_s30 + $0x380] sm:$0xff] }
 0x17c   : > { %11488 = vmatprep.subr.bf16.mxu1 %v11487_v37  ;;  %4754 = vmatprep.mubr.f32.mxu0 %v16541_v21  ;;  %v220_v37 = vld [vmem:[%s12470_s30 + $0x190] sm:$0xff]  ;;  %v16776_v19 = vand.u32 4294901760, %v13904_v0 }
 0x17d   : > { %5375 = vmatprep.mubr.f32.mxu1 %v16541_v21  ;;  %v14077_v61 = vpack.c.bf16 %v5473_v50, %v5469_v58  ;;  %v6096_v5 = vand.u32 4294901760, %v220_v37  ;;  %v14087_v62 = vsub.f32 %v219_v11, %v5473_v50  ;;  %v284_v0 = vld [vmem:[%s12470_s30 + $0x390] sm:$0xff]  ;;  %v14107_v50 = vsub.f32 %v188_v53, %v6092_v7  ;;  %v317_v53 = vld [vmem:[%s12470_s30 + $0x498] sm:$0xff] }
 0x17e   : > { %11418 = vmatpush1.bf16.msra.mxu0 %v11417_v51  ;;  %v251_v51 = vld [vmem:[%s12470_s30 + $0x288] sm:$0xff] }
 0x17f   : > { %11490 = vmatpush1.bf16.msra.mxu1 %v11489_v36  ;;  %11420 = vmatprep.subr.bf16.mxu0 %v11419_v47  ;;  %v14079_v36 = vpack.c.bf16 %v6094_v20, %v6090_v9  ;;  %v250_v47 = vld [vmem:[%s12470_s30 + $0x280] sm:$0xff]  ;;  %v5477_v54 = vand.u32 4294901760, %v251_v51  ;;  %v14105_v35 = vpack.c.bf16 %v6096_v5, %v6092_v7  ;;  %v14109_v9 = vsub.f32 %v220_v37, %v6096_v5 }
 0x180   : > { %11492 = vmatprep.subr.bf16.mxu1 %v11491_v1  ;;  %v14085_v1 = vsub.f32 %v187_v13, %v5469_v58  ;;  %v14099_v13 = vsub.f32 %v186_v30, %v5471_v26  ;;  %v5479_v11 = vand.u32 4294901760, %v250_v47  ;;  %v5483_v58 = vand.u32 4294901760, %v282_v39 }
 0x181   : > { %16778 = vst [vmem:[#allocation20_spill] sm:$0xff] %v14105_v35  ;;  %16779 = vst [vmem:[#allocation8_spill] sm:$0xff] %v14109_v9  ;;  %v16780_v30 = vand.u32 4294901760, %v13852_v60  ;;  %v14118_v26 = vsub.f32 %v251_v51, %v5477_v54  ;;  %v5485_v5 = vand.u32 4294901760, %v315_v59 }
 0x182   : > { %11422 = vmatpush1.bf16.msra.mxu0 %v11421_v14  ;;  %v5481_v14 = vand.u32 4294901760, %v283_v23  ;;  %v14134_v7 = vpack.c.bf16 %v5483_v58, %v5479_v11 }
 0x183   : > { %11494 = vmatpush1.bf16.msra.mxu1 %v11493_v46  ;;  %4699 = vmatprep.subr.mxu0 %v16776_v19  ;;  %v6102_v46 = vand.u32 4294901760, %v285_v24  ;;  %v14097_v19 = vsub.f32 %v221_v16, %v6094_v20  ;;  %v347_v16 = vld [vmem:[%s12470_s30 + $0x588] sm:$0xff]  ;;  %v16795_v48 = vand.u32 4294901760, %v14118_v26 }
 0x184   : > { %5320 = vmatprep.subr.mxu1 %v5012_v8  ;;  %v14103_v8 = vsub.f32 %v218_v2, %v5475_v6  ;;  %v14116_v20 = vpack.c.bf16 %v5481_v14, %v5477_v54  ;;  %v6104_v2 = vand.u32 4294901760, %v284_v0  ;;  %v349_v6 = vld [vmem:[%s12470_s30 + $0x598] sm:$0xff]  ;;  %v14124_v37 = vsub.f32 %v283_v23, %v5481_v14  ;;  %16783 = vst [vmem:[#allocation10_spill] sm:$0xff] %v14134_v7  ;;  %v314_v54 = vld [vmem:[%s12470_s30 + $0x480] sm:$0xff]  ;;  %v14139_v23 = vld [vmem:[%s12470_s30 + $0x490] sm:$0xff] }
 0x185   : > { %v14126_v60 = vpack.c.bf16 %v6102_v46, %v6098_v49  ;;  %v14132_v51 = vsub.f32 %v285_v24, %v6102_v46  ;;  %v6110_v14 = vand.u32 4294901760, %v349_v6  ;;  %v348_v24 = vld [vmem:[%s12470_s30 + $0x590] sm:$0xff]  ;;  %v379_v46 = vld [vmem:[%s12470_s30 + $0x688] sm:$0x3f] }
 0x186   : > { %4703 = vmatpush1.msra.mxu0 %v16777_v25  ;;  %16781 = vst [vmem:[#allocation7_spill] sm:$0xff] %v14116_v20  ;;  %v346_v25 = vld [vmem:[%s12470_s30 + $0x580] sm:$0xff]  ;;  %v6112_v42 = vand.u32 4294901760, %v348_v24 }
 0x187   : > { %5324 = vmatpush1.msra.mxu1 %v16780_v30  ;;  %11424 = vmatprep.subr.bf16.mxu0 %v13665_v17  ;;  %16782 = vst [vmem:[#allocation9_spill] sm:$0xff] %v14126_v60  ;;  %v14128_v17 = vsub.f32 %v253_v43, %v6098_v49  ;;  %v14143_v49 = vsub.f32 %v250_v47, %v5479_v11  ;;  %v6106_v43 = vand.u32 4294901760, %v317_v53  ;;  %v5487_v47 = vand.u32 4294901760, %v314_v54 }
 0x188   : > { %11496 = vmatprep.subr.bf16.mxu1 %v13667_v44  ;;  %4756 = vmatmul.mubr.f32.vlgmr.msra.gmra.mrb[6].mxu0 %v12462_v3  ;;  %v5489_v44 = vand.u32 4294901760, %v347_v16  ;;  %v14151_v30 = vpack.c.bf16 %v6104_v2, %v6100_v27  ;;  %v6108_v11 = vand.u32 4294901760, %v14139_v23  ;;  %v14185_v45 = vsub.f32 %v349_v6, %v6110_v14 }
 0x189   : > { %11426 = vmatpush1.bf16.msra.mxu0 %v13681_v32  ;;  %5377 = vmatmul.mubr.f32.vlgmr.msra.gmra.mrb[6].mxu1 %v12462_v3  ;;  %v14145_v32 = vsub.f32 %v282_v39, %v5483_v58  ;;  %v5491_v39 = vand.u32 4294901760, %v346_v25  ;;  %v14173_v27 = vsub.f32 %v317_v53, %v6106_v43  ;;  %v454_v6 = vsel %vm404_vm1, %v378_v41, 0 }
 0x18a   : > { %11498 = vmatpush1.bf16.msra.mxu1 %v16740_v12  ;;  %11428 = vmatprep.subr.bf16.mxu0 %v16741_v34  ;;  %16784 = vst [vmem:[#allocation11_spill] sm:$0xff] %v14151_v30  ;;  %v14155_v12 = vsub.f32 %v284_v0, %v6104_v2  ;;  %v14158_v34 = vsub.f32 %v315_v59, %v5485_v5  ;;  %v14167_v0 = vsel %vm404_vm1, %v379_v46, 0  ;;  %v381_v2 = vld [vmem:[%s12470_s30 + $0x698] sm:$0x3f] }
 0x18b   : > { %11500 = vmatprep.subr.bf16.mxu1 %v16742_v63  ;;  %4840 = vmatprep.mubr.f32.mxu0 %v16541_v21  ;;  %v14162_v63 = vpack.c.bf16 %v5489_v44, %v5485_v5  ;;  %v14164_v58 = vsub.f32 %v347_v16, %v5489_v44  ;;  %v14171_v59 = vpack.c.bf16 %v6110_v14, %v6106_v43  ;;  %v380_v16 = vld [vmem:[%s12470_s30 + $0x690] sm:$0x3f]  ;;  %v16398_v44 = vand.u32 4294901760, %v14091_v29 }
 0x18c   : > { %5461 = vmatprep.mubr.f32.mxu1 %v16541_v21  ;;  %v14187_v53 = vpack.c.bf16 %v5491_v39, %v5487_v47  ;;  %v16401_v43 = vand.u32 4294901760, %v14107_v50  ;;  %v14194_v5 = vsub.f32 %v346_v25, %v5491_v39  ;;  %v14197_v46 = vand.u32 4294901760, %v14167_v0 }
 0x18d   : > { %11430 = vmatpush1.bf16.msra.mxu0 %v16743_v4  ;;  %16785 = vst [vmem:[#allocation12_spill] sm:$0xff] %v14162_v63  ;;  %16786 = vst [vmem:[#allocation13_spill] sm:$0xff] %v14171_v59  ;;  %v16402_v4 = vand.u32 4294901760, %v14109_v9  ;;  %v460_v14 = vsel %vm404_vm1, %v380_v16, 0  ;;  %v16790_v25 = vand.u32 4294901760, %v14087_v62  ;;  %v16792_v39 = vand.u32 4294901760, %v14099_v13 }
 0x18e   : > { %11502 = vmatpush1.bf16.msra.mxu1 %v16744_v56  ;;  %11432 = vmatprep.subr.bf16.mxu0 %v16745_v38  ;;  %v16399_v38 = vand.u32 4294901760, %v14103_v8  ;;  %16787 = vst [vmem:[#allocation15_spill] sm:$0xff] %v14187_v53  ;;  %16788 = vst [vmem:[#allocation14_spill] sm:$0xff] %v14197_v46  ;;  %v14200_v56 = vsel %vm404_vm1, %v381_v2, 0 }
 0x18f   : > { %11504 = vmatprep.subr.bf16.mxu1 %v16746_v10  ;;  %v14192_v10 = vsub.f32 %v314_v54, %v5487_v47  ;;  %v5574_v47 = vsub.f32 %v14087_v62, %v16790_v25  ;;  %v5568_v2 = vsub.f32 %v14099_v13, %v16792_v39  ;;  %v6201_v25 = vsub.f32 %v14109_v9, %v16402_v4 }
 0x190   : > { %v5580_v16 = vsub.f32 %v14103_v8, %v16399_v38  ;;  %v14236_v39 = vsub.f32 %v14139_v23, %v6108_v11  ;;  %v14241_v38 = vand.u32 4294901760, %v14200_v56  ;;  %v14248_v4 = vand.u32 4294901760, %v460_v14 }
 0x191   : > { %11434 = vmatpush1.bf16.msra.mxu0 %v16747_v22  ;;  %v16789_v22 = vand.u32 4294901760, %v14085_v1  ;;  %v6202_v33 = vand.u32 4294901760, %v6201_v25  ;;  %v5586_v9 = vsub.f32 %v14118_v26, %v16795_v48  ;;  %v16415_v25 = vand.u32 4294901760, %v14155_v12 }
 0x192   : > { %11506 = vmatpush1.bf16.msra.mxu1 %v16748_v55  ;;  %4787 = vmatprep.subr.mxu0 %v16749_v40  ;;  %v6183_v55 = vsub.f32 %v14091_v29, %v16398_v44  ;;  %v16791_v40 = vand.u32 4294901760, %v14097_v19  ;;  %v14238_v44 = vsub.f32 %v348_v24, %v6112_v42  ;;  %v16797_v48 = vand.u32 4294901760, %v14128_v17 }
 0x193   : > { %v5562_v54 = vsub.f32 %v14085_v1, %v16789_v22  ;;  %5408 = vmatprep.subr.mxu1 %v13829_v31  ;;  %v14225_v22 = vpack.c.bf16 %v6112_v42, %v6108_v11  ;;  %v6189_v31 = vsub.f32 %v14107_v50, %v16401_v43  ;;  %v14246_v43 = vand.u32 4294901760, %v454_v6 }
 0x194   : > { %v6195_v41 = vsub.f32 %v14097_v19, %v16791_v40  ;;  %v6184_v23 = vand.u32 4294901760, %v6183_v55  ;;  %v5569_v11 = vand.u32 4294901760, %v5568_v2  ;;  %v5581_v42 = vand.u32 4294901760, %v5580_v16 }
 0x195   : > { %16793 = vst [vmem:[#allocation16_spill] sm:$0xff] %v14225_v22  ;;  %4789 = vmatpush1.msra.mxu0 %v16756_v52  ;;  %16794 = vst [vmem:[#allocation22_spill] sm:$0xff] %v14246_v43  ;;  %v5563_v40 = vand.u32 4294901760, %v5562_v54  ;;  %v5575_v52 = vand.u32 4294901760, %v5574_v47  ;;  %v14261_v47 = vsub.f32 %v454_v6, %v14246_v43  ;;  %v14264_v55 = vsub.f32 %v460_v14, %v14248_v4 }
 0x196   : > { %5410 = vmatpush1.msra.mxu1 %v13836_v18  ;;  %4842 = vmatmul.mubr.f32.vlgmr.msra.gmra.mrb[6].mxu0 %v12462_v3  ;;  %v6196_v24 = vand.u32 4294901760, %v6195_v41  ;;  %v6190_v18 = vand.u32 4294901760, %v6189_v31  ;;  %v16796_v41 = vand.u32 4294901760, %v14124_v37  ;;  %v16412_v6 = vand.u32 4294901760, %v14153_v57 }
 0x197   : > { %5463 = vmatmul.mubr.f32.vlgmr.msra.gmra.mrb[6].mxu1 %v12462_v3  ;;  %11508 = vmatprep.subr.bf16.mxu0 %v14077_v61  ;;  %v11519_v14 = vpack.c.bf16 %v5575_v52, %v5563_v40  ;;  %v6207_v31 = vsub.f32 %v14128_v17, %v16797_v48  ;;  %v16798_v52 = vand.u32 4294901760, %v14132_v51  ;;  %v16803_v16 = vand.u32 4294901760, %v14185_v45 }
 0x198   : > { %11580 = vmatprep.subr.bf16.mxu1 %v14079_v36  ;;  %11510 = vmatpush1.bf16.msra.mxu0 %v14093_v28  ;;  %v5598_v2 = vsub.f32 %v14124_v37, %v16796_v41  ;;  %v11591_v54 = vpack.c.bf16 %v6196_v24, %v6184_v23  ;;  %v16416_v41 = vand.u32 4294901760, %v14158_v34 }
 0x199   : > { %11582 = vmatpush1.bf16.msra.mxu1 %v14105_v35  ;;  %11512 = vmatprep.subr.bf16.mxu0 %v14116_v20  ;;  %v11593_v20 = vpack.c.bf16 %v6202_v33, %v6190_v18  ;;  %v5587_v35 = vand.u32 4294901760, %v5586_v9  ;;  %v6219_v23 = vsub.f32 %v14132_v51, %v16798_v52  ;;  %v16799_v33 = vand.u32 4294901760, %v14143_v49 }
 0x19a   : > { %11584 = vmatprep.subr.bf16.mxu1 %v14126_v60  ;;  %5547 = vmatprep.mubr.f32.mxu0 %v16541_v21  ;;  %v11521_v60 = vpack.c.bf16 %v5581_v42, %v5569_v11  ;;  %v5599_v40 = vand.u32 4294901760, %v5598_v2  ;;  %v16800_v11 = vand.u32 4294901760, %v14145_v32  ;;  %v6213_v18 = vsub.f32 %v14153_v57, %v16412_v6 }
 0x19b   : > { %6168 = vmatprep.mubr.f32.mxu1 %v16541_v21  ;;  %v5592_v9 = vsub.f32 %v14143_v49, %v16799_v33  ;;  %v6225_v2 = vsub.f32 %v14155_v12, %v16415_v25  ;;  %v5610_v48 = vsub.f32 %v14158_v34, %v16416_v41  ;;  %v16801_v52 = vand.u32 4294901760, %v14164_v58 }
 0x19c   : > { %11514 = vmatpush1.bf16.msra.mxu0 %v14134_v7  ;;  %v5604_v42 = vsub.f32 %v14145_v32, %v16800_v11  ;;  %v6208_v24 = vand.u32 4294901760, %v6207_v31  ;;  %v14316_v25 = vsub.f32 %v14167_v0, %v14197_v46  ;;  %v16802_v41 = vand.u32 4294901760, %v14173_v27 }
 0x19d   : > { %11586 = vmatpush1.bf16.msra.mxu1 %v14151_v30  ;;  %11516 = vmatprep.subr.bf16.mxu0 %v14162_v63  ;;  %v5622_v33 = vsub.f32 %v14164_v58, %v16801_v52  ;;  %v6220_v52 = vand.u32 4294901760, %v6219_v23  ;;  %v6243_v31 = vsub.f32 %v14185_v45, %v16803_v16  ;;  %v5593_v0 = vand.u32 4294901760, %v5592_v9 }
 0x19e   : > { %11588 = vmatprep.subr.bf16.mxu1 %v14171_v59  ;;  %v6231_v11 = vsub.f32 %v14173_v27, %v16802_v41  ;;  %v14328_v59 = vsub.f32 %v14200_v56, %v14241_v38  ;;  %v5605_v6 = vand.u32 4294901760, %v5604_v42  ;;  %v16804_v63 = vand.u32 4294901760, %v14192_v10 }
 0x19f   : > { %v5623_v23 = vand.u32 4294901760, %v5622_v33  ;;  %v16805_v30 = vand.u32 4294901760, %v14194_v5  ;;  %v11523_v56 = vpack.c.bf16 %v5599_v40, %v5587_v35  ;;  %v16806_v7 = vand.u32 4294901760, %v14236_v39 }
 0x1a0   : > { %11518 = vmatpush1.bf16.msra.mxu0 %v14187_v53  ;;  %v6226_v53 = vand.u32 4294901760, %v6225_v2  ;;  %v5616_v41 = vsub.f32 %v14192_v10, %v16804_v63  ;;  %v16807_v42 = vand.u32 4294901760, %v14238_v44  ;;  %v11595_v63 = vpack.c.bf16 %v6220_v52, %v6208_v24 }
 0x1a1   : > { %11590 = vmatpush1.bf16.msra.mxu1 %v14225_v22  ;;  %5494 = vmatprep.subr.mxu0 %v14197_v46  ;;  %v6214_v22 = vand.u32 4294901760, %v6213_v18  ;;  %v5611_v46 = vand.u32 4294901760, %v5610_v48  ;;  %v5628_v16 = vsub.f32 %v14194_v5, %v16805_v30  ;;  %v6237_v9 = vsub.f32 %v14236_v39, %v16806_v7 }
 0x1a2   : > { %6115 = vmatprep.subr.mxu1 %v14241_v38  ;;  %v6249_v18 = vsub.f32 %v14238_v44, %v16807_v42  ;;  %v6232_v48 = vand.u32 4294901760, %v6231_v11  ;;  %v6244_v33 = vand.u32 4294901760, %v6243_v31  ;;  %v6254_v30 = vand.u32 4294901760, %v14328_v59 }
 0x1a3   : > { %v11525_v35 = vpack.c.bf16 %v5605_v6, %v5593_v0  ;;  %v11597_v40 = vpack.c.bf16 %v6226_v53, %v6214_v22  ;;  %v11527_v7 = vpack.c.bf16 %v5623_v23, %v5611_v46  ;;  %v5617_v42 = vand.u32 4294901760, %v5616_v41 }
 0x1a4   : > { %5496 = vmatpush1.msra.mxu0 %v14246_v43  ;;  %v5629_v43 = vand.u32 4294901760, %v5628_v16  ;;  %v16432_v2 = vand.u32 4294901760, %v14261_v47  ;;  %v6250_v24 = vand.u32 4294901760, %v6249_v18  ;;  %v16808_v11 = vand.u32 4294901760, %v14316_v25 }
 0x1a5   : > { %6117 = vmatpush1.msra.mxu1 %v14248_v4  ;;  %11520 = vmatprep.subr.bf16.mxu0 %v11519_v14  ;;  %v6238_v14 = vand.u32 4294901760, %v6237_v9  ;;  %v16431_v52 = vand.u32 4294901760, %v14264_v55  ;;  %v11599_v53 = vpack.c.bf16 %v6244_v33, %v6232_v48  ;;  %v11603_v16 = vpack.c.bf16 %v14097_v19, %v14091_v29  ;;  %v16809_v9 = vld [vmem:[#allocation8_spill] sm:$0xff] }
 0x1a6   : > { %11592 = vmatprep.subr.bf16.mxu1 %v11591_v54  ;;  %5553 = vmatmul.mubr.f32.vlgmr.msra.gmra.mrb[8].mxu0 %v16595_v15  ;;  %v5634_v54 = vsub.f32 %v14316_v25, %v16808_v11  ;;  %v5640_v46 = vsub.f32 %v14261_v47, %v16432_v2  ;;  %v11605_v18 = vpack.c.bf16 %v16809_v9, %v14107_v50  ;;  %v256_v2 = vld [vmem:[%s12470_s30 + $0x2b0] sm:$0xff] }
 0x1a7   : > { %11522 = vmatpush1.bf16.msra.mxu0 %v11521_v60  ;;  %6174 = vmatmul.mubr.f32.vlgmr.msra.gmra.mrb[8].mxu1 %v16595_v15  ;;  %v6255_v60 = vsub.f32 %v14328_v59, %v6254_v30  ;;  %v11601_v22 = vpack.c.bf16 %v6250_v24, %v6238_v14  ;;  %v6261_v31 = vsub.f32 %v14264_v55, %v16431_v52 }
 0x1a8   : > { %11594 = vmatpush1.bf16.msra.mxu1 %v11593_v20  ;;  %11524 = vmatprep.subr.bf16.mxu0 %v11523_v56  ;;  %v11529_v20 = vpack.c.bf16 %v5629_v43, %v5617_v42  ;;  %v5635_v6 = vand.u32 4294901760, %v5634_v54  ;;  %v5641_v23 = vand.u32 4294901760, %v5640_v46  ;;  %v11531_v43 = vpack.c.bf16 %v14087_v62, %v14085_v1  ;;  %v16816_v46 = vld [vmem:[#allocation7_spill] sm:$0xff] }
 0x1a9   : > { %11596 = vmatprep.subr.bf16.mxu1 %v11595_v63  ;;  %5693 = vmatprep.mubr.f32.mxu0 %v16541_v21  ;;  %v6256_v0 = vand.u32 4294901760, %v6255_v60  ;;  %v6262_v41 = vand.u32 4294901760, %v6261_v31  ;;  %v11533_v56 = vpack.c.bf16 %v14103_v8, %v14099_v13  ;;  %v11535_v63 = vpack.c.bf16 %v14124_v37, %v14118_v26  ;;  %v16814_v60 = vld [vmem:[#allocation5_spill] sm:$0xff]  ;;  %v16819_v31 = vld [vmem:[#allocation11_spill] sm:$0xff] }
 0x1aa   : > { %6314 = vmatprep.mubr.f32.mxu1 %v16541_v21  ;;  %v11607_v48 = vpack.c.bf16 %v14132_v51, %v14128_v17  ;;  %v11609_v42 = vpack.c.bf16 %v14155_v12, %v14153_v57  ;;  %v11539_v14 = vpack.c.bf16 %v14164_v58, %v14158_v34  ;;  %v11611_v11 = vpack.c.bf16 %v14185_v45, %v14173_v27 }
 0x1ab   : > { %11526 = vmatpush1.bf16.msra.mxu0 %v11525_v35  ;;  %v11537_v35 = vpack.c.bf16 %v14145_v32, %v14143_v49  ;;  %v11541_v54 = vpack.c.bf16 %v14194_v5, %v14192_v10 }
 0x1ac   : > { %11598 = vmatpush1.bf16.msra.mxu1 %v11597_v40  ;;  %11528 = vmatprep.subr.bf16.mxu0 %v11527_v7 }
 0x1ad   : > { %11600 = vmatprep.subr.bf16.mxu1 %v11599_v53  ;;  %v11613_v53 = vpack.c.bf16 %v14238_v44, %v14236_v39 }
 0x1af   : > { %11530 = vmatpush1.bf16.msra.mxu0 %v11529_v20  ;;  %v16815_v20 = vld [vmem:[#allocation20_spill] sm:$0xff] }
 0x1b0   : > { %11602 = vmatpush1.bf16.msra.mxu1 %v11601_v22  ;;  %5636 = vmatprep.subr.mxu0 %v5635_v6  ;;  %v16817_v22 = vld [vmem:[#allocation9_spill] sm:$0xff]  ;;  %v16818_v6 = vld [vmem:[#allocation10_spill] sm:$0xff] }
 0x1b1   : > { %6257 = vmatprep.subr.mxu1 %v6256_v0  ;;  %v16820_v0 = vld [vmem:[#allocation12_spill] sm:$0xff] }
 0x1b3   : > { %5642 = vmatpush1.msra.mxu0 %v5641_v23  ;;  %v16821_v23 = vld [vmem:[#allocation13_spill] sm:$0xff] }
 0x1b4   : > { %6263 = vmatpush1.msra.mxu1 %v6262_v41  ;;  %11532 = vmatprep.subr.bf16.mxu0 %v11531_v43  ;;  %v16822_v41 = vld [vmem:[#allocation15_spill] sm:$0xff]  ;;  %v16823_v43 = vld [vmem:[#allocation16_spill] sm:$0xff] }
 0x1b5   : > { %11604 = vmatprep.subr.bf16.mxu1 %v11603_v16  ;;  %5695 = vmatmul.mubr.f32.vlgmr.msra.gmra.mrb[8].mxu0 %v12462_v3  ;;  %v14378_v33 = vpop.f32.mrb[2].mxu0  ;;  %v16824_v16 = vld [vmem:[#allocation14_spill] sm:$0xff] }
 0x1b6   : > { %16810 = vst [vmem:[#allocation8_spill] sm:$0xff] %v14378_v33  ;;  %11534 = vmatpush1.bf16.msra.mxu0 %v11533_v56  ;;  %6316 = vmatmul.mubr.f32.vlgmr.msra.gmra.mrb[8].mxu1 %v12462_v3  ;;  %v14383_v40 = vpop.f32.mrb[2].mxu1  ;;  %v14385_v7 = vpop.f32.mrb[3].mxu0  ;;  %v16825_v56 = vand.u32 4294901760, %v14085_v1  ;;  %v16832_v1 = vand.u32 4294901760, %v14107_v50  ;;  %v16838_v50 = vld [vmem:[#allocation6_spill] sm:$0xff] }
 0x1b7   : > { %16811 = vst [vmem:[#allocation23_spill] sm:$0xff] %v14383_v40  ;;  %16812 = vst [vmem:[#allocation24_spill] sm:$0xff] %v14385_v7  ;;  %11606 = vmatpush1.bf16.msra.mxu1 %v11605_v18  ;;  %11536 = vmatprep.subr.bf16.mxu0 %v11535_v63  ;;  %v14391_v24 = vpop.f32.mrb[3].mxu1  ;;  %v16826_v18 = vand.u32 4294901760, %v14087_v62  ;;  %v16833_v62 = vand.u32 4294901760, %v16809_v9 }
 0x1b8   : > { %16813 = vst [vmem:[#allocation25_spill] sm:$0xff] %v14391_v24  ;;  %11608 = vmatprep.subr.bf16.mxu1 %v11607_v48  ;;  %5793 = vmatprep.mubr.f32.mxu0 %v16541_v21  ;;  %v16827_v48 = vand.u32 4294901760, %v14091_v29  ;;  %v16835_v29 = vand.u32 4294901760, %v14124_v37  ;;  %v16840_v37 = vand.u32 4294901760, %v14145_v32  ;;  %v16845_v32 = vand.u32 4294901760, %v14173_v27  ;;  %v319_v24 = vld [vmem:[%s12470_s30 + $0x4a8] sm:$0xff] }
 0x1b9   : > { %6414 = vmatprep.mubr.f32.mxu1 %v16541_v21  ;;  %v11555_v63 = vpack.c.bf16 %v16826_v18, %v16825_v56  ;;  %v11629_v56 = vpack.c.bf16 %v16833_v62, %v16832_v1  ;;  %v16834_v18 = vand.u32 4294901760, %v14118_v26  ;;  %v16839_v26 = vand.u32 4294901760, %v14143_v49  ;;  %v193_v1 = vld [vmem:[%s12470_s30 + $0xb8] sm:$0xff]  ;;  %v382_v7 = vld [vmem:[%s12470_s30 + $0x6a0] sm:$0x3f] }
 0x1ba   : > { %11538 = vmatpush1.bf16.msra.mxu0 %v11537_v35  ;;  %v16828_v35 = vand.u32 4294901760, %v14097_v19  ;;  %v225_v49 = vld [vmem:[%s12470_s30 + $0x1b8] sm:$0xff]  ;;  %v16846_v62 = vand.u32 4294901760, %v14185_v45 }
 0x1bb   : > { %11610 = vmatpush1.bf16.msra.mxu1 %v11609_v42  ;;  %11540 = vmatprep.subr.bf16.mxu0 %v11539_v14  ;;  %v16829_v14 = vand.u32 4294901760, %v14099_v13  ;;  %v11559_v19 = vpack.c.bf16 %v16835_v29, %v16834_v18  ;;  %v16836_v13 = vand.u32 4294901760, %v14128_v17  ;;  %v11561_v9 = vpack.c.bf16 %v16840_v37, %v16839_v26  ;;  %v222_v18 = vld [vmem:[%s12470_s30 + $0x1a0] sm:$0xff] }
 0x1bc   : > { %11612 = vmatprep.subr.bf16.mxu1 %v11611_v11  ;;  %v11627_v42 = vpack.c.bf16 %v16828_v35, %v16827_v48  ;;  %v16830_v11 = vand.u32 4294901760, %v14103_v8  ;;  %v16837_v8 = vand.u32 4294901760, %v14132_v51  ;;  %v191_v35 = vld [vmem:[%s12470_s30 + $0xa8] sm:$0xff]  ;;  %v16841_v17 = vand.u32 4294901760, %v14153_v57 }
 0x1bd   : > { %v16842_v51 = vand.u32 4294901760, %v14155_v12  ;;  %v16847_v57 = vand.u32 4294901760, %v14192_v10  ;;  %v16848_v12 = vand.u32 4294901760, %v14194_v5  ;;  %v6711_v27 = vand.u32 4294901760, %v191_v35 }
 0x1be   : > { %11542 = vmatpush1.bf16.msra.mxu0 %v11541_v54  ;;  %v11557_v54 = vpack.c.bf16 %v16830_v11, %v16829_v14  ;;  %v11631_v48 = vpack.c.bf16 %v16837_v8, %v16836_v13  ;;  %v16844_v14 = vand.u32 4294901760, %v14164_v58  ;;  %v190_v58 = vld [vmem:[%s12470_s30 + $0xa0] sm:$0xff]  ;;  %v7332_v29 = vand.u32 4294901760, %v193_v1  ;;  %v192_v8 = vld [vmem:[%s12470_s30 + $0xb0] sm:$0xff] }
 0x1bf   : > { %11614 = vmatpush1.bf16.msra.mxu1 %v11613_v53  ;;  %5739 = vmatprep.subr.mxu0 %v14316_v25  ;;  %v16831_v53 = vld [vmem:[#allocation22_spill] sm:$0xff]  ;;  %v16849_v10 = vand.u32 4294901760, %v14236_v39  ;;  %v16850_v5 = vand.u32 4294901760, %v14238_v44  ;;  %v6713_v26 = vand.u32 4294901760, %v190_v58  ;;  %v6717_v37 = vand.u32 4294901760, %v222_v18 }
 0x1c0   : > { %6360 = vmatprep.subr.mxu1 %v14328_v59  ;;  %v7334_v39 = vand.u32 4294901760, %v192_v8  ;;  %v16852_v59 = vand.u32 4294901760, %v14261_v47 }
 0x1c1   : > { %v11637_v13 = vpack.c.bf16 %v16850_v5, %v16849_v10  ;;  %v14503_v10 = vsub.f32 %v193_v1, %v7332_v29  ;;  %v14505_v5 = vpack.c.bf16 %v6717_v37, %v6713_v26 }
 0x1c2   : > { %5742 = vmatpush1.msra.mxu0 %v14261_v47  ;;  %v7342_v47 = vand.u32 4294901760, %v256_v2 }
 0x1c3   : > { %6363 = vmatpush1.msra.mxu1 %v14264_v55  ;;  %11544 = vmatprep.subr.bf16.mxu0 %v14077_v61 }
 0x1c4   : > { %11616 = vmatprep.subr.bf16.mxu1 %v14079_v36  ;;  %5796 = vmatmul.mubr.f32.vlgmr.msra.gmra.mrb[8].mxu0 %v16814_v60  ;;  %v14565_v40 = vsub.f32 %v256_v2, %v7342_v47 }
 0x1c5   : > { %11546 = vmatpush1.bf16.msra.mxu0 %v14093_v28  ;;  %6417 = vmatmul.mubr.f32.vlgmr.msra.gmra.mrb[8].mxu1 %v16814_v60 }
 0x1c6   : > { %11618 = vmatpush1.bf16.msra.mxu1 %v16815_v20  ;;  %11548 = vmatprep.subr.bf16.mxu0 %v16816_v46 }
 0x1c7   : > { %11620 = vmatprep.subr.bf16.mxu1 %v16817_v22  ;;  %5880 = vmatprep.mubr.f32.mxu0 %v16541_v21 }
 0x1c8   : > { %6501 = vmatprep.mubr.f32.mxu1 %v16541_v21 }
 0x1c9   : > { %11550 = vmatpush1.bf16.msra.mxu0 %v16818_v6 }
 0x1ca   : > { %11622 = vmatpush1.bf16.msra.mxu1 %v16819_v31  ;;  %11552 = vmatprep.subr.bf16.mxu0 %v16820_v0 }
 0x1cb   : > { %11624 = vmatprep.subr.bf16.mxu1 %v16821_v23 }
 0x1cd   : > { %11554 = vmatpush1.bf16.msra.mxu0 %v16822_v41 }
 0x1ce   : > { %11626 = vmatpush1.bf16.msra.mxu1 %v16823_v43  ;;  %5827 = vmatprep.subr.mxu0 %v16824_v16 }
 0x1cf   : > { %6448 = vmatprep.subr.mxu1 %v14241_v38 }
 0x1d1   : > { %5829 = vmatpush1.msra.mxu0 %v16831_v53 }
 0x1d2   : > { %6450 = vmatpush1.msra.mxu1 %v14248_v4  ;;  %11556 = vmatprep.subr.bf16.mxu0 %v11555_v63  ;;  %v11633_v63 = vpack.c.bf16 %v16842_v51, %v16841_v17  ;;  %v287_v17 = vld [vmem:[%s12470_s30 + $0x3a8] sm:$0xff]  ;;  %v257_v51 = vld [vmem:[%s12470_s30 + $0x2b8] sm:$0xff] }
 0x1d3   : > { %11628 = vmatprep.subr.bf16.mxu1 %v11627_v42  ;;  %5884 = vmatmul.mubr.f32.vlgmr.msra.gmra.mrb[8].mxu0 %v16838_v50  ;;  %v16843_v42 = vand.u32 4294901760, %v14158_v34  ;;  %v11565_v34 = vpack.c.bf16 %v16848_v12, %v16847_v57  ;;  %v7340_v52 = vand.u32 4294901760, %v257_v51 }
 0x1d4   : > { %11558 = vmatpush1.bf16.msra.mxu0 %v11557_v54  ;;  %6505 = vmatmul.mubr.f32.vlgmr.msra.gmra.mrb[8].mxu1 %v16838_v50  ;;  %v223_v54 = vld [vmem:[%s12470_s30 + $0x1a8] sm:$0xff] }
 0x1d5   : > { %11630 = vmatpush1.bf16.msra.mxu1 %v11629_v56  ;;  %11560 = vmatprep.subr.bf16.mxu0 %v11559_v19  ;;  %v11563_v11 = vpack.c.bf16 %v16844_v14, %v16843_v42  ;;  %v11635_v56 = vpack.c.bf16 %v16846_v62, %v16845_v32  ;;  %v6715_v45 = vand.u32 4294901760, %v223_v54  ;;  %v7336_v19 = vand.u32 4294901760, %v225_v49  ;;  %v289_v42 = vld [vmem:[%s12470_s30 + $0x3b8] sm:$0xff]  ;;  %v286_v32 = vld [vmem:[%s12470_s30 + $0x3a0] sm:$0xff] }
 0x1d6   : > { %11632 = vmatprep.subr.bf16.mxu1 %v11631_v48  ;;  %5996 = vmatprep.mubr.f32.mxu0 %v16541_v21  ;;  %v224_v48 = vld [vmem:[%s12470_s30 + $0x1b0] sm:$0xff]  ;;  %v16851_v62 = vand.u32 4294901760, %v14316_v25 }
 0x1d7   : > { %6617 = vmatprep.mubr.f32.mxu1 %v16541_v21  ;;  %v14489_v14 = vpack.c.bf16 %v6715_v45, %v6711_v27  ;;  %v7338_v44 = vand.u32 4294901760, %v224_v48  ;;  %v14499_v57 = vsub.f32 %v223_v54, %v6715_v45  ;;  %v288_v25 = vld [vmem:[%s12470_s30 + $0x3b0] sm:$0xff]  ;;  %v14519_v45 = vsub.f32 %v192_v8, %v7334_v39  ;;  %v321_v8 = vld [vmem:[%s12470_s30 + $0x4b8] sm:$0xff] }
 0x1d8   : > { %11562 = vmatpush1.bf16.msra.mxu0 %v11561_v9  ;;  %v255_v9 = vld [vmem:[%s12470_s30 + $0x2a8] sm:$0xff] }
 0x1d9   : > { %11634 = vmatpush1.bf16.msra.mxu1 %v11633_v63  ;;  %11564 = vmatprep.subr.bf16.mxu0 %v11563_v11  ;;  %v14491_v63 = vpack.c.bf16 %v7336_v19, %v7332_v29  ;;  %v254_v11 = vld [vmem:[%s12470_s30 + $0x2a0] sm:$0xff]  ;;  %v6719_v12 = vand.u32 4294901760, %v255_v9  ;;  %v14517_v1 = vpack.c.bf16 %v7338_v44, %v7334_v39  ;;  %v14521_v29 = vsub.f32 %v224_v48, %v7338_v44 }
 0x1da   : > { %11636 = vmatprep.subr.bf16.mxu1 %v11635_v56  ;;  %v14497_v56 = vsub.f32 %v191_v35, %v6711_v27  ;;  %v14511_v35 = vsub.f32 %v190_v58, %v6713_v26  ;;  %v6721_v54 = vand.u32 4294901760, %v254_v11  ;;  %v6725_v27 = vand.u32 4294901760, %v286_v32 }
 0x1db   : > { %16853 = vst [vmem:[#allocation20_spill] sm:$0xff] %v14517_v1  ;;  %16854 = vst [vmem:[#allocation7_spill] sm:$0xff] %v14521_v29  ;;  %v16855_v58 = vand.u32 4294901760, %v14264_v55  ;;  %v14530_v26 = vsub.f32 %v255_v9, %v6719_v12  ;;  %v6727_v44 = vand.u32 4294901760, %v319_v24 }
 0x1dc   : > { %11566 = vmatpush1.bf16.msra.mxu0 %v11565_v34  ;;  %v6723_v34 = vand.u32 4294901760, %v287_v17  ;;  %v14546_v39 = vpack.c.bf16 %v6725_v27, %v6721_v54 }
 0x1dd   : > { %11638 = vmatpush1.bf16.msra.mxu1 %v11637_v13  ;;  %5941 = vmatprep.subr.mxu0 %v16851_v62  ;;  %v7344_v13 = vand.u32 4294901760, %v289_v42  ;;  %v14509_v62 = vsub.f32 %v225_v49, %v7336_v19  ;;  %v351_v49 = vld [vmem:[%s12470_s30 + $0x5a8] sm:$0xff]  ;;  %v16870_v60 = vand.u32 4294901760, %v14530_v26 }
 0x1de   : > { %6562 = vmatprep.subr.mxu1 %v6254_v30  ;;  %v14515_v30 = vsub.f32 %v222_v18, %v6717_v37  ;;  %v14528_v19 = vpack.c.bf16 %v6723_v34, %v6719_v12  ;;  %v7346_v18 = vand.u32 4294901760, %v288_v25  ;;  %v353_v37 = vld [vmem:[%s12470_s30 + $0x5b8] sm:$0xff]  ;;  %v14536_v48 = vsub.f32 %v287_v17, %v6723_v34  ;;  %16858 = vst [vmem:[#allocation11_spill] sm:$0xff] %v14546_v39  ;;  %v318_v12 = vld [vmem:[%s12470_s30 + $0x4a0] sm:$0xff]  ;;  %v14551_v17 = vld [vmem:[%s12470_s30 + $0x4b0] sm:$0xff] }
 0x1df   : > { %v14538_v55 = vpack.c.bf16 %v7344_v13, %v7340_v52  ;;  %v14544_v9 = vsub.f32 %v289_v42, %v7344_v13  ;;  %v7352_v34 = vand.u32 4294901760, %v353_v37  ;;  %v352_v42 = vld [vmem:[%s12470_s30 + $0x5b0] sm:$0xff]  ;;  %v383_v13 = vld [vmem:[%s12470_s30 + $0x6a8] sm:$0x3f] }
 0x1e0   : > { %5945 = vmatpush1.msra.mxu0 %v16852_v59  ;;  %16856 = vst [vmem:[#allocation9_spill] sm:$0xff] %v14528_v19  ;;  %v350_v59 = vld [vmem:[%s12470_s30 + $0x5a0] sm:$0xff]  ;;  %v7354_v2 = vand.u32 4294901760, %v352_v42 }
 0x1e1   : > { %6566 = vmatpush1.msra.mxu1 %v16855_v58  ;;  %11568 = vmatprep.subr.bf16.mxu0 %v14077_v61  ;;  %16857 = vst [vmem:[#allocation10_spill] sm:$0xff] %v14538_v55  ;;  %v14540_v61 = vsub.f32 %v257_v51, %v7340_v52  ;;  %v14555_v52 = vsub.f32 %v254_v11, %v6721_v54  ;;  %v7348_v51 = vand.u32 4294901760, %v321_v8  ;;  %v6729_v11 = vand.u32 4294901760, %v318_v12 }
 0x1e2   : > { %11640 = vmatprep.subr.bf16.mxu1 %v14079_v36  ;;  %5998 = vmatmul.mubr.f32.vlgmr.msra.gmra.mrb[8].mxu0 %v12462_v3  ;;  %v6731_v36 = vand.u32 4294901760, %v351_v49  ;;  %v14563_v58 = vpack.c.bf16 %v7346_v18, %v7342_v47  ;;  %v7350_v54 = vand.u32 4294901760, %v14551_v17  ;;  %v14597_v33 = vsub.f32 %v353_v37, %v7352_v34 }
 0x1e3   : > { %11570 = vmatpush1.bf16.msra.mxu0 %v14093_v28  ;;  %6619 = vmatmul.mubr.f32.vlgmr.msra.gmra.mrb[8].mxu1 %v12462_v3  ;;  %v14557_v28 = vsub.f32 %v286_v32, %v6725_v27  ;;  %v6733_v32 = vand.u32 4294901760, %v350_v59  ;;  %v14585_v47 = vsub.f32 %v321_v8, %v7348_v51  ;;  %v466_v37 = vsel %vm404_vm1, %v382_v7, 0 }
 0x1e4   : > { %11642 = vmatpush1.bf16.msra.mxu1 %v16815_v20  ;;  %11572 = vmatprep.subr.bf16.mxu0 %v16816_v46  ;;  %16859 = vst [vmem:[#allocation12_spill] sm:$0xff] %v14563_v58  ;;  %v14567_v20 = vsub.f32 %v288_v25, %v7346_v18  ;;  %v14570_v46 = vsub.f32 %v319_v24, %v6727_v44  ;;  %v14579_v25 = vsel %vm404_vm1, %v383_v13, 0  ;;  %v385_v18 = vld [vmem:[%s12470_s30 + $0x6b8] sm:$0x3f] }
 0x1e5   : > { %11644 = vmatprep.subr.bf16.mxu1 %v16817_v22  ;;  %6082 = vmatprep.mubr.f32.mxu0 %v16541_v21  ;;  %v14574_v22 = vpack.c.bf16 %v6731_v36, %v6727_v44  ;;  %v14576_v27 = vsub.f32 %v351_v49, %v6731_v36  ;;  %v14583_v24 = vpack.c.bf16 %v7352_v34, %v7348_v51  ;;  %v384_v49 = vld [vmem:[%s12470_s30 + $0x6b0] sm:$0x3f]  ;;  %v16433_v36 = vand.u32 4294901760, %v14503_v10 }
 0x1e6   : > { %6703 = vmatprep.mubr.f32.mxu1 %v16541_v21  ;;  %v14599_v8 = vpack.c.bf16 %v6733_v32, %v6729_v11  ;;  %v16436_v51 = vand.u32 4294901760, %v14519_v45  ;;  %v14606_v44 = vsub.f32 %v350_v59, %v6733_v32  ;;  %v14609_v13 = vand.u32 4294901760, %v14579_v25 }
 0x1e7   : > { %11574 = vmatpush1.bf16.msra.mxu0 %v16818_v6  ;;  %16860 = vst [vmem:[#allocation13_spill] sm:$0xff] %v14574_v22  ;;  %16861 = vst [vmem:[#allocation15_spill] sm:$0xff] %v14583_v24  ;;  %v16437_v6 = vand.u32 4294901760, %v14521_v29  ;;  %v472_v34 = vsel %vm404_vm1, %v384_v49, 0  ;;  %v16865_v59 = vand.u32 4294901760, %v14499_v57  ;;  %v16867_v32 = vand.u32 4294901760, %v14511_v35 }
 0x1e8   : > { %11646 = vmatpush1.bf16.msra.mxu1 %v16819_v31  ;;  %11576 = vmatprep.subr.bf16.mxu0 %v16820_v0  ;;  %v16434_v0 = vand.u32 4294901760, %v14515_v30  ;;  %16862 = vst [vmem:[#allocation16_spill] sm:$0xff] %v14599_v8  ;;  %16863 = vst [vmem:[#allocation14_spill] sm:$0xff] %v14609_v13  ;;  %v14612_v31 = vsel %vm404_vm1, %v385_v18, 0 }
 0x1e9   : > { %11648 = vmatprep.subr.bf16.mxu1 %v16821_v23  ;;  %v14604_v23 = vsub.f32 %v318_v12, %v6729_v11  ;;  %v6816_v11 = vsub.f32 %v14499_v57, %v16865_v59  ;;  %v6810_v18 = vsub.f32 %v14511_v35, %v16867_v32  ;;  %v7443_v59 = vsub.f32 %v14521_v29, %v16437_v6 }
 0x1ea   : > { %v6822_v49 = vsub.f32 %v14515_v30, %v16434_v0  ;;  %v14648_v32 = vsub.f32 %v14551_v17, %v7350_v54  ;;  %v14653_v0 = vand.u32 4294901760, %v14612_v31  ;;  %v14660_v6 = vand.u32 4294901760, %v472_v34 }
 0x1eb   : > { %11578 = vmatpush1.bf16.msra.mxu0 %v16822_v41  ;;  %v16864_v41 = vand.u32 4294901760, %v14497_v56  ;;  %v7444_v50 = vand.u32 4294901760, %v7443_v59  ;;  %v6828_v29 = vsub.f32 %v14530_v26, %v16870_v60  ;;  %v16450_v59 = vand.u32 4294901760, %v14567_v20 }
 0x1ec   : > { %11650 = vmatpush1.bf16.msra.mxu1 %v16823_v43  ;;  %6029 = vmatprep.subr.mxu0 %v16824_v16  ;;  %v7425_v43 = vsub.f32 %v14503_v10, %v16433_v36  ;;  %v16866_v16 = vand.u32 4294901760, %v14509_v62  ;;  %v14650_v36 = vsub.f32 %v352_v42, %v7354_v2  ;;  %v16872_v60 = vand.u32 4294901760, %v14540_v61 }
 0x1ed   : > { %v6804_v12 = vsub.f32 %v14497_v56, %v16864_v41  ;;  %6650 = vmatprep.subr.mxu1 %v14241_v38  ;;  %v14637_v41 = vpack.c.bf16 %v7354_v2, %v7350_v54  ;;  %v7431_v38 = vsub.f32 %v14519_v45, %v16436_v51  ;;  %v14658_v51 = vand.u32 4294901760, %v466_v37 }
 0x1ee   : > { %v7437_v7 = vsub.f32 %v14509_v62, %v16866_v16  ;;  %v7426_v17 = vand.u32 4294901760, %v7425_v43  ;;  %v6811_v54 = vand.u32 4294901760, %v6810_v18  ;;  %v6823_v2 = vand.u32 4294901760, %v6822_v49 }
 0x1ef   : > { %16868 = vst [vmem:[#allocation22_spill] sm:$0xff] %v14637_v41  ;;  %6031 = vmatpush1.msra.mxu0 %v16831_v53  ;;  %16869 = vst [vmem:[#allocation26_spill] sm:$0xff] %v14658_v51  ;;  %v6805_v16 = vand.u32 4294901760, %v6804_v12  ;;  %v6817_v53 = vand.u32 4294901760, %v6816_v11  ;;  %v14673_v11 = vsub.f32 %v466_v37, %v14658_v51  ;;  %v14676_v43 = vsub.f32 %v472_v34, %v14660_v6 }
 0x1f0   : > { %6652 = vmatpush1.msra.mxu1 %v14248_v4  ;;  %6084 = vmatmul.mubr.f32.vlgmr.msra.gmra.mrb[8].mxu0 %v12462_v3  ;;  %v7438_v42 = vand.u32 4294901760, %v7437_v7  ;;  %v7432_v4 = vand.u32 4294901760, %v7431_v38  ;;  %v16871_v7 = vand.u32 4294901760, %v14536_v48  ;;  %v16447_v37 = vand.u32 4294901760, %v14565_v40 }
 0x1f1   : > { %6705 = vmatmul.mubr.f32.vlgmr.msra.gmra.mrb[8].mxu1 %v12462_v3  ;;  %11652 = vmatprep.subr.bf16.mxu0 %v14489_v14  ;;  %v11663_v34 = vpack.c.bf16 %v6817_v53, %v6805_v16  ;;  %v7449_v38 = vsub.f32 %v14540_v61, %v16872_v60  ;;  %v16873_v53 = vand.u32 4294901760, %v14544_v9  ;;  %v16878_v49 = vand.u32 4294901760, %v14597_v33 }
 0x1f2   : > { %11724 = vmatprep.subr.bf16.mxu1 %v14491_v63  ;;  %11654 = vmatpush1.bf16.msra.mxu0 %v14505_v5  ;;  %v6840_v18 = vsub.f32 %v14536_v48, %v16871_v7  ;;  %v11735_v12 = vpack.c.bf16 %v7438_v42, %v7426_v17  ;;  %v16451_v7 = vand.u32 4294901760, %v14570_v46 }
 0x1f3   : > { %11726 = vmatpush1.bf16.msra.mxu1 %v14517_v1  ;;  %11656 = vmatprep.subr.bf16.mxu0 %v14528_v19  ;;  %v11737_v19 = vpack.c.bf16 %v7444_v50, %v7432_v4  ;;  %v6829_v1 = vand.u32 4294901760, %v6828_v29  ;;  %v7461_v17 = vsub.f32 %v14544_v9, %v16873_v53  ;;  %v16874_v50 = vand.u32 4294901760, %v14555_v52 }
 0x1f4   : > { %11728 = vmatprep.subr.bf16.mxu1 %v14538_v55  ;;  %6789 = vmatprep.mubr.f32.mxu0 %v16541_v21  ;;  %v11665_v55 = vpack.c.bf16 %v6823_v2, %v6811_v54  ;;  %v6841_v16 = vand.u32 4294901760, %v6840_v18  ;;  %v16875_v54 = vand.u32 4294901760, %v14557_v28  ;;  %v7455_v4 = vsub.f32 %v14565_v40, %v16447_v37 }
 0x1f5   : > { %7410 = vmatprep.mubr.f32.mxu1 %v16541_v21  ;;  %v6834_v29 = vsub.f32 %v14555_v52, %v16874_v50  ;;  %v7467_v18 = vsub.f32 %v14567_v20, %v16450_v59  ;;  %v6852_v60 = vsub.f32 %v14570_v46, %v16451_v7  ;;  %v16876_v53 = vand.u32 4294901760, %v14576_v27 }
 0x1f6   : > { %11658 = vmatpush1.bf16.msra.mxu0 %v14546_v39  ;;  %v6846_v2 = vsub.f32 %v14557_v28, %v16875_v54  ;;  %v7450_v42 = vand.u32 4294901760, %v7449_v38  ;;  %v14728_v59 = vsub.f32 %v14579_v25, %v14609_v13  ;;  %v16877_v7 = vand.u32 4294901760, %v14585_v47 }
 0x1f7   : > { %11730 = vmatpush1.bf16.msra.mxu1 %v14563_v58  ;;  %11660 = vmatprep.subr.bf16.mxu0 %v14574_v22  ;;  %v6864_v50 = vsub.f32 %v14576_v27, %v16876_v53  ;;  %v7462_v53 = vand.u32 4294901760, %v7461_v17  ;;  %v7485_v38 = vsub.f32 %v14597_v33, %v16878_v49  ;;  %v6835_v25 = vand.u32 4294901760, %v6834_v29 }
 0x1f8   : > { %11732 = vmatprep.subr.bf16.mxu1 %v14583_v24  ;;  %v7473_v54 = vsub.f32 %v14585_v47, %v16877_v7  ;;  %v14740_v24 = vsub.f32 %v14612_v31, %v14653_v0  ;;  %v6847_v37 = vand.u32 4294901760, %v6846_v2  ;;  %v16879_v22 = vand.u32 4294901760, %v14604_v23 }
 0x1f9   : > { %v6865_v17 = vand.u32 4294901760, %v6864_v50  ;;  %v16880_v58 = vand.u32 4294901760, %v14606_v44  ;;  %v11667_v31 = vpack.c.bf16 %v6841_v16, %v6829_v1  ;;  %v16881_v39 = vand.u32 4294901760, %v14648_v32 }
 0x1fa   : > { %11662 = vmatpush1.bf16.msra.mxu0 %v14599_v8  ;;  %v7468_v8 = vand.u32 4294901760, %v7467_v18  ;;  %v6858_v7 = vsub.f32 %v14604_v23, %v16879_v22  ;;  %v16882_v2 = vand.u32 4294901760, %v14650_v36  ;;  %v11739_v22 = vpack.c.bf16 %v7462_v53, %v7450_v42 }
 0x1fb   : > { %11734 = vmatpush1.bf16.msra.mxu1 %v14637_v41  ;;  %6736 = vmatprep.subr.mxu0 %v14609_v13  ;;  %v7456_v41 = vand.u32 4294901760, %v7455_v4  ;;  %v6853_v13 = vand.u32 4294901760, %v6852_v60  ;;  %v6870_v49 = vsub.f32 %v14606_v44, %v16880_v58  ;;  %v7479_v29 = vsub.f32 %v14648_v32, %v16881_v39 }
 0x1fc   : > { %7357 = vmatprep.subr.mxu1 %v14653_v0  ;;  %v7491_v4 = vsub.f32 %v14650_v36, %v16882_v2  ;;  %v7474_v60 = vand.u32 4294901760, %v7473_v54  ;;  %v7486_v50 = vand.u32 4294901760, %v7485_v38  ;;  %v7496_v58 = vand.u32 4294901760, %v14740_v24 }
 0x1fd   : > { %v11669_v1 = vpack.c.bf16 %v6847_v37, %v6835_v25  ;;  %v11741_v16 = vpack.c.bf16 %v7468_v8, %v7456_v41  ;;  %v11671_v39 = vpack.c.bf16 %v6865_v17, %v6853_v13  ;;  %v6859_v2 = vand.u32 4294901760, %v6858_v7 }
 0x1fe   : > { %6738 = vmatpush1.msra.mxu0 %v14658_v51  ;;  %v6871_v51 = vand.u32 4294901760, %v6870_v49  ;;  %v16467_v18 = vand.u32 4294901760, %v14673_v11  ;;  %v7492_v42 = vand.u32 4294901760, %v7491_v4  ;;  %v16883_v54 = vand.u32 4294901760, %v14728_v59 }
 0x1ff   : > { %7359 = vmatpush1.msra.mxu1 %v14660_v6  ;;  %11664 = vmatprep.subr.bf16.mxu0 %v11663_v34  ;;  %v7480_v34 = vand.u32 4294901760, %v7479_v29  ;;  %v16466_v53 = vand.u32 4294901760, %v14676_v43  ;;  %v11743_v8 = vpack.c.bf16 %v7486_v50, %v7474_v60  ;;  %v11747_v49 = vpack.c.bf16 %v14509_v62, %v14503_v10  ;;  %v16884_v29 = vld [vmem:[#allocation7_spill] sm:$0xff] }
 0x200   : > { %11736 = vmatprep.subr.bf16.mxu1 %v11735_v12  ;;  %6795 = vmatmul.mubr.f32.vlgmr.msra.gmra.mrb[10].mxu0 %v16595_v15  ;;  %v6876_v12 = vsub.f32 %v14728_v59, %v16883_v54  ;;  %v6882_v13 = vsub.f32 %v14673_v11, %v16467_v18  ;;  %v11749_v4 = vpack.c.bf16 %v16884_v29, %v14519_v45  ;;  %v260_v18 = vld [vmem:[%s12470_s30 + $0x2d0] sm:$0xff] }
 0x201   : > { %11666 = vmatpush1.bf16.msra.mxu0 %v11665_v55  ;;  %7416 = vmatmul.mubr.f32.vlgmr.msra.gmra.mrb[10].mxu1 %v16595_v15  ;;  %v7497_v55 = vsub.f32 %v14740_v24, %v7496_v58  ;;  %v11745_v41 = vpack.c.bf16 %v7492_v42, %v7480_v34  ;;  %v7503_v38 = vsub.f32 %v14676_v43, %v16466_v53 }
 0x202   : > { %11738 = vmatpush1.bf16.msra.mxu1 %v11737_v19  ;;  %11668 = vmatprep.subr.bf16.mxu0 %v11667_v31  ;;  %v11673_v19 = vpack.c.bf16 %v6871_v51, %v6859_v2  ;;  %v6877_v37 = vand.u32 4294901760, %v6876_v12  ;;  %v6883_v17 = vand.u32 4294901760, %v6882_v13  ;;  %v11675_v51 = vpack.c.bf16 %v14499_v57, %v14497_v56  ;;  %v16891_v13 = vld [vmem:[#allocation9_spill] sm:$0xff] }
 0x203   : > { %11740 = vmatprep.subr.bf16.mxu1 %v11739_v22  ;;  %6935 = vmatprep.mubr.f32.mxu0 %v16541_v21  ;;  %v7498_v25 = vand.u32 4294901760, %v7497_v55  ;;  %v7504_v7 = vand.u32 4294901760, %v7503_v38  ;;  %v11677_v31 = vpack.c.bf16 %v14515_v30, %v14511_v35  ;;  %v11679_v22 = vpack.c.bf16 %v14536_v48, %v14530_v26  ;;  %v16889_v55 = vld [vmem:[#allocation5_spill] sm:$0xff]  ;;  %v16894_v38 = vld [vmem:[#allocation12_spill] sm:$0xff] }
 0x204   : > { %7556 = vmatprep.mubr.f32.mxu1 %v16541_v21  ;;  %v11751_v60 = vpack.c.bf16 %v14544_v9, %v14540_v61  ;;  %v11753_v2 = vpack.c.bf16 %v14567_v20, %v14565_v40  ;;  %v11683_v34 = vpack.c.bf16 %v14576_v27, %v14570_v46  ;;  %v11755_v54 = vpack.c.bf16 %v14597_v33, %v14585_v47 }
 0x205   : > { %11670 = vmatpush1.bf16.msra.mxu0 %v11669_v1  ;;  %v11681_v1 = vpack.c.bf16 %v14557_v28, %v14555_v52  ;;  %v11685_v12 = vpack.c.bf16 %v14606_v44, %v14604_v23 }
 0x206   : > { %11742 = vmatpush1.bf16.msra.mxu1 %v11741_v16  ;;  %11672 = vmatprep.subr.bf16.mxu0 %v11671_v39 }
 0x207   : > { %11744 = vmatprep.subr.bf16.mxu1 %v11743_v8  ;;  %v11757_v8 = vpack.c.bf16 %v14650_v36, %v14648_v32 }
 0x209   : > { %11674 = vmatpush1.bf16.msra.mxu0 %v11673_v19  ;;  %v16890_v19 = vld [vmem:[#allocation20_spill] sm:$0xff] }
 0x20a   : > { %11746 = vmatpush1.bf16.msra.mxu1 %v11745_v41  ;;  %6878 = vmatprep.subr.mxu0 %v6877_v37  ;;  %v16892_v41 = vld [vmem:[#allocation10_spill] sm:$0xff]  ;;  %v16893_v37 = vld [vmem:[#allocation11_spill] sm:$0xff] }
 0x20b   : > { %7499 = vmatprep.subr.mxu1 %v7498_v25  ;;  %v16895_v25 = vld [vmem:[#allocation13_spill] sm:$0xff] }
 0x20d   : > { %6884 = vmatpush1.msra.mxu0 %v6883_v17  ;;  %v16896_v17 = vld [vmem:[#allocation15_spill] sm:$0xff] }
 0x20e   : > { %7505 = vmatpush1.msra.mxu1 %v7504_v7  ;;  %11676 = vmatprep.subr.bf16.mxu0 %v11675_v51  ;;  %v16897_v7 = vld [vmem:[#allocation16_spill] sm:$0xff]  ;;  %v16898_v51 = vld [vmem:[#allocation22_spill] sm:$0xff] }
 0x20f   : > { %11748 = vmatprep.subr.bf16.mxu1 %v11747_v49  ;;  %6937 = vmatmul.mubr.f32.vlgmr.msra.gmra.mrb[10].mxu0 %v12462_v3  ;;  %v14790_v50 = vpop.f32.mrb[4].mxu0  ;;  %v16899_v49 = vld [vmem:[#allocation14_spill] sm:$0xff] }
 0x210   : > { %16885 = vst [vmem:[#allocation7_spill] sm:$0xff] %v14790_v50  ;;  %11678 = vmatpush1.bf16.msra.mxu0 %v11677_v31  ;;  %7558 = vmatmul.mubr.f32.vlgmr.msra.gmra.mrb[10].mxu1 %v12462_v3  ;;  %v14795_v16 = vpop.f32.mrb[4].mxu1  ;;  %v14797_v39 = vpop.f32.mrb[5].mxu0  ;;  %v16900_v31 = vand.u32 4294901760, %v14497_v56  ;;  %v16907_v56 = vand.u32 4294901760, %v14519_v45  ;;  %v16913_v45 = vld [vmem:[#allocation6_spill] sm:$0xff] }
 0x211   : > { %16886 = vst [vmem:[#allocation27_spill] sm:$0xff] %v14795_v16  ;;  %16887 = vst [vmem:[#allocation28_spill] sm:$0xff] %v14797_v39  ;;  %11750 = vmatpush1.bf16.msra.mxu1 %v11749_v4  ;;  %11680 = vmatprep.subr.bf16.mxu0 %v11679_v22  ;;  %v14803_v42 = vpop.f32.mrb[5].mxu1  ;;  %v16901_v4 = vand.u32 4294901760, %v14499_v57  ;;  %v16908_v57 = vand.u32 4294901760, %v16884_v29 }
 0x212   : > { %16888 = vst [vmem:[#allocation29_spill] sm:$0xff] %v14803_v42  ;;  %11752 = vmatprep.subr.bf16.mxu1 %v11751_v60  ;;  %7035 = vmatprep.mubr.f32.mxu0 %v16541_v21  ;;  %v16902_v60 = vand.u32 4294901760, %v14503_v10  ;;  %v16910_v10 = vand.u32 4294901760, %v14536_v48  ;;  %v16915_v48 = vand.u32 4294901760, %v14557_v28  ;;  %v16920_v28 = vand.u32 4294901760, %v14585_v47  ;;  %v323_v42 = vld [vmem:[%s12470_s30 + $0x4c8] sm:$0xff] }
 0x213   : > { %7656 = vmatprep.mubr.f32.mxu1 %v16541_v21  ;;  %v11699_v22 = vpack.c.bf16 %v16901_v4, %v16900_v31  ;;  %v11773_v31 = vpack.c.bf16 %v16908_v57, %v16907_v56  ;;  %v16909_v4 = vand.u32 4294901760, %v14530_v26  ;;  %v16914_v26 = vand.u32 4294901760, %v14555_v52  ;;  %v197_v56 = vld [vmem:[%s12470_s30 + $0xd8] sm:$0xff]  ;;  %v386_v39 = vld [vmem:[%s12470_s30 + $0x6c0] sm:$0x3f] }
 0x214   : > { %11682 = vmatpush1.bf16.msra.mxu0 %v11681_v1  ;;  %v16903_v1 = vand.u32 4294901760, %v14509_v62  ;;  %v229_v52 = vld [vmem:[%s12470_s30 + $0x1d8] sm:$0xff]  ;;  %v16921_v57 = vand.u32 4294901760, %v14597_v33 }
 0x215   : > { %11754 = vmatpush1.bf16.msra.mxu1 %v11753_v2  ;;  %11684 = vmatprep.subr.bf16.mxu0 %v11683_v34  ;;  %v16904_v34 = vand.u32 4294901760, %v14511_v35  ;;  %v11703_v62 = vpack.c.bf16 %v16910_v10, %v16909_v4  ;;  %v16911_v35 = vand.u32 4294901760, %v14540_v61  ;;  %v11705_v29 = vpack.c.bf16 %v16915_v48, %v16914_v26  ;;  %v226_v4 = vld [vmem:[%s12470_s30 + $0x1c0] sm:$0xff] }
 0x216   : > { %11756 = vmatprep.subr.bf16.mxu1 %v11755_v54  ;;  %v11771_v2 = vpack.c.bf16 %v16903_v1, %v16902_v60  ;;  %v16905_v54 = vand.u32 4294901760, %v14515_v30  ;;  %v16912_v30 = vand.u32 4294901760, %v14544_v9  ;;  %v195_v1 = vld [vmem:[%s12470_s30 + $0xc8] sm:$0xff]  ;;  %v16916_v61 = vand.u32 4294901760, %v14565_v40 }
 0x217   : > { %v16917_v9 = vand.u32 4294901760, %v14567_v20  ;;  %v16922_v40 = vand.u32 4294901760, %v14604_v23  ;;  %v16923_v20 = vand.u32 4294901760, %v14606_v44  ;;  %v7953_v47 = vand.u32 4294901760, %v195_v1 }
 0x218   : > { %11686 = vmatpush1.bf16.msra.mxu0 %v11685_v12  ;;  %v11701_v12 = vpack.c.bf16 %v16905_v54, %v16904_v34  ;;  %v11775_v60 = vpack.c.bf16 %v16912_v30, %v16911_v35  ;;  %v16919_v34 = vand.u32 4294901760, %v14576_v27  ;;  %v194_v27 = vld [vmem:[%s12470_s30 + $0xc0] sm:$0xff]  ;;  %v8574_v10 = vand.u32 4294901760, %v197_v56  ;;  %v196_v30 = vld [vmem:[%s12470_s30 + $0xd0] sm:$0xff] }
 0x219   : > { %11758 = vmatpush1.bf16.msra.mxu1 %v11757_v8  ;;  %6981 = vmatprep.subr.mxu0 %v14728_v59  ;;  %v16906_v8 = vld [vmem:[#allocation26_spill] sm:$0xff]  ;;  %v16924_v23 = vand.u32 4294901760, %v14648_v32  ;;  %v16925_v44 = vand.u32 4294901760, %v14650_v36  ;;  %v7955_v26 = vand.u32 4294901760, %v194_v27  ;;  %v7959_v48 = vand.u32 4294901760, %v226_v4 }
 0x21a   : > { %7602 = vmatprep.subr.mxu1 %v14740_v24  ;;  %v8576_v32 = vand.u32 4294901760, %v196_v30  ;;  %v16927_v24 = vand.u32 4294901760, %v14673_v11 }
 0x21b   : > { %v11781_v35 = vpack.c.bf16 %v16925_v44, %v16924_v23  ;;  %v14915_v23 = vsub.f32 %v197_v56, %v8574_v10  ;;  %v14917_v44 = vpack.c.bf16 %v7959_v48, %v7955_v26 }
 0x21c   : > { %6984 = vmatpush1.msra.mxu0 %v14673_v11  ;;  %v8584_v11 = vand.u32 4294901760, %v260_v18 }
 0x21d   : > { %7605 = vmatpush1.msra.mxu1 %v14676_v43  ;;  %11688 = vmatprep.subr.bf16.mxu0 %v14489_v14 }
 0x21e   : > { %11760 = vmatprep.subr.bf16.mxu1 %v14491_v63  ;;  %7038 = vmatmul.mubr.f32.vlgmr.msra.gmra.mrb[10].mxu0 %v16889_v55  ;;  %v14977_v16 = vsub.f32 %v260_v18, %v8584_v11 }
 0x21f   : > { %11690 = vmatpush1.bf16.msra.mxu0 %v14505_v5  ;;  %7659 = vmatmul.mubr.f32.vlgmr.msra.gmra.mrb[10].mxu1 %v16889_v55 }
 0x220   : > { %11762 = vmatpush1.bf16.msra.mxu1 %v16890_v19  ;;  %11692 = vmatprep.subr.bf16.mxu0 %v16891_v13 }
 0x221   : > { %11764 = vmatprep.subr.bf16.mxu1 %v16892_v41  ;;  %7122 = vmatprep.mubr.f32.mxu0 %v16541_v21 }
 0x222   : > { %7743 = vmatprep.mubr.f32.mxu1 %v16541_v21 }
 0x223   : > { %11694 = vmatpush1.bf16.msra.mxu0 %v16893_v37 }
 0x224   : > { %11766 = vmatpush1.bf16.msra.mxu1 %v16894_v38  ;;  %11696 = vmatprep.subr.bf16.mxu0 %v16895_v25 }
 0x225   : > { %11768 = vmatprep.subr.bf16.mxu1 %v16896_v17 }
 0x227   : > { %11698 = vmatpush1.bf16.msra.mxu0 %v16897_v7 }
 0x228   : > { %11770 = vmatpush1.bf16.msra.mxu1 %v16898_v51  ;;  %7069 = vmatprep.subr.mxu0 %v16899_v49 }
 0x229   : > { %7690 = vmatprep.subr.mxu1 %v14653_v0 }
 0x22b   : > { %7071 = vmatpush1.msra.mxu0 %v16906_v8 }
 0x22c   : > { %7692 = vmatpush1.msra.mxu1 %v14660_v6  ;;  %11700 = vmatprep.subr.bf16.mxu0 %v11699_v22  ;;  %v11777_v22 = vpack.c.bf16 %v16917_v9, %v16916_v61  ;;  %v291_v61 = vld [vmem:[%s12470_s30 + $0x3c8] sm:$0xff]  ;;  %v261_v9 = vld [vmem:[%s12470_s30 + $0x2d8] sm:$0xff] }
 0x22d   : > { %11772 = vmatprep.subr.bf16.mxu1 %v11771_v2  ;;  %7126 = vmatmul.mubr.f32.vlgmr.msra.gmra.mrb[10].mxu0 %v16913_v45  ;;  %v16918_v2 = vand.u32 4294901760, %v14570_v46  ;;  %v11709_v46 = vpack.c.bf16 %v16923_v20, %v16922_v40  ;;  %v8582_v53 = vand.u32 4294901760, %v261_v9 }
 0x22e   : > { %11702 = vmatpush1.bf16.msra.mxu0 %v11701_v12  ;;  %7747 = vmatmul.mubr.f32.vlgmr.msra.gmra.mrb[10].mxu1 %v16913_v45  ;;  %v227_v12 = vld [vmem:[%s12470_s30 + $0x1c8] sm:$0xff] }
 0x22f   : > { %11774 = vmatpush1.bf16.msra.mxu1 %v11773_v31  ;;  %11704 = vmatprep.subr.bf16.mxu0 %v11703_v62  ;;  %v11707_v54 = vpack.c.bf16 %v16919_v34, %v16918_v2  ;;  %v11779_v31 = vpack.c.bf16 %v16921_v57, %v16920_v28  ;;  %v7957_v33 = vand.u32 4294901760, %v227_v12  ;;  %v8578_v62 = vand.u32 4294901760, %v229_v52  ;;  %v293_v2 = vld [vmem:[%s12470_s30 + $0x3d8] sm:$0xff]  ;;  %v290_v28 = vld [vmem:[%s12470_s30 + $0x3c0] sm:$0xff] }
 0x230   : > { %11776 = vmatprep.subr.bf16.mxu1 %v11775_v60  ;;  %7238 = vmatprep.mubr.f32.mxu0 %v16541_v21  ;;  %v228_v60 = vld [vmem:[%s12470_s30 + $0x1d0] sm:$0xff]  ;;  %v16926_v57 = vand.u32 4294901760, %v14728_v59 }
 0x231   : > { %7859 = vmatprep.mubr.f32.mxu1 %v16541_v21  ;;  %v14901_v34 = vpack.c.bf16 %v7957_v33, %v7953_v47  ;;  %v8580_v36 = vand.u32 4294901760, %v228_v60  ;;  %v14911_v40 = vsub.f32 %v227_v12, %v7957_v33  ;;  %v292_v59 = vld [vmem:[%s12470_s30 + $0x3d0] sm:$0xff]  ;;  %v14931_v33 = vsub.f32 %v196_v30, %v8576_v32  ;;  %v325_v30 = vld [vmem:[%s12470_s30 + $0x4d8] sm:$0xff] }
 0x232   : > { %11706 = vmatpush1.bf16.msra.mxu0 %v11705_v29  ;;  %v259_v29 = vld [vmem:[%s12470_s30 + $0x2c8] sm:$0xff] }
 0x233   : > { %11778 = vmatpush1.bf16.msra.mxu1 %v11777_v22  ;;  %11708 = vmatprep.subr.bf16.mxu0 %v11707_v54  ;;  %v14903_v22 = vpack.c.bf16 %v8578_v62, %v8574_v10  ;;  %v258_v54 = vld [vmem:[%s12470_s30 + $0x2c0] sm:$0xff]  ;;  %v7961_v20 = vand.u32 4294901760, %v259_v29  ;;  %v14929_v56 = vpack.c.bf16 %v8580_v36, %v8576_v32  ;;  %v14933_v10 = vsub.f32 %v228_v60, %v8580_v36 }
 0x234   : > { %11780 = vmatprep.subr.bf16.mxu1 %v11779_v31  ;;  %v14909_v31 = vsub.f32 %v195_v1, %v7953_v47  ;;  %v14923_v1 = vsub.f32 %v194_v27, %v7955_v26  ;;  %v7963_v12 = vand.u32 4294901760, %v258_v54  ;;  %v7967_v47 = vand.u32 4294901760, %v290_v28 }
 0x235   : > { %16928 = vst [vmem:[#allocation20_spill] sm:$0xff] %v14929_v56  ;;  %16929 = vst [vmem:[#allocation9_spill] sm:$0xff] %v14933_v10  ;;  %v16930_v27 = vand.u32 4294901760, %v14676_v43  ;;  %v14942_v26 = vsub.f32 %v259_v29, %v7961_v20  ;;  %v7969_v36 = vand.u32 4294901760, %v323_v42 }
 0x236   : > { %11710 = vmatpush1.bf16.msra.mxu0 %v11709_v46  ;;  %v7965_v46 = vand.u32 4294901760, %v291_v61  ;;  %v14958_v32 = vpack.c.bf16 %v7967_v47, %v7963_v12 }
 0x237   : > { %11782 = vmatpush1.bf16.msra.mxu1 %v11781_v35  ;;  %7183 = vmatprep.subr.mxu0 %v16926_v57  ;;  %v8586_v35 = vand.u32 4294901760, %v293_v2  ;;  %v14921_v57 = vsub.f32 %v229_v52, %v8578_v62  ;;  %v355_v52 = vld [vmem:[%s12470_s30 + $0x5c8] sm:$0xff]  ;;  %v16945_v55 = vand.u32 4294901760, %v14942_v26 }
 0x238   : > { %7804 = vmatprep.subr.mxu1 %v7496_v58  ;;  %v14927_v58 = vsub.f32 %v226_v4, %v7959_v48  ;;  %v14940_v62 = vpack.c.bf16 %v7965_v46, %v7961_v20  ;;  %v8588_v4 = vand.u32 4294901760, %v292_v59  ;;  %v357_v48 = vld [vmem:[%s12470_s30 + $0x5d8] sm:$0xff]  ;;  %v14948_v60 = vsub.f32 %v291_v61, %v7965_v46  ;;  %16933 = vst [vmem:[#allocation12_spill] sm:$0xff] %v14958_v32  ;;  %v322_v20 = vld [vmem:[%s12470_s30 + $0x4c0] sm:$0xff]  ;;  %v14963_v61 = vld [vmem:[%s12470_s30 + $0x4d0] sm:$0xff] }
 0x239   : > { %v14950_v43 = vpack.c.bf16 %v8586_v35, %v8582_v53  ;;  %v14956_v29 = vsub.f32 %v293_v2, %v8586_v35  ;;  %v8594_v46 = vand.u32 4294901760, %v357_v48  ;;  %v356_v2 = vld [vmem:[%s12470_s30 + $0x5d0] sm:$0xff]  ;;  %v387_v35 = vld [vmem:[%s12470_s30 + $0x6c8] sm:$0x3f] }
 0x23a   : > { %7187 = vmatpush1.msra.mxu0 %v16927_v24  ;;  %16931 = vst [vmem:[#allocation10_spill] sm:$0xff] %v14940_v62  ;;  %v354_v24 = vld [vmem:[%s12470_s30 + $0x5c0] sm:$0xff]  ;;  %v8596_v18 = vand.u32 4294901760, %v356_v2 }
 0x23b   : > { %7808 = vmatpush1.msra.mxu1 %v16930_v27  ;;  %11712 = vmatprep.subr.bf16.mxu0 %v14489_v14  ;;  %16932 = vst [vmem:[#allocation11_spill] sm:$0xff] %v14950_v43  ;;  %v14952_v14 = vsub.f32 %v261_v9, %v8582_v53  ;;  %v14967_v53 = vsub.f32 %v258_v54, %v7963_v12  ;;  %v8590_v9 = vand.u32 4294901760, %v325_v30  ;;  %v7971_v54 = vand.u32 4294901760, %v322_v20 }
 0x23c   : > { %11784 = vmatprep.subr.bf16.mxu1 %v14491_v63  ;;  %7240 = vmatmul.mubr.f32.vlgmr.msra.gmra.mrb[10].mxu0 %v12462_v3  ;;  %v7973_v63 = vand.u32 4294901760, %v355_v52  ;;  %v14975_v27 = vpack.c.bf16 %v8588_v4, %v8584_v11  ;;  %v8592_v12 = vand.u32 4294901760, %v14963_v61  ;;  %v15009_v50 = vsub.f32 %v357_v48, %v8594_v46 }
 0x23d   : > { %11714 = vmatpush1.bf16.msra.mxu0 %v14505_v5  ;;  %7861 = vmatmul.mubr.f32.vlgmr.msra.gmra.mrb[10].mxu1 %v12462_v3  ;;  %v14969_v5 = vsub.f32 %v290_v28, %v7967_v47  ;;  %v7975_v28 = vand.u32 4294901760, %v354_v24  ;;  %v14997_v11 = vsub.f32 %v325_v30, %v8590_v9  ;;  %v478_v48 = vsel %vm404_vm1, %v386_v39, 0 }
 0x23e   : > { %11786 = vmatpush1.bf16.msra.mxu1 %v16890_v19  ;;  %11716 = vmatprep.subr.bf16.mxu0 %v16891_v13  ;;  %16934 = vst [vmem:[#allocation13_spill] sm:$0xff] %v14975_v27  ;;  %v14979_v19 = vsub.f32 %v292_v59, %v8588_v4  ;;  %v14982_v13 = vsub.f32 %v323_v42, %v7969_v36  ;;  %v14991_v59 = vsel %vm404_vm1, %v387_v35, 0  ;;  %v389_v4 = vld [vmem:[%s12470_s30 + $0x6d8] sm:$0x3f] }
 0x23f   : > { %11788 = vmatprep.subr.bf16.mxu1 %v16892_v41  ;;  %7324 = vmatprep.mubr.f32.mxu0 %v16541_v21  ;;  %v14986_v41 = vpack.c.bf16 %v7973_v63, %v7969_v36  ;;  %v14988_v47 = vsub.f32 %v355_v52, %v7973_v63  ;;  %v14995_v42 = vpack.c.bf16 %v8594_v46, %v8590_v9  ;;  %v388_v52 = vld [vmem:[%s12470_s30 + $0x6d0] sm:$0x3f]  ;;  %v16468_v63 = vand.u32 4294901760, %v14915_v23 }
 0x240   : > { %7945 = vmatprep.mubr.f32.mxu1 %v16541_v21  ;;  %v15011_v30 = vpack.c.bf16 %v7975_v28, %v7971_v54  ;;  %v16471_v9 = vand.u32 4294901760, %v14931_v33  ;;  %v15018_v36 = vsub.f32 %v354_v24, %v7975_v28  ;;  %v15021_v35 = vand.u32 4294901760, %v14991_v59 }
 0x241   : > { %11718 = vmatpush1.bf16.msra.mxu0 %v16893_v37  ;;  %16935 = vst [vmem:[#allocation15_spill] sm:$0xff] %v14986_v41  ;;  %16936 = vst [vmem:[#allocation16_spill] sm:$0xff] %v14995_v42  ;;  %v16472_v37 = vand.u32 4294901760, %v14933_v10  ;;  %v484_v46 = vsel %vm404_vm1, %v388_v52, 0  ;;  %v16940_v24 = vand.u32 4294901760, %v14911_v40  ;;  %v16942_v28 = vand.u32 4294901760, %v14923_v1 }
 0x242   : > { %11790 = vmatpush1.bf16.msra.mxu1 %v16894_v38  ;;  %11720 = vmatprep.subr.bf16.mxu0 %v16895_v25  ;;  %v16469_v25 = vand.u32 4294901760, %v14927_v58  ;;  %16937 = vst [vmem:[#allocation22_spill] sm:$0xff] %v15011_v30  ;;  %16938 = vst [vmem:[#allocation14_spill] sm:$0xff] %v15021_v35  ;;  %v15024_v38 = vsel %vm404_vm1, %v389_v4, 0 }
 0x243   : > { %11792 = vmatprep.subr.bf16.mxu1 %v16896_v17  ;;  %v15016_v17 = vsub.f32 %v322_v20, %v7971_v54  ;;  %v8058_v54 = vsub.f32 %v14911_v40, %v16940_v24  ;;  %v8052_v4 = vsub.f32 %v14923_v1, %v16942_v28  ;;  %v8685_v24 = vsub.f32 %v14933_v10, %v16472_v37 }
 0x244   : > { %v8064_v52 = vsub.f32 %v14927_v58, %v16469_v25  ;;  %v15060_v28 = vsub.f32 %v14963_v61, %v8592_v12  ;;  %v15065_v25 = vand.u32 4294901760, %v15024_v38  ;;  %v15072_v37 = vand.u32 4294901760, %v484_v46 }
 0x245   : > { %11722 = vmatpush1.bf16.msra.mxu0 %v16897_v7  ;;  %v16939_v7 = vand.u32 4294901760, %v14909_v31  ;;  %v8686_v45 = vand.u32 4294901760, %v8685_v24  ;;  %v8070_v10 = vsub.f32 %v14942_v26, %v16945_v55  ;;  %v16485_v24 = vand.u32 4294901760, %v14979_v19 }
 0x246   : > { %11794 = vmatpush1.bf16.msra.mxu1 %v16898_v51  ;;  %7271 = vmatprep.subr.mxu0 %v16899_v49  ;;  %v8667_v51 = vsub.f32 %v14915_v23, %v16468_v63  ;;  %v16941_v49 = vand.u32 4294901760, %v14921_v57  ;;  %v15062_v63 = vsub.f32 %v356_v2, %v8596_v18  ;;  %v16947_v55 = vand.u32 4294901760, %v14952_v14 }
 0x247   : > { %v8046_v20 = vsub.f32 %v14909_v31, %v16939_v7  ;;  %7892 = vmatprep.subr.mxu1 %v14653_v0  ;;  %v15049_v7 = vpack.c.bf16 %v8596_v18, %v8592_v12  ;;  %v8673_v0 = vsub.f32 %v14931_v33, %v16471_v9  ;;  %v15070_v9 = vand.u32 4294901760, %v478_v48 }
 0x248   : > { %v8679_v39 = vsub.f32 %v14921_v57, %v16941_v49  ;;  %v8668_v61 = vand.u32 4294901760, %v8667_v51  ;;  %v8053_v12 = vand.u32 4294901760, %v8052_v4  ;;  %v8065_v18 = vand.u32 4294901760, %v8064_v52 }
 0x249   : > { %16943 = vst [vmem:[#allocation26_spill] sm:$0xff] %v15049_v7  ;;  %7273 = vmatpush1.msra.mxu0 %v16906_v8  ;;  %16944 = vst [vmem:[#allocation30_spill] sm:$0xff] %v15070_v9  ;;  %v8047_v49 = vand.u32 4294901760, %v8046_v20  ;;  %v8059_v8 = vand.u32 4294901760, %v8058_v54  ;;  %v15085_v54 = vsub.f32 %v478_v48, %v15070_v9  ;;  %v15088_v51 = vsub.f32 %v484_v46, %v15072_v37 }
 0x24a   : > { %7894 = vmatpush1.msra.mxu1 %v14660_v6  ;;  %7326 = vmatmul.mubr.f32.vlgmr.msra.gmra.mrb[10].mxu0 %v12462_v3  ;;  %v8680_v2 = vand.u32 4294901760, %v8679_v39  ;;  %v8674_v6 = vand.u32 4294901760, %v8673_v0  ;;  %v16946_v39 = vand.u32 4294901760, %v14948_v60  ;;  %v16482_v48 = vand.u32 4294901760, %v14977_v16 }
 0x24b   : > { %7947 = vmatmul.mubr.f32.vlgmr.msra.gmra.mrb[10].mxu1 %v12462_v3  ;;  %11796 = vmatprep.subr.bf16.mxu0 %v14901_v34  ;;  %v11807_v46 = vpack.c.bf16 %v8059_v8, %v8047_v49  ;;  %v8691_v0 = vsub.f32 %v14952_v14, %v16947_v55  ;;  %v16948_v8 = vand.u32 4294901760, %v14956_v29  ;;  %v16953_v52 = vand.u32 4294901760, %v15009_v50 }
 0x24c   : > { %11868 = vmatprep.subr.bf16.mxu1 %v14903_v22  ;;  %11798 = vmatpush1.bf16.msra.mxu0 %v14917_v44  ;;  %v8082_v4 = vsub.f32 %v14948_v60, %v16946_v39  ;;  %v11879_v20 = vpack.c.bf16 %v8680_v2, %v8668_v61  ;;  %v16486_v39 = vand.u32 4294901760, %v14982_v13 }
 0x24d   : > { %11870 = vmatpush1.bf16.msra.mxu1 %v14929_v56  ;;  %11800 = vmatprep.subr.bf16.mxu0 %v14940_v62  ;;  %v11881_v62 = vpack.c.bf16 %v8686_v45, %v8674_v6  ;;  %v8071_v56 = vand.u32 4294901760, %v8070_v10  ;;  %v8703_v61 = vsub.f32 %v14956_v29, %v16948_v8  ;;  %v16949_v45 = vand.u32 4294901760, %v14967_v53 }
 0x24e   : > { %11872 = vmatprep.subr.bf16.mxu1 %v14950_v43  ;;  %8031 = vmatprep.mubr.f32.mxu0 %v16541_v21  ;;  %v11809_v43 = vpack.c.bf16 %v8065_v18, %v8053_v12  ;;  %v8083_v49 = vand.u32 4294901760, %v8082_v4  ;;  %v16950_v12 = vand.u32 4294901760, %v14969_v5  ;;  %v8697_v6 = vsub.f32 %v14977_v16, %v16482_v48 }
 0x24f   : > { %8652 = vmatprep.mubr.f32.mxu1 %v16541_v21  ;;  %v8076_v10 = vsub.f32 %v14967_v53, %v16949_v45  ;;  %v8709_v4 = vsub.f32 %v14979_v19, %v16485_v24  ;;  %v8094_v55 = vsub.f32 %v14982_v13, %v16486_v39  ;;  %v16951_v8 = vand.u32 4294901760, %v14988_v47 }
 0x250   : > { %11802 = vmatpush1.bf16.msra.mxu0 %v14958_v32  ;;  %v8088_v18 = vsub.f32 %v14969_v5, %v16950_v12  ;;  %v8692_v2 = vand.u32 4294901760, %v8691_v0  ;;  %v15140_v24 = vsub.f32 %v14991_v59, %v15021_v35  ;;  %v16952_v39 = vand.u32 4294901760, %v14997_v11 }
 0x251   : > { %11874 = vmatpush1.bf16.msra.mxu1 %v14975_v27  ;;  %11804 = vmatprep.subr.bf16.mxu0 %v14986_v41  ;;  %v8106_v45 = vsub.f32 %v14988_v47, %v16951_v8  ;;  %v8704_v8 = vand.u32 4294901760, %v8703_v61  ;;  %v8727_v0 = vsub.f32 %v15009_v50, %v16953_v52  ;;  %v8077_v59 = vand.u32 4294901760, %v8076_v10 }
 0x252   : > { %11876 = vmatprep.subr.bf16.mxu1 %v14995_v42  ;;  %v8715_v12 = vsub.f32 %v14997_v11, %v16952_v39  ;;  %v15152_v42 = vsub.f32 %v15024_v38, %v15065_v25  ;;  %v8089_v48 = vand.u32 4294901760, %v8088_v18  ;;  %v16954_v41 = vand.u32 4294901760, %v15016_v17 }
 0x253   : > { %v8107_v61 = vand.u32 4294901760, %v8106_v45  ;;  %v16955_v27 = vand.u32 4294901760, %v15018_v36  ;;  %v11811_v38 = vpack.c.bf16 %v8083_v49, %v8071_v56  ;;  %v16956_v32 = vand.u32 4294901760, %v15060_v28 }
 0x254   : > { %11806 = vmatpush1.bf16.msra.mxu0 %v15011_v30  ;;  %v8710_v30 = vand.u32 4294901760, %v8709_v4  ;;  %v8100_v39 = vsub.f32 %v15016_v17, %v16954_v41  ;;  %v16957_v18 = vand.u32 4294901760, %v15062_v63  ;;  %v11883_v41 = vpack.c.bf16 %v8704_v8, %v8692_v2 }
 0x255   : > { %11878 = vmatpush1.bf16.msra.mxu1 %v15049_v7  ;;  %7978 = vmatprep.subr.mxu0 %v15021_v35  ;;  %v8698_v7 = vand.u32 4294901760, %v8697_v6  ;;  %v8095_v35 = vand.u32 4294901760, %v8094_v55  ;;  %v8112_v52 = vsub.f32 %v15018_v36, %v16955_v27  ;;  %v8721_v10 = vsub.f32 %v15060_v28, %v16956_v32 }
 0x256   : > { %8599 = vmatprep.subr.mxu1 %v15065_v25  ;;  %v8733_v6 = vsub.f32 %v15062_v63, %v16957_v18  ;;  %v8716_v55 = vand.u32 4294901760, %v8715_v12  ;;  %v8728_v45 = vand.u32 4294901760, %v8727_v0  ;;  %v8738_v27 = vand.u32 4294901760, %v15152_v42 }
 0x257   : > { %v11813_v56 = vpack.c.bf16 %v8089_v48, %v8077_v59  ;;  %v11885_v49 = vpack.c.bf16 %v8710_v30, %v8698_v7  ;;  %v11815_v32 = vpack.c.bf16 %v8107_v61, %v8095_v35  ;;  %v8101_v18 = vand.u32 4294901760, %v8100_v39 }
 0x258   : > { %7980 = vmatpush1.msra.mxu0 %v15070_v9  ;;  %v8113_v9 = vand.u32 4294901760, %v8112_v52  ;;  %v16502_v4 = vand.u32 4294901760, %v15085_v54  ;;  %v8734_v2 = vand.u32 4294901760, %v8733_v6  ;;  %v16958_v12 = vand.u32 4294901760, %v15140_v24 }
 0x259   : > { %8601 = vmatpush1.msra.mxu1 %v15072_v37  ;;  %11808 = vmatprep.subr.bf16.mxu0 %v11807_v46  ;;  %v8722_v46 = vand.u32 4294901760, %v8721_v10  ;;  %v16501_v8 = vand.u32 4294901760, %v15088_v51  ;;  %v11887_v30 = vpack.c.bf16 %v8728_v45, %v8716_v55  ;;  %v11891_v52 = vpack.c.bf16 %v14921_v57, %v14915_v23  ;;  %v16959_v10 = vld [vmem:[#allocation9_spill] sm:$0xff] }
 0x25a   : > { %11880 = vmatprep.subr.bf16.mxu1 %v11879_v20  ;;  %8037 = vmatmul.mubr.f32.vlgmr.msra.gmra.mrb[12].mxu0 %v16595_v15  ;;  %v8118_v20 = vsub.f32 %v15140_v24, %v16958_v12  ;;  %v8124_v35 = vsub.f32 %v15085_v54, %v16502_v4  ;;  %v11893_v6 = vpack.c.bf16 %v16959_v10, %v14931_v33  ;;  %v264_v4 = vld [vmem:[%s12470_s30 + $0x2f0] sm:$0xff] }
 0x25b   : > { %11810 = vmatpush1.bf16.msra.mxu0 %v11809_v43  ;;  %8658 = vmatmul.mubr.f32.vlgmr.msra.gmra.mrb[12].mxu1 %v16595_v15  ;;  %v8739_v43 = vsub.f32 %v15152_v42, %v8738_v27  ;;  %v11889_v7 = vpack.c.bf16 %v8734_v2, %v8722_v46  ;;  %v8745_v0 = vsub.f32 %v15088_v51, %v16501_v8 }
 0x25c   : > { %11882 = vmatpush1.bf16.msra.mxu1 %v11881_v62  ;;  %11812 = vmatprep.subr.bf16.mxu0 %v11811_v38  ;;  %v11817_v62 = vpack.c.bf16 %v8113_v9, %v8101_v18  ;;  %v8119_v48 = vand.u32 4294901760, %v8118_v20  ;;  %v8125_v61 = vand.u32 4294901760, %v8124_v35  ;;  %v11819_v9 = vpack.c.bf16 %v14911_v40, %v14909_v31  ;;  %v16966_v35 = vld [vmem:[#allocation10_spill] sm:$0xff] }
 0x25d   : > { %11884 = vmatprep.subr.bf16.mxu1 %v11883_v41  ;;  %8177 = vmatprep.mubr.f32.mxu0 %v16541_v21  ;;  %v8740_v59 = vand.u32 4294901760, %v8739_v43  ;;  %v8746_v39 = vand.u32 4294901760, %v8745_v0  ;;  %v11821_v38 = vpack.c.bf16 %v14927_v58, %v14923_v1  ;;  %v11823_v41 = vpack.c.bf16 %v14948_v60, %v14942_v26  ;;  %v16964_v43 = vld [vmem:[#allocation5_spill] sm:$0xff] }
 0x25e   : > { %8798 = vmatprep.mubr.f32.mxu1 %v16541_v21  ;;  %v11895_v55 = vpack.c.bf16 %v14956_v29, %v14952_v14  ;;  %v11897_v18 = vpack.c.bf16 %v14979_v19, %v14977_v16  ;;  %v11827_v46 = vpack.c.bf16 %v14988_v47, %v14982_v13  ;;  %v11899_v12 = vpack.c.bf16 %v15009_v50, %v14997_v11  ;;  %v16969_v0 = vld [vmem:[#allocation13_spill] sm:$0xff] }
 0x25f   : > { %11814 = vmatpush1.bf16.msra.mxu0 %v11813_v56  ;;  %v11825_v56 = vpack.c.bf16 %v14969_v5, %v14967_v53  ;;  %v11829_v20 = vpack.c.bf16 %v15018_v36, %v15016_v17 }
 0x260   : > { %11886 = vmatpush1.bf16.msra.mxu1 %v11885_v49  ;;  %11816 = vmatprep.subr.bf16.mxu0 %v11815_v32 }
 0x261   : > { %11888 = vmatprep.subr.bf16.mxu1 %v11887_v30  ;;  %v11901_v30 = vpack.c.bf16 %v15062_v63, %v15060_v28 }
 0x263   : > { %11818 = vmatpush1.bf16.msra.mxu0 %v11817_v62  ;;  %v16965_v62 = vld [vmem:[#allocation20_spill] sm:$0xff] }
 0x264   : > { %11890 = vmatpush1.bf16.msra.mxu1 %v11889_v7  ;;  %8120 = vmatprep.subr.mxu0 %v8119_v48  ;;  %v16967_v7 = vld [vmem:[#allocation11_spill] sm:$0xff]  ;;  %v16968_v48 = vld [vmem:[#allocation12_spill] sm:$0xff] }
 0x265   : > { %8741 = vmatprep.subr.mxu1 %v8740_v59  ;;  %v16970_v59 = vld [vmem:[#allocation15_spill] sm:$0xff] }
 0x267   : > { %8126 = vmatpush1.msra.mxu0 %v8125_v61  ;;  %v16971_v61 = vld [vmem:[#allocation16_spill] sm:$0xff] }
 0x268   : > { %8747 = vmatpush1.msra.mxu1 %v8746_v39  ;;  %11820 = vmatprep.subr.bf16.mxu0 %v11819_v9  ;;  %v16972_v39 = vld [vmem:[#allocation22_spill] sm:$0xff] }
 0x269   : > { %11892 = vmatprep.subr.bf16.mxu1 %v11891_v52  ;;  %8179 = vmatmul.mubr.f32.vlgmr.msra.gmra.mrb[12].mxu0 %v12462_v3  ;;  %v15202_v45 = vpop.f32.mrb[6].mxu0  ;;  %v16973_v9 = vld [vmem:[#allocation26_spill] sm:$0xff] }
 0x26a   : > { %16960 = vst [vmem:[#allocation9_spill] sm:$0xff] %v15202_v45  ;;  %11822 = vmatpush1.bf16.msra.mxu0 %v11821_v38  ;;  %8800 = vmatmul.mubr.f32.vlgmr.msra.gmra.mrb[12].mxu1 %v12462_v3  ;;  %v15207_v49 = vpop.f32.mrb[6].mxu1  ;;  %v15209_v32 = vpop.f32.mrb[7].mxu0  ;;  %v16974_v52 = vld [vmem:[#allocation14_spill] sm:$0xff]  ;;  %v16975_v38 = vand.u32 4294901760, %v14909_v31  ;;  %v16982_v31 = vand.u32 4294901760, %v14931_v33 }
 0x26b   : > { %16961 = vst [vmem:[#allocation31_spill] sm:$0xff] %v15207_v49  ;;  %16962 = vst [vmem:[#allocation32_spill] sm:$0xff] %v15209_v32  ;;  %11894 = vmatpush1.bf16.msra.mxu1 %v11893_v6  ;;  %11824 = vmatprep.subr.bf16.mxu0 %v11823_v41  ;;  %v15215_v2 = vpop.f32.mrb[7].mxu1  ;;  %v16976_v6 = vand.u32 4294901760, %v14911_v40  ;;  %v16983_v40 = vand.u32 4294901760, %v16959_v10  ;;  %v16988_v33 = vld [vmem:[#allocation6_spill] sm:$0xff] }
 0x26c   : > { %16963 = vst [vmem:[#allocation33_spill] sm:$0xff] %v15215_v2  ;;  %11896 = vmatprep.subr.bf16.mxu1 %v11895_v55  ;;  %8277 = vmatprep.mubr.f32.mxu0 %v16541_v21  ;;  %v16977_v55 = vand.u32 4294901760, %v14915_v23  ;;  %v16985_v23 = vand.u32 4294901760, %v14948_v60  ;;  %v16990_v60 = vand.u32 4294901760, %v14969_v5  ;;  %v16995_v5 = vand.u32 4294901760, %v14997_v11  ;;  %v327_v2 = vld [vmem:[%s12470_s30 + $0x4e8] sm:$0xff] }
 0x26d   : > { %8898 = vmatprep.mubr.f32.mxu1 %v16541_v21  ;;  %v11843_v41 = vpack.c.bf16 %v16976_v6, %v16975_v38  ;;  %v11917_v38 = vpack.c.bf16 %v16983_v40, %v16982_v31  ;;  %v16984_v6 = vand.u32 4294901760, %v14942_v26  ;;  %v16989_v26 = vand.u32 4294901760, %v14967_v53  ;;  %v201_v31 = vld [vmem:[%s12470_s30 + $0xf8] sm:$0xff]  ;;  %v390_v32 = vld [vmem:[%s12470_s30 + $0x6e0] sm:$0x3f] }
 0x26e   : > { %11826 = vmatpush1.bf16.msra.mxu0 %v11825_v56  ;;  %v16978_v56 = vand.u32 4294901760, %v14921_v57  ;;  %v233_v53 = vld [vmem:[%s12470_s30 + $0x1f8] sm:$0xff]  ;;  %v16996_v40 = vand.u32 4294901760, %v15009_v50 }
 0x26f   : > { %11898 = vmatpush1.bf16.msra.mxu1 %v11897_v18  ;;  %11828 = vmatprep.subr.bf16.mxu0 %v11827_v46  ;;  %v16979_v46 = vand.u32 4294901760, %v14923_v1  ;;  %v11847_v57 = vpack.c.bf16 %v16985_v23, %v16984_v6  ;;  %v16986_v1 = vand.u32 4294901760, %v14952_v14  ;;  %v11849_v10 = vpack.c.bf16 %v16990_v60, %v16989_v26  ;;  %v230_v6 = vld [vmem:[%s12470_s30 + $0x1e0] sm:$0xff] }
 0x270   : > { %11900 = vmatprep.subr.bf16.mxu1 %v11899_v12  ;;  %v11915_v18 = vpack.c.bf16 %v16978_v56, %v16977_v55  ;;  %v16980_v12 = vand.u32 4294901760, %v14927_v58  ;;  %v16987_v58 = vand.u32 4294901760, %v14956_v29  ;;  %v199_v56 = vld [vmem:[%s12470_s30 + $0xe8] sm:$0xff]  ;;  %v16991_v14 = vand.u32 4294901760, %v14977_v16 }
 0x271   : > { %v16992_v29 = vand.u32 4294901760, %v14979_v19  ;;  %v16997_v16 = vand.u32 4294901760, %v15016_v17  ;;  %v16998_v19 = vand.u32 4294901760, %v15018_v36  ;;  %v9195_v11 = vand.u32 4294901760, %v199_v56 }
 0x272   : > { %11830 = vmatpush1.bf16.msra.mxu0 %v11829_v20  ;;  %v11845_v20 = vpack.c.bf16 %v16980_v12, %v16979_v46  ;;  %v11919_v55 = vpack.c.bf16 %v16987_v58, %v16986_v1  ;;  %v16994_v46 = vand.u32 4294901760, %v14988_v47  ;;  %v198_v47 = vld [vmem:[%s12470_s30 + $0xe0] sm:$0xff]  ;;  %v9816_v23 = vand.u32 4294901760, %v201_v31  ;;  %v200_v58 = vld [vmem:[%s12470_s30 + $0xf0] sm:$0xff] }
 0x273   : > { %11902 = vmatpush1.bf16.msra.mxu1 %v11901_v30  ;;  %8223 = vmatprep.subr.mxu0 %v15140_v24  ;;  %v16981_v30 = vld [vmem:[#allocation30_spill] sm:$0xff]  ;;  %v16999_v17 = vand.u32 4294901760, %v15060_v28  ;;  %v17000_v36 = vand.u32 4294901760, %v15062_v63  ;;  %v9197_v26 = vand.u32 4294901760, %v198_v47  ;;  %v9201_v60 = vand.u32 4294901760, %v230_v6 }
 0x274   : > { %8844 = vmatprep.subr.mxu1 %v15152_v42  ;;  %v9818_v28 = vand.u32 4294901760, %v200_v58  ;;  %v17002_v42 = vand.u32 4294901760, %v15085_v54 }
 0x275   : > { %v11925_v1 = vpack.c.bf16 %v17000_v36, %v16999_v17  ;;  %v15327_v17 = vsub.f32 %v201_v31, %v9816_v23  ;;  %v15329_v36 = vpack.c.bf16 %v9201_v60, %v9197_v26 }
 0x276   : > { %8226 = vmatpush1.msra.mxu0 %v15085_v54  ;;  %v9826_v54 = vand.u32 4294901760, %v264_v4 }
 0x277   : > { %8847 = vmatpush1.msra.mxu1 %v15088_v51  ;;  %11832 = vmatprep.subr.bf16.mxu0 %v14901_v34 }
 0x278   : > { %11904 = vmatprep.subr.bf16.mxu1 %v14903_v22  ;;  %8280 = vmatmul.mubr.f32.vlgmr.msra.gmra.mrb[12].mxu0 %v16964_v43  ;;  %v15389_v49 = vsub.f32 %v264_v4, %v9826_v54 }
 0x279   : > { %11834 = vmatpush1.bf16.msra.mxu0 %v14917_v44  ;;  %8901 = vmatmul.mubr.f32.vlgmr.msra.gmra.mrb[12].mxu1 %v16964_v43 }
 0x27a   : > { %11906 = vmatpush1.bf16.msra.mxu1 %v16965_v62  ;;  %11836 = vmatprep.subr.bf16.mxu0 %v16966_v35 }
 0x27b   : > { %11908 = vmatprep.subr.bf16.mxu1 %v16967_v7  ;;  %8364 = vmatprep.mubr.f32.mxu0 %v16541_v21 }
 0x27c   : > { %8985 = vmatprep.mubr.f32.mxu1 %v16541_v21 }
 0x27d   : > { %11838 = vmatpush1.bf16.msra.mxu0 %v16968_v48 }
 0x27e   : > { %11910 = vmatpush1.bf16.msra.mxu1 %v16969_v0  ;;  %11840 = vmatprep.subr.bf16.mxu0 %v16970_v59 }
 0x27f   : > { %11912 = vmatprep.subr.bf16.mxu1 %v16971_v61 }
 0x281   : > { %11842 = vmatpush1.bf16.msra.mxu0 %v16972_v39 }
 0x282   : > { %11914 = vmatpush1.bf16.msra.mxu1 %v16973_v9  ;;  %8311 = vmatprep.subr.mxu0 %v16974_v52 }
 0x283   : > { %8932 = vmatprep.subr.mxu1 %v15065_v25 }
 0x285   : > { %8313 = vmatpush1.msra.mxu0 %v16981_v30 }
 0x286   : > { %8934 = vmatpush1.msra.mxu1 %v15072_v37  ;;  %11844 = vmatprep.subr.bf16.mxu0 %v11843_v41  ;;  %v11921_v41 = vpack.c.bf16 %v16992_v29, %v16991_v14  ;;  %v295_v14 = vld [vmem:[%s12470_s30 + $0x3e8] sm:$0xff]  ;;  %v265_v29 = vld [vmem:[%s12470_s30 + $0x2f8] sm:$0xff] }
 0x287   : > { %11916 = vmatprep.subr.bf16.mxu1 %v11915_v18  ;;  %8368 = vmatmul.mubr.f32.vlgmr.msra.gmra.mrb[12].mxu0 %v16988_v33  ;;  %v16993_v18 = vand.u32 4294901760, %v14982_v13  ;;  %v11853_v13 = vpack.c.bf16 %v16998_v19, %v16997_v16  ;;  %v9824_v8 = vand.u32 4294901760, %v265_v29 }
 0x288   : > { %11846 = vmatpush1.bf16.msra.mxu0 %v11845_v20  ;;  %8989 = vmatmul.mubr.f32.vlgmr.msra.gmra.mrb[12].mxu1 %v16988_v33  ;;  %v231_v20 = vld [vmem:[%s12470_s30 + $0x1e8] sm:$0xff] }
 0x289   : > { %11918 = vmatpush1.bf16.msra.mxu1 %v11917_v38  ;;  %11848 = vmatprep.subr.bf16.mxu0 %v11847_v57  ;;  %v11851_v12 = vpack.c.bf16 %v16994_v46, %v16993_v18  ;;  %v11923_v38 = vpack.c.bf16 %v16996_v40, %v16995_v5  ;;  %v9199_v50 = vand.u32 4294901760, %v231_v20  ;;  %v9820_v57 = vand.u32 4294901760, %v233_v53  ;;  %v297_v18 = vld [vmem:[%s12470_s30 + $0x3f8] sm:$0xff]  ;;  %v294_v5 = vld [vmem:[%s12470_s30 + $0x3e0] sm:$0xff] }
 0x28a   : > { %11920 = vmatprep.subr.bf16.mxu1 %v11919_v55  ;;  %8480 = vmatprep.mubr.f32.mxu0 %v16541_v21  ;;  %v232_v55 = vld [vmem:[%s12470_s30 + $0x1f0] sm:$0xff]  ;;  %v17001_v40 = vand.u32 4294901760, %v15140_v24 }
 0x28b   : > { %9101 = vmatprep.mubr.f32.mxu1 %v16541_v21  ;;  %v15313_v46 = vpack.c.bf16 %v9199_v50, %v9195_v11  ;;  %v9822_v63 = vand.u32 4294901760, %v232_v55  ;;  %v15323_v16 = vsub.f32 %v231_v20, %v9199_v50  ;;  %v296_v24 = vld [vmem:[%s12470_s30 + $0x3f0] sm:$0xff]  ;;  %v15343_v50 = vsub.f32 %v200_v58, %v9818_v28  ;;  %v329_v58 = vld [vmem:[%s12470_s30 + $0x4f8] sm:$0xff] }
 0x28c   : > { %11850 = vmatpush1.bf16.msra.mxu0 %v11849_v10  ;;  %v263_v10 = vld [vmem:[%s12470_s30 + $0x2e8] sm:$0xff] }
 0x28d   : > { %11922 = vmatpush1.bf16.msra.mxu1 %v11921_v41  ;;  %11852 = vmatprep.subr.bf16.mxu0 %v11851_v12  ;;  %v15315_v41 = vpack.c.bf16 %v9820_v57, %v9816_v23  ;;  %v262_v12 = vld [vmem:[%s12470_s30 + $0x2e0] sm:$0xff]  ;;  %v9203_v19 = vand.u32 4294901760, %v263_v10  ;;  %v15341_v31 = vpack.c.bf16 %v9822_v63, %v9818_v28  ;;  %v15345_v23 = vsub.f32 %v232_v55, %v9822_v63 }
 0x28e   : > { %11924 = vmatprep.subr.bf16.mxu1 %v11923_v38  ;;  %v15321_v38 = vsub.f32 %v199_v56, %v9195_v11  ;;  %v15335_v56 = vsub.f32 %v198_v47, %v9197_v26  ;;  %v9205_v20 = vand.u32 4294901760, %v262_v12  ;;  %v9209_v11 = vand.u32 4294901760, %v294_v5 }
 0x28f   : > { %17003 = vst [vmem:[#allocation20_spill] sm:$0xff] %v15341_v31  ;;  %17004 = vst [vmem:[#allocation10_spill] sm:$0xff] %v15345_v23  ;;  %v17005_v47 = vand.u32 4294901760, %v15088_v51  ;;  %v15354_v26 = vsub.f32 %v263_v10, %v9203_v19  ;;  %v9211_v63 = vand.u32 4294901760, %v327_v2 }
 0x290   : > { %11854 = vmatpush1.bf16.msra.mxu0 %v11853_v13  ;;  %v9207_v13 = vand.u32 4294901760, %v295_v14  ;;  %v15370_v28 = vpack.c.bf16 %v9209_v11, %v9205_v20 }
 0x291   : > { %11926 = vmatpush1.bf16.msra.mxu1 %v11925_v1  ;;  %8425 = vmatprep.subr.mxu0 %v17001_v40  ;;  %v9828_v1 = vand.u32 4294901760, %v297_v18  ;;  %v15333_v40 = vsub.f32 %v233_v53, %v9820_v57  ;;  %v359_v53 = vld [vmem:[%s12470_s30 + $0x5e8] sm:$0xff]  ;;  %v17020_v43 = vand.u32 4294901760, %v15354_v26 }
 0x292   : > { %9046 = vmatprep.subr.mxu1 %v8738_v27  ;;  %v15339_v27 = vsub.f32 %v230_v6, %v9201_v60  ;;  %v15352_v57 = vpack.c.bf16 %v9207_v13, %v9203_v19  ;;  %v9830_v6 = vand.u32 4294901760, %v296_v24  ;;  %v361_v60 = vld [vmem:[%s12470_s30 + $0x5f8] sm:$0xff]  ;;  %v15360_v55 = vsub.f32 %v295_v14, %v9207_v13  ;;  %17008 = vst [vmem:[#allocation13_spill] sm:$0xff] %v15370_v28  ;;  %v326_v19 = vld [vmem:[%s12470_s30 + $0x4e0] sm:$0xff]  ;;  %v15375_v14 = vld [vmem:[%s12470_s30 + $0x4f0] sm:$0xff] }
 0x293   : > { %v15362_v51 = vpack.c.bf16 %v9828_v1, %v9824_v8  ;;  %v15368_v10 = vsub.f32 %v297_v18, %v9828_v1  ;;  %v9836_v13 = vand.u32 4294901760, %v361_v60  ;;  %v360_v18 = vld [vmem:[%s12470_s30 + $0x5f0] sm:$0xff]  ;;  %v391_v1 = vld [vmem:[%s12470_s30 + $0x6e8] sm:$0x3f] }
 0x294   : > { %8429 = vmatpush1.msra.mxu0 %v17002_v42  ;;  %17006 = vst [vmem:[#allocation11_spill] sm:$0xff] %v15352_v57  ;;  %v358_v42 = vld [vmem:[%s12470_s30 + $0x5e0] sm:$0xff]  ;;  %v9838_v4 = vand.u32 4294901760, %v360_v18 }
 0x295   : > { %9050 = vmatpush1.msra.mxu1 %v17005_v47  ;;  %11856 = vmatprep.subr.bf16.mxu0 %v14901_v34  ;;  %17007 = vst [vmem:[#allocation12_spill] sm:$0xff] %v15362_v51  ;;  %v15364_v34 = vsub.f32 %v265_v29, %v9824_v8  ;;  %v15379_v8 = vsub.f32 %v262_v12, %v9205_v20  ;;  %v9832_v29 = vand.u32 4294901760, %v329_v58  ;;  %v9213_v12 = vand.u32 4294901760, %v326_v19 }
 0x296   : > { %11928 = vmatprep.subr.bf16.mxu1 %v14903_v22  ;;  %8482 = vmatmul.mubr.f32.vlgmr.msra.gmra.mrb[12].mxu0 %v12462_v3  ;;  %v9215_v22 = vand.u32 4294901760, %v359_v53  ;;  %v15387_v47 = vpack.c.bf16 %v9830_v6, %v9826_v54  ;;  %v9834_v20 = vand.u32 4294901760, %v15375_v14  ;;  %v15421_v45 = vsub.f32 %v361_v60, %v9836_v13 }
 0x297   : > { %11858 = vmatpush1.bf16.msra.mxu0 %v14917_v44  ;;  %9103 = vmatmul.mubr.f32.vlgmr.msra.gmra.mrb[12].mxu1 %v12462_v3  ;;  %v15381_v44 = vsub.f32 %v294_v5, %v9209_v11  ;;  %v9217_v5 = vand.u32 4294901760, %v358_v42  ;;  %v15409_v54 = vsub.f32 %v329_v58, %v9832_v29  ;;  %v490_v60 = vsel %vm404_vm1, %v390_v32, 0 }
 0x298   : > { %11930 = vmatpush1.bf16.msra.mxu1 %v16965_v62  ;;  %11860 = vmatprep.subr.bf16.mxu0 %v16966_v35  ;;  %17009 = vst [vmem:[#allocation15_spill] sm:$0xff] %v15387_v47  ;;  %v15391_v62 = vsub.f32 %v296_v24, %v9830_v6  ;;  %v15394_v35 = vsub.f32 %v327_v2, %v9211_v63  ;;  %v15403_v24 = vsel %vm404_vm1, %v391_v1, 0  ;;  %v393_v6 = vld [vmem:[%s12470_s30 + $0x6f8] sm:$0x3f] }
 0x299   : > { %11932 = vmatprep.subr.bf16.mxu1 %v16967_v7  ;;  %8566 = vmatprep.mubr.f32.mxu0 %v16541_v21  ;;  %v15398_v7 = vpack.c.bf16 %v9215_v22, %v9211_v63  ;;  %v15400_v11 = vsub.f32 %v359_v53, %v9215_v22  ;;  %v15407_v2 = vpack.c.bf16 %v9836_v13, %v9832_v29  ;;  %v392_v53 = vld [vmem:[%s12470_s30 + $0x6f0] sm:$0x3f]  ;;  %v16503_v22 = vand.u32 4294901760, %v15327_v17 }
 0x29a   : > { %9187 = vmatprep.mubr.f32.mxu1 %v16541_v21  ;;  %v15423_v58 = vpack.c.bf16 %v9217_v5, %v9213_v12  ;;  %v16506_v29 = vand.u32 4294901760, %v15343_v50  ;;  %v15430_v63 = vsub.f32 %v358_v42, %v9217_v5  ;;  %v15433_v1 = vand.u32 4294901760, %v15403_v24 }
 0x29b   : > { %11862 = vmatpush1.bf16.msra.mxu0 %v16968_v48  ;;  %17010 = vst [vmem:[#allocation16_spill] sm:$0xff] %v15398_v7  ;;  %17011 = vst [vmem:[#allocation22_spill] sm:$0xff] %v15407_v2  ;;  %v16507_v48 = vand.u32 4294901760, %v15345_v23  ;;  %v496_v13 = vsel %vm404_vm1, %v392_v53, 0  ;;  %v17015_v42 = vand.u32 4294901760, %v15323_v16  ;;  %v17017_v5 = vand.u32 4294901760, %v15335_v56 }
 0x29c   : > { %11934 = vmatpush1.bf16.msra.mxu1 %v16969_v0  ;;  %11864 = vmatprep.subr.bf16.mxu0 %v16970_v59  ;;  %v16504_v59 = vand.u32 4294901760, %v15339_v27  ;;  %17012 = vst [vmem:[#allocation26_spill] sm:$0xff] %v15423_v58  ;;  %17013 = vst [vmem:[#allocation14_spill] sm:$0xff] %v15433_v1  ;;  %v15436_v0 = vsel %vm404_vm1, %v393_v6, 0 }
 0x29d   : > { %11936 = vmatprep.subr.bf16.mxu1 %v16971_v61  ;;  %v15428_v61 = vsub.f32 %v326_v19, %v9213_v12  ;;  %v9300_v12 = vsub.f32 %v15323_v16, %v17015_v42  ;;  %v9294_v6 = vsub.f32 %v15335_v56, %v17017_v5  ;;  %v9927_v42 = vsub.f32 %v15345_v23, %v16507_v48 }
 0x29e   : > { %v9306_v53 = vsub.f32 %v15339_v27, %v16504_v59  ;;  %v15472_v5 = vsub.f32 %v15375_v14, %v9834_v20  ;;  %v15477_v59 = vand.u32 4294901760, %v15436_v0  ;;  %v15484_v48 = vand.u32 4294901760, %v496_v13 }
 0x29f   : > { %11866 = vmatpush1.bf16.msra.mxu0 %v16972_v39  ;;  %v17014_v39 = vand.u32 4294901760, %v15321_v38  ;;  %v9928_v33 = vand.u32 4294901760, %v9927_v42  ;;  %v9312_v23 = vsub.f32 %v15354_v26, %v17020_v43  ;;  %v16520_v42 = vand.u32 4294901760, %v15391_v62 }
 0x2a0   : > { %11938 = vmatpush1.bf16.msra.mxu1 %v16973_v9  ;;  %8513 = vmatprep.subr.mxu0 %v16974_v52  ;;  %v9909_v9 = vsub.f32 %v15327_v17, %v16503_v22  ;;  %v17016_v52 = vand.u32 4294901760, %v15333_v40  ;;  %v15474_v22 = vsub.f32 %v360_v18, %v9838_v4  ;;  %v17022_v43 = vand.u32 4294901760, %v15364_v34 }
 0x2a1   : > { %v9288_v19 = vsub.f32 %v15321_v38, %v17014_v39  ;;  %9134 = vmatprep.subr.mxu1 %v15065_v25  ;;  %v15461_v39 = vpack.c.bf16 %v9838_v4, %v9834_v20  ;;  %v9915_v25 = vsub.f32 %v15343_v50, %v16506_v29  ;;  %v15482_v29 = vand.u32 4294901760, %v490_v60 }
 0x2a2   : > { %v9921_v32 = vsub.f32 %v15333_v40, %v17016_v52  ;;  %v9910_v14 = vand.u32 4294901760, %v9909_v9  ;;  %v9295_v20 = vand.u32 4294901760, %v9294_v6  ;;  %v9307_v4 = vand.u32 4294901760, %v9306_v53 }
 0x2a3   : > { %17018 = vst [vmem:[#allocation30_spill] sm:$0xff] %v15461_v39  ;;  %8515 = vmatpush1.msra.mxu0 %v16981_v30  ;;  %17019 = vst [vmem:[#allocation34_spill] sm:$0xff] %v15482_v29  ;;  %v9289_v52 = vand.u32 4294901760, %v9288_v19  ;;  %v9301_v30 = vand.u32 4294901760, %v9300_v12  ;;  %v15497_v12 = vsub.f32 %v490_v60, %v15482_v29  ;;  %v15500_v9 = vsub.f32 %v496_v13, %v15484_v48 }
 0x2a4   : > { %9136 = vmatpush1.msra.mxu1 %v15072_v37  ;;  %8568 = vmatmul.mubr.f32.vlgmr.msra.gmra.mrb[12].mxu0 %v12462_v3  ;;  %v9922_v18 = vand.u32 4294901760, %v9921_v32  ;;  %v9916_v37 = vand.u32 4294901760, %v9915_v25  ;;  %v17021_v32 = vand.u32 4294901760, %v15360_v55  ;;  %v16517_v60 = vand.u32 4294901760, %v15389_v49 }
 0x2a5   : > { %9189 = vmatmul.mubr.f32.vlgmr.msra.gmra.mrb[12].mxu1 %v12462_v3  ;;  %11940 = vmatprep.subr.bf16.mxu0 %v15313_v46  ;;  %v11951_v13 = vpack.c.bf16 %v9301_v30, %v9289_v52  ;;  %v9933_v25 = vsub.f32 %v15364_v34, %v17022_v43  ;;  %v17023_v30 = vand.u32 4294901760, %v15368_v10  ;;  %v17028_v53 = vand.u32 4294901760, %v15421_v45 }
 0x2a6   : > { %12012 = vmatprep.subr.bf16.mxu1 %v15315_v41  ;;  %11942 = vmatpush1.bf16.msra.mxu0 %v15329_v36  ;;  %v9324_v6 = vsub.f32 %v15360_v55, %v17021_v32  ;;  %v12023_v19 = vpack.c.bf16 %v9922_v18, %v9910_v14  ;;  %v16521_v32 = vand.u32 4294901760, %v15394_v35 }
 0x2a7   : > { %12014 = vmatpush1.bf16.msra.mxu1 %v15341_v31  ;;  %11944 = vmatprep.subr.bf16.mxu0 %v15352_v57  ;;  %v12025_v57 = vpack.c.bf16 %v9928_v33, %v9916_v37  ;;  %v9313_v31 = vand.u32 4294901760, %v9312_v23  ;;  %v9945_v14 = vsub.f32 %v15368_v10, %v17023_v30  ;;  %v17024_v33 = vand.u32 4294901760, %v15379_v8 }
 0x2a8   : > { %12016 = vmatprep.subr.bf16.mxu1 %v15362_v51  ;;  %9273 = vmatprep.mubr.f32.mxu0 %v16541_v21  ;;  %v11953_v51 = vpack.c.bf16 %v9307_v4, %v9295_v20  ;;  %v9325_v52 = vand.u32 4294901760, %v9324_v6  ;;  %v17025_v20 = vand.u32 4294901760, %v15381_v44  ;;  %v9939_v37 = vsub.f32 %v15389_v49, %v16517_v60 }
 0x2a9   : > { %9894 = vmatprep.mubr.f32.mxu1 %v16541_v21  ;;  %v9318_v23 = vsub.f32 %v15379_v8, %v17024_v33  ;;  %v9951_v6 = vsub.f32 %v15391_v62, %v16520_v42  ;;  %v9336_v43 = vsub.f32 %v15394_v35, %v16521_v32  ;;  %v17026_v30 = vand.u32 4294901760, %v15400_v11 }
 0x2aa   : > { %11946 = vmatpush1.bf16.msra.mxu0 %v15370_v28  ;;  %v9330_v4 = vsub.f32 %v15381_v44, %v17025_v20  ;;  %v9934_v18 = vand.u32 4294901760, %v9933_v25  ;;  %v15552_v42 = vsub.f32 %v15403_v24, %v15433_v1  ;;  %v17027_v32 = vand.u32 4294901760, %v15409_v54 }
 0x2ab   : > { %12018 = vmatpush1.bf16.msra.mxu1 %v15387_v47  ;;  %11948 = vmatprep.subr.bf16.mxu0 %v15398_v7  ;;  %v9348_v33 = vsub.f32 %v15400_v11, %v17026_v30  ;;  %v9946_v30 = vand.u32 4294901760, %v9945_v14  ;;  %v9969_v25 = vsub.f32 %v15421_v45, %v17028_v53  ;;  %v9319_v24 = vand.u32 4294901760, %v9318_v23 }
 0x2ac   : > { %12020 = vmatprep.subr.bf16.mxu1 %v15407_v2  ;;  %v9957_v20 = vsub.f32 %v15409_v54, %v17027_v32  ;;  %v15564_v2 = vsub.f32 %v15436_v0, %v15477_v59  ;;  %v9331_v60 = vand.u32 4294901760, %v9330_v4  ;;  %v17029_v7 = vand.u32 4294901760, %v15428_v61 }
 0x2ad   : > { %v9349_v14 = vand.u32 4294901760, %v9348_v33  ;;  %v17030_v47 = vand.u32 4294901760, %v15430_v63  ;;  %v11955_v0 = vpack.c.bf16 %v9325_v52, %v9313_v31  ;;  %v17031_v28 = vand.u32 4294901760, %v15472_v5 }
 0x2ae   : > { %11950 = vmatpush1.bf16.msra.mxu0 %v15423_v58  ;;  %v9952_v58 = vand.u32 4294901760, %v9951_v6  ;;  %v9342_v32 = vsub.f32 %v15428_v61, %v17029_v7  ;;  %v17032_v4 = vand.u32 4294901760, %v15474_v22  ;;  %v12027_v7 = vpack.c.bf16 %v9946_v30, %v9934_v18 }
 0x2af   : > { %12022 = vmatpush1.bf16.msra.mxu1 %v15461_v39  ;;  %9220 = vmatprep.subr.mxu0 %v15433_v1  ;;  %v9940_v39 = vand.u32 4294901760, %v9939_v37  ;;  %v9337_v1 = vand.u32 4294901760, %v9336_v43  ;;  %v9354_v53 = vsub.f32 %v15430_v63, %v17030_v47  ;;  %v9963_v23 = vsub.f32 %v15472_v5, %v17031_v28 }
 0x2b0   : > { %9841 = vmatprep.subr.mxu1 %v15477_v59  ;;  %v9975_v37 = vsub.f32 %v15474_v22, %v17032_v4  ;;  %v9958_v43 = vand.u32 4294901760, %v9957_v20  ;;  %v9970_v33 = vand.u32 4294901760, %v9969_v25  ;;  %v9980_v47 = vand.u32 4294901760, %v15564_v2 }
 0x2b1   : > { %v11957_v31 = vpack.c.bf16 %v9331_v60, %v9319_v24  ;;  %v12029_v52 = vpack.c.bf16 %v9952_v58, %v9940_v39  ;;  %v11959_v28 = vpack.c.bf16 %v9349_v14, %v9337_v1  ;;  %v9343_v4 = vand.u32 4294901760, %v9342_v32 }
 0x2b2   : > { %9222 = vmatpush1.msra.mxu0 %v15482_v29  ;;  %v9355_v29 = vand.u32 4294901760, %v9354_v53  ;;  %v9365_v6 = vand.u32 4294901760, %v15497_v12  ;;  %v9976_v18 = vand.u32 4294901760, %v9975_v37  ;;  %v17033_v20 = vand.u32 4294901760, %v15552_v42 }
 0x2b3   : > { %9843 = vmatpush1.msra.mxu1 %v15484_v48  ;;  %11952 = vmatprep.subr.bf16.mxu0 %v11951_v13  ;;  %v9964_v13 = vand.u32 4294901760, %v9963_v23  ;;  %v9986_v30 = vand.u32 4294901760, %v15500_v9  ;;  %v12031_v58 = vpack.c.bf16 %v9970_v33, %v9958_v43  ;;  %v12035_v32 = vpack.c.bf16 %v15333_v40, %v15327_v17 }
 0x2b4   : > { %12024 = vmatprep.subr.bf16.mxu1 %v12023_v19  ;;  %9279 = vmatmul.mubr.f32.vlgmr.msra.gmra.mrb[14].mxu0 %v16595_v15  ;;  %v9360_v19 = vsub.f32 %v15552_v42, %v17033_v20  ;;  %v11965_v53 = vpack.c.bf16 %v15339_v27, %v15335_v56  ;;  %v11967_v37 = vpack.c.bf16 %v15360_v55, %v15354_v26 }
 0x2b5   : > { %11954 = vmatpush1.bf16.msra.mxu0 %v11953_v51  ;;  %9900 = vmatmul.mubr.f32.vlgmr.msra.gmra.mrb[14].mxu1 %v16595_v15  ;;  %v9981_v15 = vsub.f32 %v15564_v2, %v9980_v47  ;;  %v9366_v51 = vsub.f32 %v15497_v12, %v9365_v6  ;;  %v12033_v1 = vpack.c.bf16 %v9976_v18, %v9964_v13 }
 0x2b6   : > { %12026 = vmatpush1.bf16.msra.mxu1 %v12025_v57  ;;  %11956 = vmatprep.subr.bf16.mxu0 %v11955_v0  ;;  %v11961_v57 = vpack.c.bf16 %v9355_v29, %v9343_v4  ;;  %v9361_v39 = vand.u32 4294901760, %v9360_v19  ;;  %v9987_v60 = vsub.f32 %v15500_v9, %v9986_v30  ;;  %v11963_v29 = vpack.c.bf16 %v15323_v16, %v15321_v38  ;;  %v17034_v0 = vld [vmem:[#allocation10_spill] sm:$0xff] }
 0x2b7   : > { %12028 = vmatprep.subr.bf16.mxu1 %v12027_v7  ;;  %9419 = vmatprep.mubr.f32.mxu0 %v16541_v21  ;;  %v9982_v25 = vand.u32 4294901760, %v9981_v15  ;;  %v9367_v24 = vand.u32 4294901760, %v9366_v51  ;;  %v12037_v23 = vpack.c.bf16 %v17034_v0, %v15343_v50  ;;  %v12039_v7 = vpack.c.bf16 %v15368_v10, %v15364_v34  ;;  %v17036_v15 = vld [vmem:[#allocation20_spill] sm:$0xff] }
 0x2b8   : > { %10040 = vmatprep.mubr.f32.mxu1 %v16541_v21  ;;  %v9988_v14 = vand.u32 4294901760, %v9987_v60  ;;  %v11969_v33 = vpack.c.bf16 %v15381_v44, %v15379_v8  ;;  %v11971_v4 = vpack.c.bf16 %v15400_v11, %v15394_v35  ;;  %v12043_v18 = vpack.c.bf16 %v15421_v45, %v15409_v54  ;;  %v17038_v51 = vld [vmem:[#allocation12_spill] sm:$0xff] }
 0x2b9   : > { %11958 = vmatpush1.bf16.msra.mxu0 %v11957_v31  ;;  %v11973_v20 = vpack.c.bf16 %v15430_v63, %v15428_v61  ;;  %v12045_v19 = vpack.c.bf16 %v15474_v22, %v15472_v5  ;;  %v17041_v60 = vld [vmem:[#allocation16_spill] sm:$0xff] }
 0x2ba   : > { %12030 = vmatpush1.bf16.msra.mxu1 %v12029_v52  ;;  %11960 = vmatprep.subr.bf16.mxu0 %v11959_v28  ;;  %v12041_v28 = vpack.c.bf16 %v15391_v62, %v15389_v49 }
 0x2bb   : > { %12032 = vmatprep.subr.bf16.mxu1 %v12031_v58  ;;  %v17035_v58 = vld [vmem:[#allocation5_spill] sm:$0xff] }
 0x2bd   : > { %11962 = vmatpush1.bf16.msra.mxu0 %v11961_v57  ;;  %v17037_v57 = vld [vmem:[#allocation11_spill] sm:$0xff] }
 0x2be   : > { %12034 = vmatpush1.bf16.msra.mxu1 %v12033_v1  ;;  %9362 = vmatprep.subr.mxu0 %v9361_v39  ;;  %v17039_v1 = vld [vmem:[#allocation13_spill] sm:$0xff]  ;;  %v17040_v39 = vld [vmem:[#allocation15_spill] sm:$0xff] }
 0x2bf   : > { %9983 = vmatprep.subr.mxu1 %v9982_v25  ;;  %v17042_v25 = vld [vmem:[#allocation22_spill] sm:$0xff] }
 0x2c1   : > { %9368 = vmatpush1.msra.mxu0 %v9367_v24  ;;  %v17043_v24 = vld [vmem:[#allocation26_spill] sm:$0xff] }
 0x2c2   : > { %9989 = vmatpush1.msra.mxu1 %v9988_v14  ;;  %11964 = vmatprep.subr.bf16.mxu0 %v11963_v29  ;;  %v17044_v14 = vld [vmem:[#allocation30_spill] sm:$0xff] }
 0x2c3   : > { %12036 = vmatprep.subr.bf16.mxu1 %v12035_v32  ;;  %9421 = vmatmul.mubr.f32.vlgmr.msra.gmra.mrb[14].mxu0 %v12462_v3  ;;  %v15614_v43 = vpop.f32.mrb[8].mxu0  ;;  %v17045_v29 = vld [vmem:[#allocation14_spill] sm:$0xff]  ;;  %v17046_v32 = vand.u32 4294901760, %v15321_v38  ;;  %v17054_v38 = vand.u32 4294901760, %v17034_v0  ;;  %v17062_v0 = vand.u32 4294901760, %v15389_v49  ;;  %v17068_v49 = vand.u32 4294901760, %v15428_v61 }
 0x2c4   : > { %11966 = vmatpush1.bf16.msra.mxu0 %v11965_v53  ;;  %10042 = vmatmul.mubr.f32.vlgmr.msra.gmra.mrb[14].mxu1 %v12462_v3  ;;  %v15619_v31 = vpop.f32.mrb[8].mxu1  ;;  %v15621_v52 = vpop.f32.mrb[9].mxu0  ;;  %v17047_v53 = vand.u32 4294901760, %v15323_v16 }
 0x2c5   : > { %12038 = vmatpush1.bf16.msra.mxu1 %v12037_v23  ;;  %11968 = vmatprep.subr.bf16.mxu0 %v11967_v37  ;;  %v15627_v13 = vpop.f32.mrb[9].mxu1  ;;  %v17048_v37 = vand.u32 4294901760, %v15327_v17 }
 0x2c6   : > { %12040 = vmatprep.subr.bf16.mxu1 %v12039_v7  ;;  %9519 = vmatprep.mubr.f32.mxu0 %v16541_v21  ;;  %v11987_v23 = vpack.c.bf16 %v17047_v53, %v17046_v32  ;;  %v17049_v7 = vand.u32 4294901760, %v15333_v40  ;;  %v17056_v32 = vand.u32 4294901760, %v15360_v55  ;;  %v17057_v40 = vand.u32 4294901760, %v15364_v34  ;;  %v17059_v53 = vld [vmem:[#allocation6_spill] sm:$0xff] }
 0x2c7   : > { %10140 = vmatprep.mubr.f32.mxu1 %v16541_v21  ;;  %v17063_v34 = vand.u32 4294901760, %v15391_v62 }
 0x2c8   : > { %11970 = vmatpush1.bf16.msra.mxu0 %v11969_v33  ;;  %v12059_v33 = vpack.c.bf16 %v17049_v7, %v17048_v37  ;;  %v17065_v37 = vand.u32 4294901760, %v15400_v11  ;;  %v17071_v11 = vand.u32 4294901760, %v15474_v22 }
 0x2c9   : > { %12042 = vmatpush1.bf16.msra.mxu1 %v12041_v28  ;;  %11972 = vmatprep.subr.bf16.mxu0 %v11971_v4  ;;  %v17050_v28 = vand.u32 4294901760, %v15335_v56  ;;  %v17051_v4 = vand.u32 4294901760, %v15339_v27  ;;  %v17058_v56 = vand.u32 4294901760, %v15368_v10  ;;  %v17064_v10 = vand.u32 4294901760, %v15394_v35 }
 0x2ca   : > { %12044 = vmatprep.subr.bf16.mxu1 %v12043_v18  ;;  %v17070_v35 = vand.u32 4294901760, %v15472_v5 }
 0x2cb   : > { %v11989_v18 = vpack.c.bf16 %v17051_v4, %v17050_v28  ;;  %v12063_v27 = vpack.c.bf16 %v17058_v56, %v17057_v40  ;;  %v11995_v7 = vpack.c.bf16 %v17065_v37, %v17064_v10  ;;  %v17079_v40 = vld [vmem:[#allocation23_spill] sm:$0xff] }
 0x2cc   : > { %11974 = vmatpush1.bf16.msra.mxu0 %v11973_v20  ;;  %v17052_v20 = vld [vmem:[#allocation34_spill] sm:$0xff]  ;;  %v17081_v10 = vld [vmem:[#allocation7_spill] sm:$0xff] }
 0x2cd   : > { %12046 = vmatpush1.bf16.msra.mxu1 %v12045_v19  ;;  %9465 = vmatprep.subr.mxu0 %v15552_v42  ;;  %v17053_v19 = vand.u32 4294901760, %v15343_v50  ;;  %v17060_v50 = vand.u32 4294901760, %v15379_v8  ;;  %v17067_v8 = vand.u32 4294901760, %v15421_v45  ;;  %v17072_v45 = vand.u32 4294901760, %v15552_v42 }
 0x2ce   : > { %10086 = vmatprep.subr.mxu1 %v15564_v2  ;;  %v15751_v2 = vpop.permute.xlu0 %397 }
 0x2cf   : > { %v12061_v16 = vpack.c.bf16 %v17054_v38, %v17053_v19  ;;  %v12089_v56 = vadd.f32 %v17079_v40, %v15751_v2  ;;  %v12091_v37 = vadd.f32 %v17081_v10, %v15751_v2 }
 0x2d0   : > { %9468 = vmatpush1.msra.mxu0 %v15497_v12 }
 0x2d1   : > { %10089 = vmatpush1.msra.mxu1 %v15500_v9  ;;  %11976 = vmatprep.subr.bf16.mxu0 %v15313_v46  ;;  %vm10443_vm9 = vcmp.ge.f32.partialorder %v12089_v56, 0.0  ;;  %vm10445_vm11 = vcmp.ge.f32.partialorder %v12091_v37, 0.0 }
 0x2d2   : > { %12048 = vmatprep.subr.bf16.mxu1 %v15315_v41  ;;  %9522 = vmatmul.mubr.f32.vlgmr.msra.gmra.mrb[14].mxu0 %v17035_v58 }
 0x2d3   : > { %11978 = vmatpush1.bf16.msra.mxu0 %v15329_v36  ;;  %10143 = vmatmul.mubr.f32.vlgmr.msra.gmra.mrb[14].mxu1 %v17035_v58  ;;  %v17055_v58 = vand.u32 4294901760, %v15354_v26  ;;  %v17061_v26 = vand.u32 4294901760, %v15381_v44  ;;  %v17069_v44 = vand.u32 4294901760, %v15430_v63  ;;  %v17073_v63 = vld [vmem:[#allocation18_spill] sm:$0xff] }
 0x2d4   : > { %12050 = vmatpush1.bf16.msra.mxu1 %v17036_v15  ;;  %11980 = vmatprep.subr.bf16.mxu0 %v17037_v57  ;;  %v12083_v22 = vadd.f32 %v17073_v63, %v15751_v2 }
 0x2d5   : > { %12052 = vmatprep.subr.bf16.mxu1 %v17038_v51  ;;  %9606 = vmatprep.mubr.f32.mxu0 %v16541_v21  ;;  %v11991_v17 = vpack.c.bf16 %v17056_v32, %v17055_v58  ;;  %v11993_v55 = vpack.c.bf16 %v17061_v26, %v17060_v50  ;;  %v11997_v62 = vpack.c.bf16 %v17069_v44, %v17068_v49  ;;  %v10477_v49 = vmul.f32 0.01, %v12091_v37  ;;  %v17082_v44 = vld [vmem:[#allocation28_spill] sm:$0xff] }
 0x2d6   : > { %10227 = vmatprep.mubr.f32.mxu1 %v16541_v21  ;;  %v10469_v61 = vmul.f32 0.01, %v12083_v22  ;;  %vm10437_vm2 = vcmp.ge.f32.partialorder %v12083_v22, 0.0 }
 0x2d7   : > { %11982 = vmatpush1.bf16.msra.mxu0 %v17039_v1 }
 0x2d8   : > { %12054 = vmatpush1.bf16.msra.mxu1 %v17040_v39  ;;  %11984 = vmatprep.subr.bf16.mxu0 %v17041_v60  ;;  %v15759_v9 = vsel %vm10437_vm2, %v12083_v22, %v10469_v61  ;;  %v17083_v22 = vld [vmem:[#allocation27_spill] sm:$0xff] }
 0x2d9   : > { %12056 = vmatprep.subr.bf16.mxu1 %v17042_v25 }
 0x2db   : > { %11986 = vmatpush1.bf16.msra.mxu0 %v17043_v24 }
 0x2dc   : > { %12058 = vmatpush1.bf16.msra.mxu1 %v17044_v14  ;;  %9553 = vmatprep.subr.mxu0 %v17045_v29 }
 0x2dd   : > { %10174 = vmatprep.subr.mxu1 %v15477_v59 }
 0x2df   : > { %9555 = vmatpush1.msra.mxu0 %v17052_v20 }
 0x2e0   : > { %10176 = vmatpush1.msra.mxu1 %v15484_v48  ;;  %11988 = vmatprep.subr.bf16.mxu0 %v11987_v23  ;;  %v12065_v23 = vpack.c.bf16 %v17063_v34, %v17062_v0 }
 0x2e1   : > { %12060 = vmatprep.subr.bf16.mxu1 %v12059_v33  ;;  %9610 = vmatmul.mubr.f32.vlgmr.msra.gmra.mrb[14].mxu0 %v17059_v53  ;;  %v17066_v33 = vand.u32 4294901760, %v15409_v54  ;;  %v12069_v54 = vpack.c.bf16 %v17071_v11, %v17070_v35 }
 0x2e2   : > { %11990 = vmatpush1.bf16.msra.mxu0 %v11989_v18  ;;  %10231 = vmatmul.mubr.f32.vlgmr.msra.gmra.mrb[14].mxu1 %v17059_v53 }
 0x2e3   : > { %12062 = vmatpush1.bf16.msra.mxu1 %v12061_v16  ;;  %11992 = vmatprep.subr.bf16.mxu0 %v11991_v17  ;;  %v12067_v28 = vpack.c.bf16 %v17067_v8, %v17066_v33 }
 0x2e4   : > { %12064 = vmatprep.subr.bf16.mxu1 %v12063_v27  ;;  %9722 = vmatprep.mubr.f32.mxu0 %v16541_v21 }
 0x2e5   : > { %10343 = vmatprep.mubr.f32.mxu1 %v16541_v21 }
 0x2e6   : > { %11994 = vmatpush1.bf16.msra.mxu0 %v11993_v55  ;;  %v17080_v55 = vld [vmem:[#allocation25_spill] sm:$0xff] }
 0x2e7   : > { %12066 = vmatpush1.bf16.msra.mxu1 %v12065_v23  ;;  %11996 = vmatprep.subr.bf16.mxu0 %v11995_v7  ;;  %v12090_v0 = vadd.f32 %v17080_v55, %v15751_v2  ;;  %v10475_v23 = vmul.f32 0.01, %v12089_v56 }
 0x2e8   : > { %12068 = vmatprep.subr.bf16.mxu1 %v12067_v28 }
 0x2e9   : > { %v10476_v33 = vmul.f32 0.01, %v12090_v0  ;;  %v15803_v8 = vsel %vm10443_vm9, %v12089_v56, %v10475_v23  ;;  %vm10444_vm10 = vcmp.ge.f32.partialorder %v12090_v0, 0.0  ;;  %v17088_v23 = vld [vmem:[#allocation33_spill] sm:$0xff] }
 0x2ea   : > { %11998 = vmatpush1.bf16.msra.mxu0 %v11997_v62  ;;  %v12092_v62 = vadd.f32 %v17082_v44, %v15751_v2  ;;  %v10545_v35 = vsel %vm10533_vm4, %v15803_v8, 0.0  ;;  %v12098_v10 = vadd.f32 %v17088_v23, %v15751_v2 }
 0x2eb   : > { %12070 = vmatpush1.bf16.msra.mxu1 %v12069_v54  ;;  %9667 = vmatprep.subr.mxu0 %v17072_v45  ;;  %v15809_v11 = vsel %vm10444_vm10, %v12090_v0, %v10476_v33  ;;  %v15811_v45 = vsel %vm10445_vm11, %v12091_v37, %v10477_v49  ;;  %v12099_v33 = vadd.f32 %v15614_v43, %v15751_v2 }
 0x2ec   : > { %10288 = vmatprep.subr.mxu1 %v9980_v47  ;;  %v10478_v63 = vmul.f32 0.01, %v12092_v62  ;;  %vm10446_vm12 = vcmp.ge.f32.partialorder %v12092_v62, 0.0  ;;  %v10549_v61 = vsel %vm10533_vm4, %v15811_v45, 0.0  ;;  %v10484_v49 = vmul.f32 0.01, %v12098_v10 }
 0x2ed   : > { %vm10452_vm2 = vcmp.ge.f32.partialorder %v12098_v10, 0.0 }
 0x2ee   : > { %9671 = vmatpush1.msra.mxu0 %v9365_v6  ;;  %v17076_v6 = vld [vmem:[#allocation21_spill] sm:$0xff] }
 0x2ef   : > { %10292 = vmatpush1.msra.mxu1 %v9986_v30  ;;  %12000 = vmatprep.subr.bf16.mxu0 %v15313_v46  ;;  %v12086_v47 = vadd.f32 %v17076_v6, %v15751_v2 }
 0x2f0   : > { %12072 = vmatprep.subr.bf16.mxu1 %v15315_v41  ;;  %9724 = vmatmul.mubr.f32.vlgmr.msra.gmra.mrb[14].mxu0 %v12462_v3 }
 0x2f1   : > { %12002 = vmatpush1.bf16.msra.mxu0 %v15329_v36  ;;  %10345 = vmatmul.mubr.f32.vlgmr.msra.gmra.mrb[14].mxu1 %v12462_v3  ;;  %vm10440_vm6 = vcmp.ge.f32.partialorder %v12086_v47, 0.0 }
 0x2f2   : > { %12074 = vmatpush1.bf16.msra.mxu1 %v17036_v15  ;;  %12004 = vmatprep.subr.bf16.mxu0 %v17037_v57  ;;  %v17077_v15 = vld [vmem:[#allocation8_spill] sm:$0xff] }
 0x2f3   : > { %12076 = vmatprep.subr.bf16.mxu1 %v17038_v51  ;;  %9808 = vmatprep.mubr.f32.mxu0 %v16541_v21  ;;  %v12087_v57 = vadd.f32 %v17077_v15, %v15751_v2  ;;  %v10534_v51 = vsel %vm10533_vm4, %v15759_v9, 0.0  ;;  %v17085_v15 = vld [vmem:[#allocation9_spill] sm:$0xff] }
 0x2f4   : > { %10429 = vmatprep.mubr.f32.mxu1 %v16541_v21 }
 0x2f5   : > { %12006 = vmatpush1.bf16.msra.mxu0 %v17039_v1  ;;  %v10473_v18 = vmul.f32 0.01, %v12087_v57  ;;  %vm10441_vm7 = vcmp.ge.f32.partialorder %v12087_v57, 0.0 }
 0x2f6   : > { %12078 = vmatpush1.bf16.msra.mxu1 %v17040_v39  ;;  %12008 = vmatprep.subr.bf16.mxu0 %v17041_v60 }
 0x2f7   : > { %12080 = vmatprep.subr.bf16.mxu1 %v17042_v25  ;;  %v15787_v32 = vsel %vm10441_vm7, %v12087_v57, %v10473_v18  ;;  %v12095_v57 = vadd.f32 %v17085_v15, %v15751_v2 }
 0x2f8   : > { %v10541_v53 = vsel %vm10533_vm4, %v15787_v32, 0.0 }
 0x2f9   : > { %12010 = vmatpush1.bf16.msra.mxu0 %v17043_v24  ;;  %v10472_v24 = vmul.f32 0.01, %v12086_v47  ;;  %v10481_v18 = vmul.f32 0.01, %v12095_v57  ;;  %vm10449_vm15 = vcmp.ge.f32.partialorder %v12095_v57, 0.0 }
 0x2fa   : > { %12082 = vmatpush1.bf16.msra.mxu1 %v17044_v14  ;;  %9755 = vmatprep.subr.mxu0 %v17045_v29 }
 0x2fb   : > { %10376 = vmatprep.subr.mxu1 %v15477_v59  ;;  %v17074_v59 = vld [vmem:[#allocation19_spill] sm:$0xff]  ;;  %v15785_v16 = vsel %vm10440_vm6, %v12086_v47, %v10472_v24  ;;  %v15835_v40 = vsel %vm10449_vm15, %v12095_v57, %v10481_v18 }
 0x2fc   : > { %v10539_v27 = vsel %vm10533_vm4, %v15785_v16, 0.0  ;;  %v10557_v55 = vsel %vm10533_vm4, %v15835_v40, 0.0 }
 0x2fd   : > { %9757 = vmatpush1.msra.mxu0 %v17052_v20  ;;  %v17078_v20 = vld [vmem:[#allocation24_spill] sm:$0xff] }
 0x2fe   : > { %10378 = vmatpush1.msra.mxu1 %v15484_v48  ;;  %9810 = vmatmul.mubr.f32.vlgmr.msra.gmra.mrb[14].mxu0 %v12462_v3  ;;  %v12084_v48 = vadd.f32 %v17074_v59, %v15751_v2  ;;  %v12088_v19 = vadd.f32 %v17078_v20, %v15751_v2  ;;  %v12093_v59 = vadd.f32 %v17083_v22, %v15751_v2  ;;  %v17086_v20 = vld [vmem:[#allocation32_spill] sm:$0xff] }
 0x2ff   : > { %10431 = vmatmul.mubr.f32.vlgmr.msra.gmra.mrb[14].mxu1 %v12462_v3  ;;  %v17075_v3 = vld [vmem:[#allocation17_spill] sm:$0xff]  ;;  %v15857_v22 = vsel %vm10452_vm2, %v12098_v10, %v10484_v49 }
 0x300   : > { %v10470_v5 = vmul.f32 0.01, %v12084_v48  ;;  %vm10438_vm3 = vcmp.ge.f32.partialorder %v12084_v48, 0.0  ;;  %v12085_v12 = vadd.f32 %v17075_v3, %v15751_v2  ;;  %v10474_v17 = vmul.f32 0.01, %v12088_v19 }
 0x301   : > { %vm10442_vm8 = vcmp.ge.f32.partialorder %v12088_v19, 0.0  ;;  %v15819_v3 = vsel %vm10446_vm12, %v12092_v62, %v10478_v63  ;;  %vm10447_vm13 = vcmp.ge.f32.partialorder %v12093_v59, 0.0 }
 0x302   : > { %v15761_v42 = vsel %vm10438_vm3, %v12084_v48, %v10470_v5  ;;  %v10471_v30 = vmul.f32 0.01, %v12085_v12  ;;  %vm10439_vm5 = vcmp.ge.f32.partialorder %v12085_v12, 0.0  ;;  %v15795_v26 = vsel %vm10442_vm8, %v12088_v19, %v10474_v17 }
 0x303   : > { %v10535_v1 = vsel %vm10533_vm4, %v15761_v42, 0.0  ;;  %v10543_v7 = vsel %vm10533_vm4, %v15795_v26, 0.0  ;;  %v10547_v48 = vsel %vm10533_vm4, %v15809_v11, 0.0  ;;  %v12096_v19 = vadd.f32 %v17086_v20, %v15751_v2 }
 0x304   : > { %v15779_v29 = vsel %vm10439_vm5, %v12085_v12, %v10471_v30  ;;  %v10536_v4 = vadd.f32 %v10535_v1, %v10534_v51  ;;  %v17084_v12 = vld [vmem:[#allocation29_spill] sm:$0xff]  ;;  %v10479_v30 = vmul.f32 0.01, %v12093_v59  ;;  %v10551_v51 = vsel %vm10533_vm4, %v15819_v3, 0.0 }
 0x305   : > { %v10537_v38 = vsel %vm10533_vm4, %v15779_v29, 0.0  ;;  %v12094_v6 = vadd.f32 %v17084_v12, %v15751_v2  ;;  %v10482_v56 = vmul.f32 0.01, %v12096_v19  ;;  %vm10450_vm0 = vcmp.ge.f32.partialorder %v12096_v19, 0.0 }
 0x306   : > { %v10538_v58 = vadd.f32 %v10537_v38, %v10536_v4  ;;  %v15827_v24 = vsel %vm10447_vm13, %v12093_v59, %v10479_v30  ;;  %vm10453_vm3 = vcmp.ge.f32.partialorder %v12099_v33, 0.0 }
 0x307   : > { %v10480_v1 = vmul.f32 0.01, %v12094_v6  ;;  %vm10448_vm14 = vcmp.ge.f32.partialorder %v12094_v6, 0.0  ;;  %v10553_v38 = vsel %vm10533_vm4, %v15827_v24, 0.0 }
 0x308   : > { %v10540_v50 = vadd.f32 %v10539_v27, %v10538_v58  ;;  %v17087_v27 = vld [vmem:[#allocation31_spill] sm:$0xff] }
 0x309   : > { %v15833_v58 = vsel %vm10448_vm14, %v12094_v6, %v10480_v1 }
 0x30a   : > { %v10542_v34 = vadd.f32 %v10541_v53, %v10540_v50  ;;  %v12097_v53 = vadd.f32 %v17087_v27, %v15751_v2  ;;  %v10555_v50 = vsel %vm10533_vm4, %v15833_v58, 0.0 }
 0x30c   : > { %v10544_v28 = vadd.f32 %v10543_v7, %v10542_v34  ;;  %v15843_v34 = vsel %vm10450_vm0, %v12096_v19, %v10482_v56  ;;  %v10483_v7 = vmul.f32 0.01, %v12097_v53  ;;  %vm10451_vm1 = vcmp.ge.f32.partialorder %v12097_v53, 0.0 }
 0x30e   : > { %v10546_v54 = vadd.f32 %v10545_v35, %v10544_v28  ;;  %v10559_v28 = vsel %vm10533_vm4, %v15843_v34, 0.0  ;;  %v15851_v44 = vsel %vm10451_vm1, %v12097_v53, %v10483_v7  ;;  %v10485_v35 = vmul.f32 0.01, %v12099_v33 }
 0x30f   : > { %v10561_v63 = vsel %vm10533_vm4, %v15851_v44, 0.0 }
 0x310   : > { %v10548_v5 = vadd.f32 %v10547_v48, %v10546_v54  ;;  %v12100_v54 = vadd.f32 %v15621_v52, %v15751_v2  ;;  %v15859_v59 = vsel %vm10453_vm3, %v12099_v33, %v10485_v35 }
 0x311   : > { %v10565_v52 = vsel %vm10533_vm4, %v15859_v59, 0.0 }
 0x312   : > { %v10550_v47 = vadd.f32 %v10549_v61, %v10548_v5  ;;  %v10486_v48 = vmul.f32 0.01, %v12100_v54  ;;  %vm10454_vm5 = vcmp.ge.f32.partialorder %v12100_v54, 0.0  ;;  %v12101_v61 = vadd.f32 %v15619_v31, %v15751_v2 }
 0x313   : > { %v10563_v5 = vsel %vm10533_vm4, %v15857_v22, 0.0 }
 0x314   : > { %v10552_v4 = vadd.f32 %v10551_v51, %v10550_v47  ;;  %v15867_v6 = vsel %vm10454_vm5, %v12100_v54, %v10486_v48  ;;  %v12102_v47 = vadd.f32 %v15627_v13, %v15751_v2  ;;  %v10487_v15 = vmul.f32 0.01, %v12101_v61 }
 0x315   : > { %vm10455_vm6 = vcmp.ge.f32.partialorder %v12101_v61, 0.0  ;;  %v10567_v31 = vsel %vm10533_vm4, %v15867_v6, 0.0 }
 0x316   : > { %v10554_v17 = vadd.f32 %v10553_v38, %v10552_v4  ;;  %v10488_v51 = vmul.f32 0.01, %v12102_v47  ;;  %v15875_v1 = vsel %vm10455_vm6, %v12101_v61, %v10487_v15  ;;  %vm10456_vm7 = vcmp.ge.f32.partialorder %v12102_v47, 0.0 }
 0x317   : > { %v10569_v13 = vsel %vm10533_vm4, %v15875_v1, 0.0 }
 0x318   : > { %v10556_v0 = vadd.f32 %v10555_v50, %v10554_v17  ;;  %v15881_v19 = vsel %vm10456_vm7, %v12102_v47, %v10488_v51 }
 0x319   : > { %v10571_v27 = vsel %vm10533_vm4, %v15881_v19, 0.0 }
 0x31a   : > { %v10558_v37 = vadd.f32 %v10557_v55, %v10556_v0 }
 0x31c   : > { %v10560_v62 = vadd.f32 %v10559_v28, %v10558_v37 }
 0x31d   : > { %v15743_v21 = vpop.f32.mrb[10].mxu0 }
 0x31e   : > { %v15745_v46 = vpop.f32.mrb[10].mxu1  ;;  %v15747_v41 = vpop.f32.mrb[11].mxu0  ;;  %v10562_v43 = vadd.f32 %v10561_v63, %v10560_v62  ;;  %v12103_v57 = vadd.f32 %v15743_v21, %v15751_v2 }
 0x31f   : > { %v15749_v36 = vpop.f32.mrb[11].mxu1  ;;  %v12104_v20 = vadd.f32 %v15747_v41, %v15751_v2  ;;  %v12105_v56 = vadd.f32 %v15745_v46, %v15751_v2 }
 0x320   : > { %v10564_v12 = vadd.f32 %v10563_v5, %v10562_v43  ;;  %v10489_v18 = vmul.f32 0.01, %v12103_v57  ;;  %vm10457_vm8 = vcmp.ge.f32.partialorder %v12103_v57, 0.0  ;;  %v12106_v55 = vadd.f32 %v15749_v36, %v15751_v2 }
 0x321   : > { %v10490_v17 = vmul.f32 0.01, %v12104_v20  ;;  %vm10458_vm9 = vcmp.ge.f32.partialorder %v12104_v20, 0.0  ;;  %v10491_v23 = vmul.f32 0.01, %v12105_v56  ;;  %vm10459_vm10 = vcmp.ge.f32.partialorder %v12105_v56, 0.0 }
 0x322   : > { %v10566_v30 = vadd.f32 %v10565_v52, %v10564_v12  ;;  %v15883_v38 = vsel %vm10457_vm8, %v12103_v57, %v10489_v18  ;;  %v10492_v37 = vmul.f32 0.01, %v12106_v55  ;;  %vm10460_vm11 = vcmp.ge.f32.partialorder %v12106_v55, 0.0 }
 0x323   : > { %v10573_v41 = vsel %vm10533_vm4, %v15883_v38, 0.0  ;;  %v15891_v50 = vsel %vm10458_vm9, %v12104_v20, %v10490_v17  ;;  %v15899_v7 = vsel %vm10459_vm10, %v12105_v56, %v10491_v23 }
 0x324   : > { %v10568_v4 = vadd.f32 %v10567_v31, %v10566_v30  ;;  %v10575_v46 = vsel %vm10533_vm4, %v15891_v50, 0.0  ;;  %v10577_v36 = vsel %vm10533_vm4, %v15899_v7, 0.0  ;;  %v15905_v62 = vsel %vm10460_vm11, %v12106_v55, %v10492_v37 }
 0x325   : > { %v10579_v43 = vsel %vm10533_vm4, %v15905_v62, 0.0 }
 0x326   : > { %v10570_v21 = vadd.f32 %v10569_v13, %v10568_v4 }
 0x328   : > { %v10572_v53 = vadd.f32 %v10571_v27, %v10570_v21 }
 0x32a   : > { %v10574_v0 = vadd.f32 %v10573_v41, %v10572_v53 }
 0x32c   : > { %v10576_v33 = vadd.f32 %v10575_v46, %v10574_v0 }
 0x377   : > { %v15771_v39 = vpop.f32.mrb[12].mxu0 }
 0x378   : > { %v15773_v60 = vpop.f32.mrb[12].mxu1  ;;  %v15775_v25 = vpop.f32.mrb[13].mxu0  ;;  %v12107_v10 = vadd.f32 %v15771_v39, %v15751_v2  ;;  %v10578_v39 = vadd.f32 %v10577_v36, %v10576_v33 }
 0x379   : > { %v15777_v14 = vpop.f32.mrb[13].mxu1  ;;  %v12108_v49 = vadd.f32 %v15775_v25, %v15751_v2  ;;  %v12109_v63 = vadd.f32 %v15773_v60, %v15751_v2 }
 0x37a   : > { %v10493_v28 = vmul.f32 0.01, %v12107_v10  ;;  %vm10461_vm12 = vcmp.ge.f32.partialorder %v12107_v10, 0.0  ;;  %v10580_v48 = vadd.f32 %v10579_v43, %v10578_v39  ;;  %v12110_v5 = vadd.f32 %v15777_v14, %v15751_v2 }
 0x37b   : > { %v10494_v54 = vmul.f32 0.01, %v12108_v49  ;;  %vm10462_vm13 = vcmp.ge.f32.partialorder %v12108_v49, 0.0  ;;  %v10495_v12 = vmul.f32 0.01, %v12109_v63  ;;  %vm10463_vm14 = vcmp.ge.f32.partialorder %v12109_v63, 0.0 }
 0x37c   : > { %v15907_v35 = vsel %vm10461_vm12, %v12107_v10, %v10493_v28  ;;  %v10496_v30 = vmul.f32 0.01, %v12110_v5  ;;  %vm10464_vm15 = vcmp.ge.f32.partialorder %v12110_v5, 0.0 }
 0x37d   : > { %v10581_v25 = vsel %vm10533_vm4, %v15907_v35, 0.0  ;;  %v15915_v61 = vsel %vm10462_vm13, %v12108_v49, %v10494_v54  ;;  %v15921_v60 = vsel %vm10463_vm14, %v12109_v63, %v10495_v12 }
 0x37e   : > { %v10582_v52 = vadd.f32 %v10581_v25, %v10580_v48  ;;  %v10583_v47 = vsel %vm10533_vm4, %v15915_v61, 0.0  ;;  %v10585_v57 = vsel %vm10533_vm4, %v15921_v60, 0.0  ;;  %v15925_v31 = vsel %vm10464_vm15, %v12110_v5, %v10496_v30 }
 0x37f   : > { %v10587_v56 = vsel %vm10533_vm4, %v15925_v31, 0.0 }
 0x380   : > { %v10584_v15 = vadd.f32 %v10583_v47, %v10582_v52 }
 0x382   : > { %v10586_v4 = vadd.f32 %v10585_v57, %v10584_v15 }
 0x384   : > { %v10588_v0 = vadd.f32 %v10587_v56, %v10586_v4 }
 0x3d1   : > { %v9811_v51 = vpop.f32.mrb[14].mxu0 }
 0x3d2   : > { %v12111_v14 = vadd.f32 %v9811_v51, %v15751_v2  ;;  %v10432_v18 = vpop.f32.mrb[14].mxu1  ;;  %v9813_v20 = vpop.f32.mrb[15].mxu0 }
 0x3d3   : > { %v12113_v13 = vadd.f32 %v10432_v18, %v15751_v2  ;;  %v12112_v21 = vadd.f32 %v9813_v20, %v15751_v2  ;;  %v10434_v17 = vpop.f32.mrb[15].mxu1 }
 0x3d4   : > { %vm10465_vm0 = vcmp.ge.f32.partialorder %v12111_v14, 0.0  ;;  %v10497_v27 = vmul.f32 0.01, %v12111_v14  ;;  %v12114_v41 = vadd.f32 %v10434_v17, %v15751_v2 }
 0x3d5   : > { %vm10467_vm1 = vcmp.ge.f32.partialorder %v12113_v13, 0.0  ;;  %v10499_v53 = vmul.f32 0.01, %v12113_v13  ;;  %vm10466_vm2 = vcmp.ge.f32.partialorder %v12112_v21, 0.0  ;;  %v10498_v55 = vmul.f32 0.01, %v12112_v21 }
 0x3d6   : > { %v15933_v23 = vsel %vm10465_vm0, %v12111_v14, %v10497_v27  ;;  %v10500_v10 = vmul.f32 0.01, %v12114_v41  ;;  %vm10468_vm3 = vcmp.ge.f32.partialorder %v12114_v41, 0.0 }
 0x3d7   : > { %v10589_v46 = vsel %vm10533_vm4, %v15933_v23, 0.0  ;;  %v15937_v37 = vsel %vm10466_vm2, %v12112_v21, %v10498_v55  ;;  %v15939_v28 = vsel %vm10467_vm1, %v12113_v13, %v10499_v53 }
 0x3d8   : > { %v10590_v33 = vadd.f32 %v10589_v46, %v10588_v0  ;;  %v10591_v2 = vsel %vm10533_vm4, %v15937_v37, 0.0  ;;  %v15943_v49 = vsel %vm10468_vm3, %v12114_v41, %v10500_v10  ;;  %v10593_v39 = vsel %vm10533_vm4, %v15939_v28, 0.0 }
 0x3d9   : > { %v10595_v63 = vsel %vm10533_vm4, %v15943_v49, 0.0 }
 0x3da   : > { %v10592_v36 = vadd.f32 %v10591_v2, %v10590_v33 }
 0x3dc   : > { %v10594_v54 = vadd.f32 %v10593_v39, %v10592_v36 }
 0x3de   : > { %v10596_v43 = vadd.f32 %v10595_v63, %v10594_v54 }
 0x3e0   : > { %10597 = vadd.xlane.f32.xlu0 %v10596_v43 }
 0x46d   : > { %v10598_v25 = vpop.xlane.xlu0 %10597 }
 0x46e   : > { %v15949_v48 = vmul.f32 0.00024414063, %v10598_v25 }
 0x470   : > { %v15953_v5 = vsub.f32 %v15759_v9, %v15949_v48  ;;  %v15957_v52 = vsub.f32 %v15761_v42, %v15949_v48  ;;  %v15961_v12 = vsub.f32 %v15779_v29, %v15949_v48  ;;  %v15965_v47 = vsub.f32 %v15785_v16, %v15949_v48 }
 0x471   : > { %v15973_v9 = vsub.f32 %v15787_v32, %v15949_v48  ;;  %v15979_v29 = vsub.f32 %v15795_v26, %v15949_v48  ;;  %v15987_v14 = vsub.f32 %v15803_v8, %v15949_v48  ;;  %v15994_v26 = vsub.f32 %v15809_v11, %v15949_v48 }
 0x472   : > { %v10633_v30 = vmul.f32 %v15953_v5, %v15953_v5  ;;  %v10634_v15 = vmul.f32 %v15957_v52, %v15957_v52  ;;  %v10635_v42 = vmul.f32 %v15961_v12, %v15961_v12  ;;  %v10636_v16 = vmul.f32 %v15965_v47, %v15965_v47 }
 0x473   : > { %v10637_v32 = vmul.f32 %v15973_v9, %v15973_v9  ;;  %v10638_v13 = vmul.f32 %v15979_v29, %v15979_v29  ;;  %v16001_v8 = vsub.f32 %v15811_v45, %v15949_v48  ;;  %v10639_v56 = vmul.f32 %v15987_v14, %v15987_v14 }
 0x474   : > { %v10665_v57 = vsel %vm10533_vm4, %v10633_v30, 0.0  ;;  %v10666_v51 = vsel %vm10533_vm4, %v10634_v15, 0.0  ;;  %v10668_v18 = vsel %vm10533_vm4, %v10635_v42, 0.0  ;;  %v10670_v21 = vsel %vm10533_vm4, %v10636_v16, 0.0 }
 0x475   : > { %v10667_v4 = vadd.f32 %v10666_v51, %v10665_v57  ;;  %v10672_v27 = vsel %vm10533_vm4, %v10637_v32, 0.0  ;;  %v16008_v11 = vsub.f32 %v15819_v3, %v15949_v48  ;;  %v10640_v53 = vmul.f32 %v15994_v26, %v15994_v26 }
 0x476   : > { %v10674_v55 = vsel %vm10533_vm4, %v10638_v13, 0.0  ;;  %v16015_v45 = vsub.f32 %v15827_v24, %v15949_v48  ;;  %v10641_v10 = vmul.f32 %v16001_v8, %v16001_v8  ;;  %v10676_v46 = vsel %vm10533_vm4, %v10639_v56, 0.0 }
 0x477   : > { %v10669_v20 = vadd.f32 %v10668_v18, %v10667_v4  ;;  %v16022_v3 = vsub.f32 %v15833_v58, %v15949_v48  ;;  %v10642_v2 = vmul.f32 %v16008_v11, %v16008_v11  ;;  %v10678_v36 = vsel %vm10533_vm4, %v10640_v53, 0.0 }
 0x478   : > { %v16029_v24 = vsub.f32 %v15835_v40, %v15949_v48  ;;  %v10643_v54 = vmul.f32 %v16015_v45, %v16015_v45  ;;  %v10680_v63 = vsel %vm10533_vm4, %v10641_v10, 0.0  ;;  %v16036_v58 = vsub.f32 %v15843_v34, %v15949_v48 }
 0x479   : > { %v10671_v17 = vadd.f32 %v10670_v21, %v10669_v20  ;;  %v10644_v25 = vmul.f32 %v16022_v3, %v16022_v3  ;;  %v10682_v30 = vsel %vm10533_vm4, %v10642_v2, 0.0  ;;  %v16043_v40 = vsub.f32 %v15851_v44, %v15949_v48 }
 0x47a   : > { %v10645_v42 = vmul.f32 %v16029_v24, %v16029_v24  ;;  %v10684_v16 = vsel %vm10533_vm4, %v10643_v54, 0.0  ;;  %v16050_v34 = vsub.f32 %v15857_v22, %v15949_v48  ;;  %v10646_v51 = vmul.f32 %v16036_v58, %v16036_v58 }
 0x47b   : > { %v10673_v41 = vadd.f32 %v10672_v27, %v10671_v17  ;;  %v10686_v4 = vsel %vm10533_vm4, %v10644_v25, 0.0  ;;  %v16057_v44 = vsub.f32 %v15859_v59, %v15949_v48  ;;  %v10647_v18 = vmul.f32 %v16043_v40, %v16043_v40 }
 0x47c   : > { %v10688_v20 = vsel %vm10533_vm4, %v10645_v42, 0.0  ;;  %v16064_v22 = vsub.f32 %v15867_v6, %v15949_v48  ;;  %v10648_v21 = vmul.f32 %v16050_v34, %v16050_v34  ;;  %v10690_v17 = vsel %vm10533_vm4, %v10646_v51, 0.0 }
 0x47d   : > { %v10675_v0 = vadd.f32 %v10674_v55, %v10673_v41  ;;  %v16071_v59 = vsub.f32 %v15875_v1, %v15949_v48  ;;  %v10649_v27 = vmul.f32 %v16057_v44, %v16057_v44  ;;  %v10692_v41 = vsel %vm10533_vm4, %v10647_v18, 0.0 }
 0x47e   : > { %v16078_v6 = vsub.f32 %v15881_v19, %v15949_v48  ;;  %v10650_v55 = vmul.f32 %v16064_v22, %v16064_v22  ;;  %v16085_v1 = vsub.f32 %v15883_v38, %v15949_v48  ;;  %v16092_v19 = vsub.f32 %v15891_v50, %v15949_v48 }
 0x47f   : > { %v10677_v33 = vadd.f32 %v10676_v46, %v10675_v0  ;;  %v10694_v0 = vsel %vm10533_vm4, %v10648_v21, 0.0  ;;  %v10651_v46 = vmul.f32 %v16071_v59, %v16071_v59  ;;  %v16099_v38 = vsub.f32 %v15899_v7, %v15949_v48 }
 0x480   : > { %v16106_v50 = vsub.f32 %v15905_v62, %v15949_v48  ;;  %v16113_v7 = vsub.f32 %v15907_v35, %v15949_v48  ;;  %v16120_v62 = vsub.f32 %v15915_v61, %v15949_v48  ;;  %v16127_v35 = vsub.f32 %v15921_v60, %v15949_v48 }
 0x481   : > { %v10679_v39 = vadd.f32 %v10678_v36, %v10677_v33  ;;  %v10696_v33 = vsel %vm10533_vm4, %v10649_v27, 0.0  ;;  %v10652_v36 = vmul.f32 %v16078_v6, %v16078_v6  ;;  %v16134_v61 = vsub.f32 %v15925_v31, %v15949_v48 }
 0x482   : > { %v10629_v60 = vsub.f32 %v15933_v23, %v15949_v48 }
 0x483   : > { %v10681_v43 = vadd.f32 %v10680_v63, %v10679_v39  ;;  %v10698_v39 = vsel %vm10533_vm4, %v10650_v55, 0.0  ;;  %v10653_v63 = vmul.f32 %v16085_v1, %v16085_v1  ;;  %v10660_v31 = vmul.f32 %v16134_v61, %v16134_v61 }
 0x485   : > { %v10683_v15 = vadd.f32 %v10682_v30, %v10681_v43  ;;  %v10700_v43 = vsel %vm10533_vm4, %v10651_v46, 0.0  ;;  %v10654_v30 = vmul.f32 %v16092_v19, %v16092_v19 }
 0x487   : > { %v10685_v57 = vadd.f32 %v10684_v16, %v10683_v15  ;;  %v10702_v15 = vsel %vm10533_vm4, %v10652_v36, 0.0  ;;  %v10655_v16 = vmul.f32 %v16099_v38, %v16099_v38 }
 0x489   : > { %v10687_v32 = vadd.f32 %v10686_v4, %v10685_v57  ;;  %v10704_v57 = vsel %vm10533_vm4, %v10653_v63, 0.0  ;;  %v10656_v4 = vmul.f32 %v16106_v50, %v16106_v50  ;;  %v10718_v63 = vsel %vm10533_vm4, %v10660_v31, 0.0 }
 0x48b   : > { %v10689_v13 = vadd.f32 %v10688_v20, %v10687_v32  ;;  %v10706_v32 = vsel %vm10533_vm4, %v10654_v30, 0.0  ;;  %v10657_v20 = vmul.f32 %v16113_v7, %v16113_v7 }
 0x48d   : > { %v10691_v56 = vadd.f32 %v10690_v17, %v10689_v13  ;;  %v10708_v13 = vsel %vm10533_vm4, %v10655_v16, 0.0  ;;  %v10658_v17 = vmul.f32 %v16120_v62, %v16120_v62 }
 0x48f   : > { %v10693_v53 = vadd.f32 %v10692_v41, %v10691_v56  ;;  %v10710_v56 = vsel %vm10533_vm4, %v10656_v4, 0.0  ;;  %v10659_v41 = vmul.f32 %v16127_v35, %v16127_v35 }
 0x491   : > { %v10695_v10 = vadd.f32 %v10694_v0, %v10693_v53  ;;  %v10712_v53 = vsel %vm10533_vm4, %v10657_v20, 0.0  ;;  %v10630_v0 = vsub.f32 %v15937_v37, %v15949_v48  ;;  %v10716_v23 = vsel %vm10533_vm4, %v10659_v41, 0.0 }
 0x493   : > { %v10697_v2 = vadd.f32 %v10696_v33, %v10695_v10  ;;  %v10714_v10 = vsel %vm10533_vm4, %v10658_v17, 0.0  ;;  %v10631_v33 = vsub.f32 %v15939_v28, %v15949_v48 }
 0x495   : > { %v10699_v54 = vadd.f32 %v10698_v39, %v10697_v2  ;;  %v10661_v2 = vmul.f32 %v10629_v60, %v10629_v60  ;;  %v10632_v39 = vsub.f32 %v15943_v49, %v15949_v48 }
 0x497   : > { %v10701_v25 = vadd.f32 %v10700_v43, %v10699_v54  ;;  %v10662_v54 = vmul.f32 %v10630_v0, %v10630_v0  ;;  %v10663_v43 = vmul.f32 %v10631_v33, %v10631_v33 }
 0x499   : > { %v10703_v42 = vadd.f32 %v10702_v15, %v10701_v25  ;;  %v10720_v25 = vsel %vm10533_vm4, %v10661_v2, 0.0  ;;  %v10664_v15 = vmul.f32 %v10632_v39, %v10632_v39  ;;  %v10724_v16 = vsel %vm10533_vm4, %v10663_v43, 0.0 }
 0x49b   : > { %v10705_v51 = vadd.f32 %v10704_v57, %v10703_v42  ;;  %v10722_v42 = vsel %vm10533_vm4, %v10662_v54, 0.0 }
 0x49d   : > { %v10707_v18 = vadd.f32 %v10706_v32, %v10705_v51  ;;  %v10726_v51 = vsel %vm10533_vm4, %v10664_v15, 0.0 }
 0x49f   : > { %v10709_v21 = vadd.f32 %v10708_v13, %v10707_v18 }
 0x4a1   : > { %v10711_v27 = vadd.f32 %v10710_v56, %v10709_v21 }
 0x4a3   : > { %v10713_v55 = vadd.f32 %v10712_v53, %v10711_v27 }
 0x4a5   : > { %v10715_v46 = vadd.f32 %v10714_v10, %v10713_v55 }
 0x4a7   : > { %v10717_v36 = vadd.f32 %v10716_v23, %v10715_v46 }
 0x4a9   : > { %v10719_v37 = vadd.f32 %v10718_v63, %v10717_v36 }
 0x4ab   : > { %v10721_v30 = vadd.f32 %v10720_v25, %v10719_v37 }
 0x4ad   : > { %v10723_v28 = vadd.f32 %v10722_v42, %v10721_v30 }
 0x4af   : > { %v10725_v57 = vadd.f32 %v10724_v16, %v10723_v28 }
 0x4b1   : > { %v10727_v4 = vadd.f32 %v10726_v51, %v10725_v57 }
 0x4b3   : > { %10728 = vadd.xlane.f32.xlu1 %v10727_v4 }
 0x540   : > { %v10729_v49 = vpop.xlane.xlu1 %10728 }
 0x541   : > { %v10730_v48 = vmul.f32 0.00024414063, %v10729_v49 }
 0x543   : > { %v10731_v32 = vadd.f32 1e-05, %v10730_v48 }
 0x545   : > { %12318 = vrsqrt.f32 %v10731_v32 }
 0x54f   : > { %v12319_v18 = vpop.eup %12318 }
 0x550   : > { %v10733_v20 = vmul.f32 %v12319_v18, %v15953_v5  ;;  %v10734_v13 = vmul.f32 %v12319_v18, %v15957_v52  ;;  %v10735_v21 = vmul.f32 %v12319_v18, %v15961_v12  ;;  %v10736_v17 = vmul.f32 %v12319_v18, %v15965_v47 }
 0x551   : > { %v10737_v56 = vmul.f32 %v12319_v18, %v15973_v9  ;;  %v10738_v27 = vmul.f32 %v12319_v18, %v15979_v29  ;;  %v10739_v41 = vmul.f32 %v12319_v18, %v15987_v14  ;;  %v10740_v53 = vmul.f32 %v12319_v18, %v15994_v26 }
 0x552   : > { %v10741_v55 = vmul.f32 %v12319_v18, %v16001_v8  ;;  %v10742_v5 = vmul.f32 %v12319_v18, %v16008_v11  ;;  %v10743_v52 = vmul.f32 %v12319_v18, %v16015_v45  ;;  %v10744_v12 = vmul.f32 %v12319_v18, %v16022_v3 }
 0x553   : > { %v10745_v47 = vmul.f32 %v12319_v18, %v16029_v24  ;;  %v10746_v9 = vmul.f32 %v12319_v18, %v16036_v58  ;;  %v10747_v29 = vmul.f32 %v12319_v18, %v16043_v40  ;;  %v10748_v14 = vmul.f32 %v12319_v18, %v16050_v34 }
 0x554   : > { %v10749_v26 = vmul.f32 %v12319_v18, %v16057_v44  ;;  %v10750_v31 = vmul.f32 %v12319_v18, %v16064_v22  ;;  %v10751_v8 = vmul.f32 %v12319_v18, %v16071_v59  ;;  %v10752_v11 = vmul.f32 %v12319_v18, %v16078_v6 }
 0x555   : > { %v10753_v45 = vmul.f32 %v12319_v18, %v16085_v1  ;;  %v10754_v3 = vmul.f32 %v12319_v18, %v16092_v19  ;;  %v10755_v24 = vmul.f32 %v12319_v18, %v16099_v38  ;;  %v10756_v58 = vmul.f32 %v12319_v18, %v16106_v50 }
 0x556   : > { %v10757_v40 = vmul.f32 %v12319_v18, %v16113_v7  ;;  %v10758_v34 = vmul.f32 %v12319_v18, %v16120_v62  ;;  %v10759_v44 = vmul.f32 %v12319_v18, %v16127_v35  ;;  %v10760_v22 = vmul.f32 %v12319_v18, %v16134_v61 }
 0x557   : > { %v10761_v59 = vmul.f32 %v12319_v18, %v10629_v60  ;;  %v10762_v6 = vmul.f32 %v12319_v18, %v10630_v0  ;;  %v10763_v10 = vmul.f32 %v12319_v18, %v10631_v33  ;;  %v10764_v1 = vmul.f32 %v12319_v18, %v10632_v39 }
 0x558   : > { %v10797_v46 = vcombine.low %v10733_v20, %v10734_v13  ;;  %v10798_v2 = vcombine.low %v10735_v21, %v10736_v17  ;;  %v10799_v19 = vcombine.low %v10737_v56, %v10738_v27  ;;  %v10800_v23 = vcombine.low %v10739_v41, %v10740_v53 }
 0x559   : > { %v10801_v38 = vcombine.low %v10741_v55, %v10742_v5  ;;  %v10802_v50 = vcombine.low %v10743_v52, %v10744_v12  ;;  %v10803_v7 = vcombine.low %v10745_v47, %v10746_v9  ;;  %v10804_v62 = vcombine.low %v10747_v29, %v10748_v14 }
 0x55a   : > { %v10805_v35 = vcombine.low %v10749_v26, %v10750_v31  ;;  %v10806_v61 = vcombine.low %v10751_v8, %v10752_v11  ;;  %v10807_v60 = vcombine.low %v10753_v45, %v10754_v3  ;;  %v10808_v0 = vcombine.low %v10755_v24, %v10756_v58  ;;  %10829 = vst [vmem:[%s16194_s9] sm:$0xff] %v10797_v46 }
 0x55b   : > { %10830 = vst [vmem:[%s16194_s9 + $0x8] sm:$0xff] %v10798_v2  ;;  %10831 = vst [vmem:[%s16194_s9 + $0x10] sm:$0xff] %v10799_v19  ;;  %v10809_v33 = vcombine.low %v10757_v40, %v10758_v34  ;;  %v10810_v36 = vcombine.low %v10759_v44, %v10760_v22  ;;  %v10811_v39 = vcombine.low %v10761_v59, %v10762_v6 }
 0x55c   : > { %10832 = vst [vmem:[%s16194_s9 + $0x18] sm:$0xff] %v10800_v23  ;;  %v10812_v54 = vcombine.low %v10763_v10, %v10764_v1  ;;  %10833 = vst [vmem:[%s16194_s9 + $0x20] sm:$0xff] %v10801_v38 }
 0x55d   : > { %10834 = vst [vmem:[%s16194_s9 + $0x28] sm:$0xff] %v10802_v50  ;;  %10835 = vst [vmem:[%s16194_s9 + $0x30] sm:$0xff] %v10803_v7 }
 0x55e   : > { %10836 = vst [vmem:[%s16194_s9 + $0x38] sm:$0xff] %v10804_v62  ;;  %10837 = vst [vmem:[%s16194_s9 + $0x40] sm:$0xff] %v10805_v35 }
 0x55f   : > { %10838 = vst [vmem:[%s16194_s9 + $0x48] sm:$0xff] %v10806_v61  ;;  %10839 = vst [vmem:[%s16194_s9 + $0x50] sm:$0xff] %v10807_v60 }
 0x560   : > { %10840 = vst [vmem:[%s16194_s9 + $0x58] sm:$0xff] %v10808_v0  ;;  %10841 = vst [vmem:[%s16194_s9 + $0x60] sm:$0xff] %v10809_v33 }
 0x561   : > { %10842 = vst [vmem:[%s16194_s9 + $0x68] sm:$0xff] %v10810_v36  ;;  %10843 = vst [vmem:[%s16194_s9 + $0x70] sm:$0xff] %v10811_v39 }
 0x562   : > { %10844 = vst [vmem:[%s16194_s9 + $0x78] sm:$0xff] %v10812_v54 }
 0x563   : > { %12333 = shalt.err (!%p12330_p3)
}
 0x564   : > { %s12334_s27 = scalar_lea.hbm %s16208_s17, 2048  ;;  %s12338_s30 = scalar_lea.hbm %s16263_s3, 4096 }
 0x565   : > { %p12335_p4 = scmp.ne.s32.totalorder %s16208_s17, %s12334_s27  ;;  %p12339_p9 = scmp.lt.u32.totalorder %s16208_s17, %s16263_s3 }
 0x566   : > { %p12340_p10 = scmp.lt.u32.totalorder %s12338_s30, %s12334_s27  ;;  %p12342_p12 = scmp.lt.u32.totalorder %s12334_s27, %s16208_s17 }
 0x567   : > { %p12336_p7 = pnand %p12335_p4, %p12445_p5 }
 0x568   : > { %p12341_p11 = por %p12340_p10, %p12339_p9 }
 0x569   : > { %p12337_p8 = pneg %p12336_p7 }
 0x56a   : > { %p12343_p13 = por %p12342_p12, %p12341_p11 }
 0x56c   : > { %p12344_p0 = pnand %p12343_p13, %p12337_p8 }
 0x56e   : > { %12347 = shalt.err (!%p12344_p0)
}
 0x56f   : > { %12276 = dma.vmem_to_hbm [thread:$0]  (%p12445_p5), %s16210_s10, 2048, %s16208_s17, %s10846_s19  }
 0x570 PF: > { %p12282_p1 = scmp.ge.s32.totalorder %s12382_s15, 2  ;;  %s10872_s6 = sand.u32 1, %s12370_s12  }
 0x571   : > { %s10873_s7 = scalar_lea.sflag [#allocation3], %s10872_s6 }
 0x572   : > { %p12279_p2 = pnand %p12282_p1, %p12449_p6 }
 0x574   : > { %12365 = dma.done.wait (!%p12279_p2), %s10873_s7, 2048  }
 0x575   : > { %12367 = vsyncadd (!%p12279_p2), %s10873_s7, 4294965248  ;;  %p13_p3 = scmp.ge.s32.totalorder %s12432_s18, 4   ;;  %s17089_s12 = smov %s12374_s13 }
 0x576   : > { %s17090_s13 = smov %s12378_s14  ;;  %s17091_s14 = smov %s12443_s21 }
 0x577   : > { %s17092_s15 = smov %s12432_s18  ;;  %15 = sbr.rel (!%p13_p3) target bundleno = 3 (0x3), region = 67 }
 0x57e   :  { %10878 = vsyncpa [#allocation3], 1 }
 0x57f   :  { %10880 = vsyncpa [#allocation3 + $0x1], 1 }

</bundles_post_ra>
